<compile_context>
chip_gen: v6e
topology: v6e:2x2x1
jax: 0.10.0
libtpu: 0.0.40
codegen_flags: <defaults>
</compile_context>

<pallas_src>
import functools
import math

import jax
import jax.numpy as jnp
import numpy as np
from jax import lax
from jax.experimental import pallas as pl
from jax.experimental.pallas import tpu as pltpu


def _layer_norm(x, gamma, beta, eps=1e-5):
    mean = jnp.mean(x, axis=-1, keepdims=True)
    var = jnp.mean(jnp.square(x - mean), axis=-1, keepdims=True)
    return (x - mean) * lax.rsqrt(var + eps) * gamma + beta


def _gelu_exact(x):
    # nn.GELU() default is the exact erf formulation.
    return 0.5 * x * (1.0 + lax.erf(x * (1.0 / math.sqrt(2.0))))


def mhsa_kernel(x_ref, vecs_ref, wqkv_ref, bqkv_ref, wo_ref,
                w1_ref, bm1_ref, w2_ref, o_ref, *, num_heads):
    nb, L, C = x_ref.shape                      # nb = batch rows in this block
    hd = C // num_heads

    # Fold the block's batch dim into sublanes for all dense / elementwise work.
    x = x_ref[...].reshape(nb * L, C)           # (nb*L, C) float32

    vecs = vecs_ref[...]                        # packed (6, C) small params, f32
    g1, b1 = vecs[0:1, :], vecs[1:2, :]
    bo = vecs[2:3, :]
    g2, b2 = vecs[3:4, :], vecs[4:5, :]
    bm2 = vecs[5:6, :]

    # ---- norm1 (f32) ----
    xn = _layer_norm(x, g1, b1)
    xn_bf = xn.astype(jnp.bfloat16)             # MXU operand only

    # ---- fused QKV projection (bf16 x bf16 -> f32; scale folded into Q) ----
    qkv = jnp.dot(xn_bf, wqkv_ref[...],
                  preferred_element_type=jnp.float32) + bqkv_ref[...]   # (nb*L, 3C) f32
    qkv_bf = qkv.astype(jnp.bfloat16)

    wo = wo_ref[...]                            # (C, C) bf16

    # ---- multi-head self-attention (Q = K = V = xn) ----
    attn_rows = []
    for b in range(nb):                         # static, tiny (1 or B)
        r0 = b * L
        acc = jnp.zeros((L, C), jnp.float32)
        for h in range(num_heads):              # static unroll (num_heads small)
            c0 = h * hd
            qh = qkv_bf[r0:r0 + L, c0:c0 + hd]                   # (L, hd), pre-scaled
            kh = qkv_bf[r0:r0 + L, C + c0:C + c0 + hd]           # (L, hd)
            vh = qkv_bf[r0:r0 + L, 2 * C + c0:2 * C + c0 + hd]   # (L, hd)
            # scores = qh @ kh^T without an explicit transpose (bf16 -> f32 acc)
            s = lax.dot_general(qh, kh, (((1,), (1,)), ((), ())),
                                preferred_element_type=jnp.float32)  # (L, L) f32
            s = s - jnp.max(s, axis=-1, keepdims=True)
            p = jnp.exp(s)
            p = p * pl.reciprocal(jnp.sum(p, axis=-1, keepdims=True), approx=True)
            # Standard P @ V_h: (L,L)@(L,hd) — num_heads x fewer MACs than the
            # old distributed-Wo form.
            oh = jnp.dot(p.astype(jnp.bfloat16), vh,
                         preferred_element_type=jnp.float32)         # (L, hd) f32
            # Output projection contribution of this head: o_h @ Wo[h-rows].
            # Algebraically identical to concat(heads) @ Wo, but only needs a
            # sublane-aligned row slice of Wo (no lane-narrow concat).
            acc = acc + jnp.dot(oh.astype(jnp.bfloat16), wo[c0:c0 + hd, :],
                                preferred_element_type=jnp.float32)  # (L, C)
        attn_rows.append(acc)
    attn = attn_rows[0] if nb == 1 else jnp.concatenate(attn_rows, axis=0)  # (nb*L, C)
    attn = attn + bo

    # residual on the normed input (matches the PyTorch forward exactly)
    x1 = xn + attn

    # ---- MLP block (LN/GELU in f32, matmuls bf16 -> f32 acc) ----
    x2n = _layer_norm(x1, g2, b2)
    h1 = jnp.dot(x2n.astype(jnp.bfloat16), w1_ref[...],
                 preferred_element_type=jnp.float32) + bm1_ref[...]
    h1 = _gelu_exact(h1)
    h2 = jnp.dot(h1.astype(jnp.bfloat16), w2_ref[...],
                 preferred_element_type=jnp.float32) + bm2

    o_ref[...] = (x1 + h2).reshape(nb, L, C)


def pack_params(params, num_heads):
    """Host-side constant folding / packing of the raw (torch-style) params."""
    C = params['g1'].shape[-1]
    hd = C // num_heads
    scale = 1.0 / math.sqrt(hd)
    # Fused QKV weight/bias with the attention scale folded into Q; big
    # weights stored bf16 so the MXU sees native-rate operands and weight DMA
    # bytes are halved.  Biases / LN vectors stay f32 (added post-accumulation).
    wqkv_t = jnp.concatenate(
        [params['wq_t'] * scale, params['wk_t'], params['wv_t']],
        axis=1).astype(jnp.bfloat16)                                       # (C, 3C) bf16
    bqkv = jnp.concatenate(
        [params['bq'] * scale, params['bk'], params['bv']], axis=1)        # (1, 3C) f32
    vecs = jnp.concatenate(
        [params['g1'], params['b1'], params['bo'],
         params['g2'], params['b2'], params['bm2']], axis=0)               # (6, C) f32
    return {'vecs': vecs, 'wqkv_t': wqkv_t, 'bqkv': bqkv,
            'wo_t': params['wo_t'].astype(jnp.bfloat16),
            'w1_t': params['w1_t'].astype(jnp.bfloat16),
            'bm1': params['bm1'],
            'w2_t': params['w2_t'].astype(jnp.bfloat16)}


def _num_tensorcores():
    """TensorCores per chip, probed robustly (no bare device_kind sniffing)."""
    try:
        info = pltpu.get_tpu_info()
        for attr in ("num_cores", "core_count", "num_tensorcores",
                     "tensor_cores_per_chip", "cores_per_chip",
                     "num_cores_per_chip"):
            v = getattr(info, attr, None)
            if v:
                return int(v)
    except Exception:
        pass
    try:
        d = jax.devices()[0]
        v = getattr(d, "num_cores", None)
        if v:
            return int(v)
        if "v7" in d.device_kind.lower():
            return 2
    except Exception:
        pass
    return 1


def _default_block_batch(B):
    # Multi-TensorCore chips (v7x): per-batch "parallel" grid so both TCs get
    # work.  Single-TC chips (v5e/v6e): one grid step with M = B*L rows for
    # better MXU fill and no per-step overhead.
    if B > 1 and _num_tensorcores() > 1:
        return 1
    return B


def mhsa_forward(x_nchw, params, num_heads, *, block_batch=None):
    B, C, H, W = x_nchw.shape
    L = H * W
    # Note: the NCHW <-> (B, L, C) layout change is left to XLA in the wrapper
    # (negligible at this size; could be folded into the kernel as an in-tile
    # transpose if H*W grows large).
    x = x_nchw.reshape(B, C, L).transpose(0, 2, 1)          # (B, L, C)

    if block_batch is None:
        block_batch = _default_block_batch(B)
    assert B % block_batch == 0

    pp = pack_params(params, num_heads)
    param_arrays = [pp['vecs'], pp['wqkv_t'], pp['bqkv'], pp['wo_t'],
                    pp['w1_t'], pp['bm1'], pp['w2_t']]

    in_specs = [pl.BlockSpec((block_batch, L, C), lambda b: (b, 0, 0))]
    for a in param_arrays:                                  # all packed params are 2D
        in_specs.append(pl.BlockSpec(a.shape, lambda b: (0, 0)))

    out = pl.pallas_call(
        functools.partial(mhsa_kernel, num_heads=num_heads),
        out_shape=jax.ShapeDtypeStruct((B, L, C), x.dtype),
        grid=(B // block_batch,),
        in_specs=in_specs,
        out_specs=pl.BlockSpec((block_batch, L, C), lambda b: (b, 0, 0)),
        compiler_params=pltpu.CompilerParams(
            dimension_semantics=("parallel",),
            vmem_limit_bytes=32 * 1024 * 1024),
    )(x, *param_arrays)

    return out.transpose(0, 2, 1).reshape(B, C, H, W)


def mhsa_reference(x_nchw, p, num_heads):
    """Pure-JAX reference matching torch semantics (uses the raw f32 params)."""
    B, C, H, W = x_nchw.shape
    L = H * W
    x = x_nchw.reshape(B, C, L).transpose(0, 2, 1)           # (B, L, C)

    def ln(y, g, b):
        m = y.mean(-1, keepdims=True)
        v = jnp.square(y - m).mean(-1, keepdims=True)
        return (y - m) / jnp.sqrt(v + 1e-5) * g + b

    xn = ln(x, p['g1'], p['b1'])
    q = xn @ p['wq_t'] + p['bq']
    k = xn @ p['wk_t'] + p['bk']
    v = xn @ p['wv_t'] + p['bv']
    hd = C // num_heads
    qh = q.reshape(B, L, num_heads, hd).transpose(0, 2, 1, 3)
    kh = k.reshape(B, L, num_heads, hd).transpose(0, 2, 1, 3)
    vh = v.reshape(B, L, num_heads, hd).transpose(0, 2, 1, 3)
    s = jnp.einsum('bhqd,bhkd->bhqk', qh, kh) / math.sqrt(hd)
    pa = jax.nn.softmax(s, axis=-1)
    o = jnp.einsum('bhqk,bhkd->bhqd', pa, vh).transpose(0, 2, 1, 3).reshape(B, L, C)
    attn = o @ p['wo_t'] + p['bo']
    x1 = xn + attn
    x2n = ln(x1, p['g2'], p['b2'])
    h1 = jax.nn.gelu(x2n @ p['w1_t'] + p['bm1'], approximate=False)
    h2 = h1 @ p['w2_t'] + p['bm2']
    out = x1 + h2
    return out.transpose(0, 2, 1).reshape(B, C, H, W)


def init_params(key, dim):
    ks = jax.random.split(key, 12)
    s = 0.02
    in_proj_w = jax.random.normal(ks[0], (3 * dim, dim), jnp.float32) * s
    in_proj_b = jax.random.normal(ks[1], (3 * dim,), jnp.float32) * s
    wq, wk, wv = jnp.split(in_proj_w, 3, axis=0)
    bq, bk, bv = jnp.split(in_proj_b, 3, axis=0)
    wo = jax.random.normal(ks[2], (dim, dim), jnp.float32) * s
    bo = jax.random.normal(ks[3], (dim,), jnp.float32) * s
    w1 = jax.random.normal(ks[4], (4 * dim, dim), jnp.float32) * s
    bm1 = jax.random.normal(ks[5], (4 * dim,), jnp.float32) * s
    w2 = jax.random.normal(ks[6], (dim, 4 * dim), jnp.float32) * s
    bm2 = jax.random.normal(ks[7], (dim,), jnp.float32) * s
    g1 = 1.0 + 0.1 * jax.random.normal(ks[8], (dim,), jnp.float32)
    b1 = 0.1 * jax.random.normal(ks[9], (dim,), jnp.float32)
    g2 = 1.0 + 0.1 * jax.random.normal(ks[10], (dim,), jnp.float32)
    b2 = 0.1 * jax.random.normal(ks[11], (dim,), jnp.float32)
    return {
        # nn.Linear computes x @ W^T + b, so store pre-transposed weights.
        'g1': g1.reshape(1, dim), 'b1': b1.reshape(1, dim),
        'wq_t': wq.T, 'wk_t': wk.T, 'wv_t': wv.T,
        'bq': bq.reshape(1, dim), 'bk': bk.reshape(1, dim), 'bv': bv.reshape(1, dim),
        'wo_t': wo.T, 'bo': bo.reshape(1, dim),
        'g2': g2.reshape(1, dim), 'b2': b2.reshape(1, dim),
        'w1_t': w1.T, 'bm1': bm1.reshape(1, 4 * dim),
        'w2_t': w2.T, 'bm2': bm2.reshape(1, dim),
    }


if __name__ == "__main__":
    dim = 32          # channel dim C
    num_heads = 4
    B, H, W = 2, 8, 8

    key = jax.random.PRNGKey(0)
    kx, kp = jax.random.split(key)
    x = jax.random.normal(kx, (B, dim, H, W), jnp.float32)
    params = init_params(kp, dim)

    ref = mhsa_reference(x, params, num_heads)

    # Check both grid shapes (single-step for single-TC chips, per-batch for
    # multi-TC), plus the auto-selected default.  Tolerance accounts for bf16
    # MXU operands (f32 accumulation) and the approx softmax reciprocal.
    for bb in (B, 1, None):
        out = jax.block_until_ready(mhsa_forward(x, params, num_heads, block_batch=bb))
        np.testing.assert_allclose(np.asarray(out), np.asarray(ref),
                                   atol=5e-3, rtol=5e-3)

    print("KERNEL_OK")
</pallas_src>

<mosaic_0001>
module attributes {stable_mosaic.version = 11 : i64} {
  func.func @mhsa_kernel(%arg0: i32, %arg1: memref<2x64x32xf32, #tpu.memory_space<vmem>>, %arg2: memref<6x32xf32, #tpu.memory_space<vmem>>, %arg3: memref<32x96xbf16, #tpu.memory_space<vmem>>, %arg4: memref<1x96xf32, #tpu.memory_space<vmem>>, %arg5: memref<32x32xbf16, #tpu.memory_space<vmem>>, %arg6: memref<32x128xbf16, #tpu.memory_space<vmem>>, %arg7: memref<1x128xf32, #tpu.memory_space<vmem>>, %arg8: memref<128x32xbf16, #tpu.memory_space<vmem>>, %arg9: memref<2x64x32xf32, #tpu.memory_space<vmem>>) attributes {dimension_semantics = [#tpu.dimension_semantics<parallel>], iteration_bounds = array<i64: 1>, scalar_prefetch = 0 : i64, scratch_operands = 0 : i64, tpu.core_type = #tpu.core_type<tc>, window_params = [{transform_indices = @transform_0, window_bounds = array<i64: 2, 64, 32>}, {pipeline_mode = #tpu.pipeline_mode<synchronous>, transform_indices = @transform_1, window_bounds = array<i64: 6, 32>}, {pipeline_mode = #tpu.pipeline_mode<synchronous>, transform_indices = @transform_2, window_bounds = array<i64: 32, 96>}, {pipeline_mode = #tpu.pipeline_mode<synchronous>, transform_indices = @transform_3, window_bounds = array<i64: 1, 96>}, {pipeline_mode = #tpu.pipeline_mode<synchronous>, transform_indices = @transform_4, window_bounds = array<i64: 32, 32>}, {pipeline_mode = #tpu.pipeline_mode<synchronous>, transform_indices = @transform_5, window_bounds = array<i64: 32, 128>}, {pipeline_mode = #tpu.pipeline_mode<synchronous>, transform_indices = @transform_6, window_bounds = array<i64: 1, 128>}, {pipeline_mode = #tpu.pipeline_mode<synchronous>, transform_indices = @transform_7, window_bounds = array<i64: 128, 32>}, {transform_indices = @transform_8, window_bounds = array<i64: 2, 64, 32>}]} {
    %c0 = arith.constant 0 : index
    %c0_0 = arith.constant 0 : index
    %c0_1 = arith.constant 0 : index
    %0 = vector.load %arg1[%c0, %c0_0, %c0_1] : memref<2x64x32xf32, #tpu.memory_space<vmem>>, vector<2x64x32xf32>
    %1 = vector.shape_cast %0 : vector<2x64x32xf32> to vector<128x32xf32>
    %c0_2 = arith.constant 0 : index
    %c0_3 = arith.constant 0 : index
    %2 = vector.load %arg2[%c0_2, %c0_3] : memref<6x32xf32, #tpu.memory_space<vmem>>, vector<6x32xf32>
    %3 = vector.extract_strided_slice %2 {offsets = [0, 0], sizes = [1, 32], strides = [1, 1]} : vector<6x32xf32> to vector<1x32xf32>
    %4 = vector.extract_strided_slice %2 {offsets = [1, 0], sizes = [1, 32], strides = [1, 1]} : vector<6x32xf32> to vector<1x32xf32>
    %5 = vector.extract_strided_slice %2 {offsets = [2, 0], sizes = [1, 32], strides = [1, 1]} : vector<6x32xf32> to vector<1x32xf32>
    %6 = vector.extract_strided_slice %2 {offsets = [3, 0], sizes = [1, 32], strides = [1, 1]} : vector<6x32xf32> to vector<1x32xf32>
    %7 = vector.extract_strided_slice %2 {offsets = [4, 0], sizes = [1, 32], strides = [1, 1]} : vector<6x32xf32> to vector<1x32xf32>
    %8 = vector.extract_strided_slice %2 {offsets = [5, 0], sizes = [1, 32], strides = [1, 1]} : vector<6x32xf32> to vector<1x32xf32>
    %cst = arith.constant dense<0.000000e+00> : vector<128xf32>
    %9 = vector.multi_reduction <add>, %1, %cst [1] : vector<128x32xf32> to vector<128xf32>
    %10 = vector.shape_cast %9 : vector<128xf32> to vector<128x1xf32>
    %cst_4 = arith.constant 3.200000e+01 : f32
    %11 = vector.broadcast %cst_4 : f32 to vector<128x1xf32>
    %12 = arith.divf %10, %11 : vector<128x1xf32>
    %13 = vector.broadcast %12 : vector<128x1xf32> to vector<128x32xf32>
    %14 = arith.subf %1, %13 : vector<128x32xf32>
    %15 = arith.mulf %14, %14 : vector<128x32xf32>
    %cst_5 = arith.constant dense<0.000000e+00> : vector<128xf32>
    %16 = vector.multi_reduction <add>, %15, %cst_5 [1] : vector<128x32xf32> to vector<128xf32>
    %17 = vector.shape_cast %16 : vector<128xf32> to vector<128x1xf32>
    %cst_6 = arith.constant 3.200000e+01 : f32
    %18 = vector.broadcast %cst_6 : f32 to vector<128x1xf32>
    %19 = arith.divf %17, %18 : vector<128x1xf32>
    %20 = vector.broadcast %12 : vector<128x1xf32> to vector<128x32xf32>
    %21 = arith.subf %1, %20 : vector<128x32xf32>
    %cst_7 = arith.constant 9.99999974E-6 : f32
    %22 = vector.broadcast %cst_7 : f32 to vector<128x1xf32>
    %23 = arith.addf %19, %22 : vector<128x1xf32>
    %24 = math.rsqrt %23 : vector<128x1xf32>
    %25 = vector.broadcast %24 : vector<128x1xf32> to vector<128x32xf32>
    %26 = arith.mulf %21, %25 : vector<128x32xf32>
    %27 = vector.broadcast %3 : vector<1x32xf32> to vector<128x32xf32>
    %28 = arith.mulf %26, %27 : vector<128x32xf32>
    %29 = vector.broadcast %4 : vector<1x32xf32> to vector<128x32xf32>
    %30 = arith.addf %28, %29 : vector<128x32xf32>
    %31 = arith.truncf %30 : vector<128x32xf32> to vector<128x32xbf16>
    %c0_8 = arith.constant 0 : index
    %c0_9 = arith.constant 0 : index
    %32 = vector.load %arg3[%c0_8, %c0_9] : memref<32x96xbf16, #tpu.memory_space<vmem>>, vector<32x96xbf16>
    %cst_10 = arith.constant dense<0.000000e+00> : vector<128x96xf32>
    %33 = tpu.matmul %31, %32, %cst_10 {dimension_numbers = #tpu.dot_dimension_numbers<[1], [0], [0], [1], [0, 0, 1, 1], [], []>} : vector<128x32xbf16>, vector<32x96xbf16>, vector<128x96xf32> -> vector<128x96xf32>
    %c0_11 = arith.constant 0 : index
    %c0_12 = arith.constant 0 : index
    %34 = vector.load %arg4[%c0_11, %c0_12] : memref<1x96xf32, #tpu.memory_space<vmem>>, vector<1x96xf32>
    %35 = vector.broadcast %34 : vector<1x96xf32> to vector<128x96xf32>
    %36 = arith.addf %33, %35 : vector<128x96xf32>
    %37 = arith.truncf %36 : vector<128x96xf32> to vector<128x96xbf16>
    %c0_13 = arith.constant 0 : index
    %c0_14 = arith.constant 0 : index
    %38 = vector.load %arg5[%c0_13, %c0_14] : memref<32x32xbf16, #tpu.memory_space<vmem>>, vector<32x32xbf16>
    %cst_15 = arith.constant 0.000000e+00 : f32
    %39 = vector.broadcast %cst_15 : f32 to vector<64x32xf32>
    %40 = vector.extract_strided_slice %37 {offsets = [0, 0], sizes = [64, 8], strides = [1, 1]} : vector<128x96xbf16> to vector<64x8xbf16>
    %41 = vector.extract_strided_slice %37 {offsets = [0, 32], sizes = [64, 8], strides = [1, 1]} : vector<128x96xbf16> to vector<64x8xbf16>
    %42 = vector.extract_strided_slice %37 {offsets = [0, 64], sizes = [64, 8], strides = [1, 1]} : vector<128x96xbf16> to vector<64x8xbf16>
    %cst_16 = arith.constant dense<0.000000e+00> : vector<64x64xf32>
    %43 = tpu.matmul %40, %41, %cst_16 {dimension_numbers = #tpu.dot_dimension_numbers<[1], [1], [0], [0], [0, 0, 1, 0], [], []>} : vector<64x8xbf16>, vector<64x8xbf16>, vector<64x64xf32> -> vector<64x64xf32>
    %cst_17 = arith.constant dense<0xFF800000> : vector<64xf32>
    %44 = vector.multi_reduction <maximumf>, %43, %cst_17 [1] : vector<64x64xf32> to vector<64xf32>
    %45 = vector.shape_cast %44 : vector<64xf32> to vector<64x1xf32>
    %46 = vector.broadcast %45 : vector<64x1xf32> to vector<64x64xf32>
    %47 = arith.subf %43, %46 : vector<64x64xf32>
    %48 = math.exp %47 : vector<64x64xf32>
    %cst_18 = arith.constant dense<0.000000e+00> : vector<64xf32>
    %49 = vector.multi_reduction <add>, %48, %cst_18 [1] : vector<64x64xf32> to vector<64xf32>
    %50 = vector.shape_cast %49 : vector<64xf32> to vector<64x1xf32>
    %51 = tpu.reciprocal %50 {approx = true} : vector<64x1xf32> -> vector<64x1xf32>
    %52 = vector.broadcast %51 : vector<64x1xf32> to vector<64x64xf32>
    %53 = arith.mulf %48, %52 : vector<64x64xf32>
    %54 = arith.truncf %53 : vector<64x64xf32> to vector<64x64xbf16>
    %cst_19 = arith.constant dense<0.000000e+00> : vector<64x8xf32>
    %55 = tpu.matmul %54, %42, %cst_19 {dimension_numbers = #tpu.dot_dimension_numbers<[1], [0], [0], [1], [0, 0, 1, 1], [], []>} : vector<64x64xbf16>, vector<64x8xbf16>, vector<64x8xf32> -> vector<64x8xf32>
    %56 = arith.truncf %55 : vector<64x8xf32> to vector<64x8xbf16>
    %57 = vector.extract_strided_slice %38 {offsets = [0, 0], sizes = [8, 32], strides = [1, 1]} : vector<32x32xbf16> to vector<8x32xbf16>
    %cst_20 = arith.constant dense<0.000000e+00> : vector<64x32xf32>
    %58 = tpu.matmul %56, %57, %cst_20 {dimension_numbers = #tpu.dot_dimension_numbers<[1], [0], [0], [1], [0, 0, 1, 1], [], []>} : vector<64x8xbf16>, vector<8x32xbf16>, vector<64x32xf32> -> vector<64x32xf32>
    %59 = arith.addf %39, %58 : vector<64x32xf32>
    %60 = vector.extract_strided_slice %37 {offsets = [0, 8], sizes = [64, 8], strides = [1, 1]} : vector<128x96xbf16> to vector<64x8xbf16>
    %61 = vector.extract_strided_slice %37 {offsets = [0, 40], sizes = [64, 8], strides = [1, 1]} : vector<128x96xbf16> to vector<64x8xbf16>
    %62 = vector.extract_strided_slice %37 {offsets = [0, 72], sizes = [64, 8], strides = [1, 1]} : vector<128x96xbf16> to vector<64x8xbf16>
    %cst_21 = arith.constant dense<0.000000e+00> : vector<64x64xf32>
    %63 = tpu.matmul %60, %61, %cst_21 {dimension_numbers = #tpu.dot_dimension_numbers<[1], [1], [0], [0], [0, 0, 1, 0], [], []>} : vector<64x8xbf16>, vector<64x8xbf16>, vector<64x64xf32> -> vector<64x64xf32>
    %cst_22 = arith.constant dense<0xFF800000> : vector<64xf32>
    %64 = vector.multi_reduction <maximumf>, %63, %cst_22 [1] : vector<64x64xf32> to vector<64xf32>
    %65 = vector.shape_cast %64 : vector<64xf32> to vector<64x1xf32>
    %66 = vector.broadcast %65 : vector<64x1xf32> to vector<64x64xf32>
    %67 = arith.subf %63, %66 : vector<64x64xf32>
    %68 = math.exp %67 : vector<64x64xf32>
    %cst_23 = arith.constant dense<0.000000e+00> : vector<64xf32>
    %69 = vector.multi_reduction <add>, %68, %cst_23 [1] : vector<64x64xf32> to vector<64xf32>
    %70 = vector.shape_cast %69 : vector<64xf32> to vector<64x1xf32>
    %71 = tpu.reciprocal %70 {approx = true} : vector<64x1xf32> -> vector<64x1xf32>
    %72 = vector.broadcast %71 : vector<64x1xf32> to vector<64x64xf32>
    %73 = arith.mulf %68, %72 : vector<64x64xf32>
    %74 = arith.truncf %73 : vector<64x64xf32> to vector<64x64xbf16>
    %cst_24 = arith.constant dense<0.000000e+00> : vector<64x8xf32>
    %75 = tpu.matmul %74, %62, %cst_24 {dimension_numbers = #tpu.dot_dimension_numbers<[1], [0], [0], [1], [0, 0, 1, 1], [], []>} : vector<64x64xbf16>, vector<64x8xbf16>, vector<64x8xf32> -> vector<64x8xf32>
    %76 = arith.truncf %75 : vector<64x8xf32> to vector<64x8xbf16>
    %77 = vector.extract_strided_slice %38 {offsets = [8, 0], sizes = [8, 32], strides = [1, 1]} : vector<32x32xbf16> to vector<8x32xbf16>
    %cst_25 = arith.constant dense<0.000000e+00> : vector<64x32xf32>
    %78 = tpu.matmul %76, %77, %cst_25 {dimension_numbers = #tpu.dot_dimension_numbers<[1], [0], [0], [1], [0, 0, 1, 1], [], []>} : vector<64x8xbf16>, vector<8x32xbf16>, vector<64x32xf32> -> vector<64x32xf32>
    %79 = arith.addf %59, %78 : vector<64x32xf32>
    %80 = vector.extract_strided_slice %37 {offsets = [0, 16], sizes = [64, 8], strides = [1, 1]} : vector<128x96xbf16> to vector<64x8xbf16>
    %81 = vector.extract_strided_slice %37 {offsets = [0, 48], sizes = [64, 8], strides = [1, 1]} : vector<128x96xbf16> to vector<64x8xbf16>
    %82 = vector.extract_strided_slice %37 {offsets = [0, 80], sizes = [64, 8], strides = [1, 1]} : vector<128x96xbf16> to vector<64x8xbf16>
    %cst_26 = arith.constant dense<0.000000e+00> : vector<64x64xf32>
    %83 = tpu.matmul %80, %81, %cst_26 {dimension_numbers = #tpu.dot_dimension_numbers<[1], [1], [0], [0], [0, 0, 1, 0], [], []>} : vector<64x8xbf16>, vector<64x8xbf16>, vector<64x64xf32> -> vector<64x64xf32>
    %cst_27 = arith.constant dense<0xFF800000> : vector<64xf32>
    %84 = vector.multi_reduction <maximumf>, %83, %cst_27 [1] : vector<64x64xf32> to vector<64xf32>
    %85 = vector.shape_cast %84 : vector<64xf32> to vector<64x1xf32>
    %86 = vector.broadcast %85 : vector<64x1xf32> to vector<64x64xf32>
    %87 = arith.subf %83, %86 : vector<64x64xf32>
    %88 = math.exp %87 : vector<64x64xf32>
    %cst_28 = arith.constant dense<0.000000e+00> : vector<64xf32>
    %89 = vector.multi_reduction <add>, %88, %cst_28 [1] : vector<64x64xf32> to vector<64xf32>
    %90 = vector.shape_cast %89 : vector<64xf32> to vector<64x1xf32>
    %91 = tpu.reciprocal %90 {approx = true} : vector<64x1xf32> -> vector<64x1xf32>
    %92 = vector.broadcast %91 : vector<64x1xf32> to vector<64x64xf32>
    %93 = arith.mulf %88, %92 : vector<64x64xf32>
    %94 = arith.truncf %93 : vector<64x64xf32> to vector<64x64xbf16>
    %cst_29 = arith.constant dense<0.000000e+00> : vector<64x8xf32>
    %95 = tpu.matmul %94, %82, %cst_29 {dimension_numbers = #tpu.dot_dimension_numbers<[1], [0], [0], [1], [0, 0, 1, 1], [], []>} : vector<64x64xbf16>, vector<64x8xbf16>, vector<64x8xf32> -> vector<64x8xf32>
    %96 = arith.truncf %95 : vector<64x8xf32> to vector<64x8xbf16>
    %97 = vector.extract_strided_slice %38 {offsets = [16, 0], sizes = [8, 32], strides = [1, 1]} : vector<32x32xbf16> to vector<8x32xbf16>
    %cst_30 = arith.constant dense<0.000000e+00> : vector<64x32xf32>
    %98 = tpu.matmul %96, %97, %cst_30 {dimension_numbers = #tpu.dot_dimension_numbers<[1], [0], [0], [1], [0, 0, 1, 1], [], []>} : vector<64x8xbf16>, vector<8x32xbf16>, vector<64x32xf32> -> vector<64x32xf32>
    %99 = arith.addf %79, %98 : vector<64x32xf32>
    %100 = vector.extract_strided_slice %37 {offsets = [0, 24], sizes = [64, 8], strides = [1, 1]} : vector<128x96xbf16> to vector<64x8xbf16>
    %101 = vector.extract_strided_slice %37 {offsets = [0, 56], sizes = [64, 8], strides = [1, 1]} : vector<128x96xbf16> to vector<64x8xbf16>
    %102 = vector.extract_strided_slice %37 {offsets = [0, 88], sizes = [64, 8], strides = [1, 1]} : vector<128x96xbf16> to vector<64x8xbf16>
    %cst_31 = arith.constant dense<0.000000e+00> : vector<64x64xf32>
    %103 = tpu.matmul %100, %101, %cst_31 {dimension_numbers = #tpu.dot_dimension_numbers<[1], [1], [0], [0], [0, 0, 1, 0], [], []>} : vector<64x8xbf16>, vector<64x8xbf16>, vector<64x64xf32> -> vector<64x64xf32>
    %cst_32 = arith.constant dense<0xFF800000> : vector<64xf32>
    %104 = vector.multi_reduction <maximumf>, %103, %cst_32 [1] : vector<64x64xf32> to vector<64xf32>
    %105 = vector.shape_cast %104 : vector<64xf32> to vector<64x1xf32>
    %106 = vector.broadcast %105 : vector<64x1xf32> to vector<64x64xf32>
    %107 = arith.subf %103, %106 : vector<64x64xf32>
    %108 = math.exp %107 : vector<64x64xf32>
    %cst_33 = arith.constant dense<0.000000e+00> : vector<64xf32>
    %109 = vector.multi_reduction <add>, %108, %cst_33 [1] : vector<64x64xf32> to vector<64xf32>
    %110 = vector.shape_cast %109 : vector<64xf32> to vector<64x1xf32>
    %111 = tpu.reciprocal %110 {approx = true} : vector<64x1xf32> -> vector<64x1xf32>
    %112 = vector.broadcast %111 : vector<64x1xf32> to vector<64x64xf32>
    %113 = arith.mulf %108, %112 : vector<64x64xf32>
    %114 = arith.truncf %113 : vector<64x64xf32> to vector<64x64xbf16>
    %cst_34 = arith.constant dense<0.000000e+00> : vector<64x8xf32>
    %115 = tpu.matmul %114, %102, %cst_34 {dimension_numbers = #tpu.dot_dimension_numbers<[1], [0], [0], [1], [0, 0, 1, 1], [], []>} : vector<64x64xbf16>, vector<64x8xbf16>, vector<64x8xf32> -> vector<64x8xf32>
    %116 = arith.truncf %115 : vector<64x8xf32> to vector<64x8xbf16>
    %117 = vector.extract_strided_slice %38 {offsets = [24, 0], sizes = [8, 32], strides = [1, 1]} : vector<32x32xbf16> to vector<8x32xbf16>
    %cst_35 = arith.constant dense<0.000000e+00> : vector<64x32xf32>
    %118 = tpu.matmul %116, %117, %cst_35 {dimension_numbers = #tpu.dot_dimension_numbers<[1], [0], [0], [1], [0, 0, 1, 1], [], []>} : vector<64x8xbf16>, vector<8x32xbf16>, vector<64x32xf32> -> vector<64x32xf32>
    %119 = arith.addf %99, %118 : vector<64x32xf32>
    %cst_36 = arith.constant 0.000000e+00 : f32
    %120 = vector.broadcast %cst_36 : f32 to vector<64x32xf32>
    %121 = vector.extract_strided_slice %37 {offsets = [64, 0], sizes = [64, 8], strides = [1, 1]} : vector<128x96xbf16> to vector<64x8xbf16>
    %122 = vector.extract_strided_slice %37 {offsets = [64, 32], sizes = [64, 8], strides = [1, 1]} : vector<128x96xbf16> to vector<64x8xbf16>
    %123 = vector.extract_strided_slice %37 {offsets = [64, 64], sizes = [64, 8], strides = [1, 1]} : vector<128x96xbf16> to vector<64x8xbf16>
    %cst_37 = arith.constant dense<0.000000e+00> : vector<64x64xf32>
    %124 = tpu.matmul %121, %122, %cst_37 {dimension_numbers = #tpu.dot_dimension_numbers<[1], [1], [0], [0], [0, 0, 1, 0], [], []>} : vector<64x8xbf16>, vector<64x8xbf16>, vector<64x64xf32> -> vector<64x64xf32>
    %cst_38 = arith.constant dense<0xFF800000> : vector<64xf32>
    %125 = vector.multi_reduction <maximumf>, %124, %cst_38 [1] : vector<64x64xf32> to vector<64xf32>
    %126 = vector.shape_cast %125 : vector<64xf32> to vector<64x1xf32>
    %127 = vector.broadcast %126 : vector<64x1xf32> to vector<64x64xf32>
    %128 = arith.subf %124, %127 : vector<64x64xf32>
    %129 = math.exp %128 : vector<64x64xf32>
    %cst_39 = arith.constant dense<0.000000e+00> : vector<64xf32>
    %130 = vector.multi_reduction <add>, %129, %cst_39 [1] : vector<64x64xf32> to vector<64xf32>
    %131 = vector.shape_cast %130 : vector<64xf32> to vector<64x1xf32>
    %132 = tpu.reciprocal %131 {approx = true} : vector<64x1xf32> -> vector<64x1xf32>
    %133 = vector.broadcast %132 : vector<64x1xf32> to vector<64x64xf32>
    %134 = arith.mulf %129, %133 : vector<64x64xf32>
    %135 = arith.truncf %134 : vector<64x64xf32> to vector<64x64xbf16>
    %cst_40 = arith.constant dense<0.000000e+00> : vector<64x8xf32>
    %136 = tpu.matmul %135, %123, %cst_40 {dimension_numbers = #tpu.dot_dimension_numbers<[1], [0], [0], [1], [0, 0, 1, 1], [], []>} : vector<64x64xbf16>, vector<64x8xbf16>, vector<64x8xf32> -> vector<64x8xf32>
    %137 = arith.truncf %136 : vector<64x8xf32> to vector<64x8xbf16>
    %138 = vector.extract_strided_slice %38 {offsets = [0, 0], sizes = [8, 32], strides = [1, 1]} : vector<32x32xbf16> to vector<8x32xbf16>
    %cst_41 = arith.constant dense<0.000000e+00> : vector<64x32xf32>
    %139 = tpu.matmul %137, %138, %cst_41 {dimension_numbers = #tpu.dot_dimension_numbers<[1], [0], [0], [1], [0, 0, 1, 1], [], []>} : vector<64x8xbf16>, vector<8x32xbf16>, vector<64x32xf32> -> vector<64x32xf32>
    %140 = arith.addf %120, %139 : vector<64x32xf32>
    %141 = vector.extract_strided_slice %37 {offsets = [64, 8], sizes = [64, 8], strides = [1, 1]} : vector<128x96xbf16> to vector<64x8xbf16>
    %142 = vector.extract_strided_slice %37 {offsets = [64, 40], sizes = [64, 8], strides = [1, 1]} : vector<128x96xbf16> to vector<64x8xbf16>
    %143 = vector.extract_strided_slice %37 {offsets = [64, 72], sizes = [64, 8], strides = [1, 1]} : vector<128x96xbf16> to vector<64x8xbf16>
    %cst_42 = arith.constant dense<0.000000e+00> : vector<64x64xf32>
    %144 = tpu.matmul %141, %142, %cst_42 {dimension_numbers = #tpu.dot_dimension_numbers<[1], [1], [0], [0], [0, 0, 1, 0], [], []>} : vector<64x8xbf16>, vector<64x8xbf16>, vector<64x64xf32> -> vector<64x64xf32>
    %cst_43 = arith.constant dense<0xFF800000> : vector<64xf32>
    %145 = vector.multi_reduction <maximumf>, %144, %cst_43 [1] : vector<64x64xf32> to vector<64xf32>
    %146 = vector.shape_cast %145 : vector<64xf32> to vector<64x1xf32>
    %147 = vector.broadcast %146 : vector<64x1xf32> to vector<64x64xf32>
    %148 = arith.subf %144, %147 : vector<64x64xf32>
    %149 = math.exp %148 : vector<64x64xf32>
    %cst_44 = arith.constant dense<0.000000e+00> : vector<64xf32>
    %150 = vector.multi_reduction <add>, %149, %cst_44 [1] : vector<64x64xf32> to vector<64xf32>
    %151 = vector.shape_cast %150 : vector<64xf32> to vector<64x1xf32>
    %152 = tpu.reciprocal %151 {approx = true} : vector<64x1xf32> -> vector<64x1xf32>
    %153 = vector.broadcast %152 : vector<64x1xf32> to vector<64x64xf32>
    %154 = arith.mulf %149, %153 : vector<64x64xf32>
    %155 = arith.truncf %154 : vector<64x64xf32> to vector<64x64xbf16>
    %cst_45 = arith.constant dense<0.000000e+00> : vector<64x8xf32>
    %156 = tpu.matmul %155, %143, %cst_45 {dimension_numbers = #tpu.dot_dimension_numbers<[1], [0], [0], [1], [0, 0, 1, 1], [], []>} : vector<64x64xbf16>, vector<64x8xbf16>, vector<64x8xf32> -> vector<64x8xf32>
    %157 = arith.truncf %156 : vector<64x8xf32> to vector<64x8xbf16>
    %158 = vector.extract_strided_slice %38 {offsets = [8, 0], sizes = [8, 32], strides = [1, 1]} : vector<32x32xbf16> to vector<8x32xbf16>
    %cst_46 = arith.constant dense<0.000000e+00> : vector<64x32xf32>
    %159 = tpu.matmul %157, %158, %cst_46 {dimension_numbers = #tpu.dot_dimension_numbers<[1], [0], [0], [1], [0, 0, 1, 1], [], []>} : vector<64x8xbf16>, vector<8x32xbf16>, vector<64x32xf32> -> vector<64x32xf32>
    %160 = arith.addf %140, %159 : vector<64x32xf32>
    %161 = vector.extract_strided_slice %37 {offsets = [64, 16], sizes = [64, 8], strides = [1, 1]} : vector<128x96xbf16> to vector<64x8xbf16>
    %162 = vector.extract_strided_slice %37 {offsets = [64, 48], sizes = [64, 8], strides = [1, 1]} : vector<128x96xbf16> to vector<64x8xbf16>
    %163 = vector.extract_strided_slice %37 {offsets = [64, 80], sizes = [64, 8], strides = [1, 1]} : vector<128x96xbf16> to vector<64x8xbf16>
    %cst_47 = arith.constant dense<0.000000e+00> : vector<64x64xf32>
    %164 = tpu.matmul %161, %162, %cst_47 {dimension_numbers = #tpu.dot_dimension_numbers<[1], [1], [0], [0], [0, 0, 1, 0], [], []>} : vector<64x8xbf16>, vector<64x8xbf16>, vector<64x64xf32> -> vector<64x64xf32>
    %cst_48 = arith.constant dense<0xFF800000> : vector<64xf32>
    %165 = vector.multi_reduction <maximumf>, %164, %cst_48 [1] : vector<64x64xf32> to vector<64xf32>
    %166 = vector.shape_cast %165 : vector<64xf32> to vector<64x1xf32>
    %167 = vector.broadcast %166 : vector<64x1xf32> to vector<64x64xf32>
    %168 = arith.subf %164, %167 : vector<64x64xf32>
    %169 = math.exp %168 : vector<64x64xf32>
    %cst_49 = arith.constant dense<0.000000e+00> : vector<64xf32>
    %170 = vector.multi_reduction <add>, %169, %cst_49 [1] : vector<64x64xf32> to vector<64xf32>
    %171 = vector.shape_cast %170 : vector<64xf32> to vector<64x1xf32>
    %172 = tpu.reciprocal %171 {approx = true} : vector<64x1xf32> -> vector<64x1xf32>
    %173 = vector.broadcast %172 : vector<64x1xf32> to vector<64x64xf32>
    %174 = arith.mulf %169, %173 : vector<64x64xf32>
    %175 = arith.truncf %174 : vector<64x64xf32> to vector<64x64xbf16>
    %cst_50 = arith.constant dense<0.000000e+00> : vector<64x8xf32>
    %176 = tpu.matmul %175, %163, %cst_50 {dimension_numbers = #tpu.dot_dimension_numbers<[1], [0], [0], [1], [0, 0, 1, 1], [], []>} : vector<64x64xbf16>, vector<64x8xbf16>, vector<64x8xf32> -> vector<64x8xf32>
    %177 = arith.truncf %176 : vector<64x8xf32> to vector<64x8xbf16>
    %178 = vector.extract_strided_slice %38 {offsets = [16, 0], sizes = [8, 32], strides = [1, 1]} : vector<32x32xbf16> to vector<8x32xbf16>
    %cst_51 = arith.constant dense<0.000000e+00> : vector<64x32xf32>
    %179 = tpu.matmul %177, %178, %cst_51 {dimension_numbers = #tpu.dot_dimension_numbers<[1], [0], [0], [1], [0, 0, 1, 1], [], []>} : vector<64x8xbf16>, vector<8x32xbf16>, vector<64x32xf32> -> vector<64x32xf32>
    %180 = arith.addf %160, %179 : vector<64x32xf32>
    %181 = vector.extract_strided_slice %37 {offsets = [64, 24], sizes = [64, 8], strides = [1, 1]} : vector<128x96xbf16> to vector<64x8xbf16>
    %182 = vector.extract_strided_slice %37 {offsets = [64, 56], sizes = [64, 8], strides = [1, 1]} : vector<128x96xbf16> to vector<64x8xbf16>
    %183 = vector.extract_strided_slice %37 {offsets = [64, 88], sizes = [64, 8], strides = [1, 1]} : vector<128x96xbf16> to vector<64x8xbf16>
    %cst_52 = arith.constant dense<0.000000e+00> : vector<64x64xf32>
    %184 = tpu.matmul %181, %182, %cst_52 {dimension_numbers = #tpu.dot_dimension_numbers<[1], [1], [0], [0], [0, 0, 1, 0], [], []>} : vector<64x8xbf16>, vector<64x8xbf16>, vector<64x64xf32> -> vector<64x64xf32>
    %cst_53 = arith.constant dense<0xFF800000> : vector<64xf32>
    %185 = vector.multi_reduction <maximumf>, %184, %cst_53 [1] : vector<64x64xf32> to vector<64xf32>
    %186 = vector.shape_cast %185 : vector<64xf32> to vector<64x1xf32>
    %187 = vector.broadcast %186 : vector<64x1xf32> to vector<64x64xf32>
    %188 = arith.subf %184, %187 : vector<64x64xf32>
    %189 = math.exp %188 : vector<64x64xf32>
    %cst_54 = arith.constant dense<0.000000e+00> : vector<64xf32>
    %190 = vector.multi_reduction <add>, %189, %cst_54 [1] : vector<64x64xf32> to vector<64xf32>
    %191 = vector.shape_cast %190 : vector<64xf32> to vector<64x1xf32>
    %192 = tpu.reciprocal %191 {approx = true} : vector<64x1xf32> -> vector<64x1xf32>
    %193 = vector.broadcast %192 : vector<64x1xf32> to vector<64x64xf32>
    %194 = arith.mulf %189, %193 : vector<64x64xf32>
    %195 = arith.truncf %194 : vector<64x64xf32> to vector<64x64xbf16>
    %cst_55 = arith.constant dense<0.000000e+00> : vector<64x8xf32>
    %196 = tpu.matmul %195, %183, %cst_55 {dimension_numbers = #tpu.dot_dimension_numbers<[1], [0], [0], [1], [0, 0, 1, 1], [], []>} : vector<64x64xbf16>, vector<64x8xbf16>, vector<64x8xf32> -> vector<64x8xf32>
    %197 = arith.truncf %196 : vector<64x8xf32> to vector<64x8xbf16>
    %198 = vector.extract_strided_slice %38 {offsets = [24, 0], sizes = [8, 32], strides = [1, 1]} : vector<32x32xbf16> to vector<8x32xbf16>
    %cst_56 = arith.constant dense<0.000000e+00> : vector<64x32xf32>
    %199 = tpu.matmul %197, %198, %cst_56 {dimension_numbers = #tpu.dot_dimension_numbers<[1], [0], [0], [1], [0, 0, 1, 1], [], []>} : vector<64x8xbf16>, vector<8x32xbf16>, vector<64x32xf32> -> vector<64x32xf32>
    %200 = arith.addf %180, %199 : vector<64x32xf32>
    %201 = tpu.concatenate %119, %200 in 0 : vector<64x32xf32>, vector<64x32xf32> -> vector<128x32xf32>
    %202 = vector.broadcast %5 : vector<1x32xf32> to vector<128x32xf32>
    %203 = arith.addf %201, %202 : vector<128x32xf32>
    %204 = arith.addf %30, %203 : vector<128x32xf32>
    %cst_57 = arith.constant dense<0.000000e+00> : vector<128xf32>
    %205 = vector.multi_reduction <add>, %204, %cst_57 [1] : vector<128x32xf32> to vector<128xf32>
    %206 = vector.shape_cast %205 : vector<128xf32> to vector<128x1xf32>
    %cst_58 = arith.constant 3.200000e+01 : f32
    %207 = vector.broadcast %cst_58 : f32 to vector<128x1xf32>
    %208 = arith.divf %206, %207 : vector<128x1xf32>
    %209 = vector.broadcast %208 : vector<128x1xf32> to vector<128x32xf32>
    %210 = arith.subf %204, %209 : vector<128x32xf32>
    %211 = arith.mulf %210, %210 : vector<128x32xf32>
    %cst_59 = arith.constant dense<0.000000e+00> : vector<128xf32>
    %212 = vector.multi_reduction <add>, %211, %cst_59 [1] : vector<128x32xf32> to vector<128xf32>
    %213 = vector.shape_cast %212 : vector<128xf32> to vector<128x1xf32>
    %cst_60 = arith.constant 3.200000e+01 : f32
    %214 = vector.broadcast %cst_60 : f32 to vector<128x1xf32>
    %215 = arith.divf %213, %214 : vector<128x1xf32>
    %216 = vector.broadcast %208 : vector<128x1xf32> to vector<128x32xf32>
    %217 = arith.subf %204, %216 : vector<128x32xf32>
    %cst_61 = arith.constant 9.99999974E-6 : f32
    %218 = vector.broadcast %cst_61 : f32 to vector<128x1xf32>
    %219 = arith.addf %215, %218 : vector<128x1xf32>
    %220 = math.rsqrt %219 : vector<128x1xf32>
    %221 = vector.broadcast %220 : vector<128x1xf32> to vector<128x32xf32>
    %222 = arith.mulf %217, %221 : vector<128x32xf32>
    %223 = vector.broadcast %6 : vector<1x32xf32> to vector<128x32xf32>
    %224 = arith.mulf %222, %223 : vector<128x32xf32>
    %225 = vector.broadcast %7 : vector<1x32xf32> to vector<128x32xf32>
    %226 = arith.addf %224, %225 : vector<128x32xf32>
    %227 = arith.truncf %226 : vector<128x32xf32> to vector<128x32xbf16>
    %c0_62 = arith.constant 0 : index
    %c0_63 = arith.constant 0 : index
    %228 = vector.load %arg6[%c0_62, %c0_63] : memref<32x128xbf16, #tpu.memory_space<vmem>>, vector<32x128xbf16>
    %cst_64 = arith.constant dense<0.000000e+00> : vector<128x128xf32>
    %229 = tpu.matmul %227, %228, %cst_64 {dimension_numbers = #tpu.dot_dimension_numbers<[1], [0], [0], [1], [0, 0, 1, 1], [], []>} : vector<128x32xbf16>, vector<32x128xbf16>, vector<128x128xf32> -> vector<128x128xf32>
    %c0_65 = arith.constant 0 : index
    %c0_66 = arith.constant 0 : index
    %230 = vector.load %arg7[%c0_65, %c0_66] : memref<1x128xf32, #tpu.memory_space<vmem>>, vector<1x128xf32>
    %231 = vector.broadcast %230 : vector<1x128xf32> to vector<128x128xf32>
    %232 = arith.addf %229, %231 : vector<128x128xf32>
    %cst_67 = arith.constant 5.000000e-01 : f32
    %233 = vector.broadcast %cst_67 : f32 to vector<128x128xf32>
    %234 = arith.mulf %233, %232 : vector<128x128xf32>
    %cst_68 = arith.constant 0.707106769 : f32
    %235 = vector.broadcast %cst_68 : f32 to vector<128x128xf32>
    %236 = arith.mulf %232, %235 : vector<128x128xf32>
    %237 = math.erf %236 : vector<128x128xf32>
    %cst_69 = arith.constant 1.000000e+00 : f32
    %238 = vector.broadcast %cst_69 : f32 to vector<128x128xf32>
    %239 = arith.addf %238, %237 : vector<128x128xf32>
    %240 = arith.mulf %234, %239 : vector<128x128xf32>
    %241 = arith.truncf %240 : vector<128x128xf32> to vector<128x128xbf16>
    %c0_70 = arith.constant 0 : index
    %c0_71 = arith.constant 0 : index
    %242 = vector.load %arg8[%c0_70, %c0_71] : memref<128x32xbf16, #tpu.memory_space<vmem>>, vector<128x32xbf16>
    %cst_72 = arith.constant dense<0.000000e+00> : vector<128x32xf32>
    %243 = tpu.matmul %241, %242, %cst_72 {dimension_numbers = #tpu.dot_dimension_numbers<[1], [0], [0], [1], [0, 0, 1, 1], [], []>} : vector<128x128xbf16>, vector<128x32xbf16>, vector<128x32xf32> -> vector<128x32xf32>
    %244 = vector.broadcast %8 : vector<1x32xf32> to vector<128x32xf32>
    %245 = arith.addf %243, %244 : vector<128x32xf32>
    %246 = arith.addf %204, %245 : vector<128x32xf32>
    %247 = vector.shape_cast %246 : vector<128x32xf32> to vector<2x64x32xf32>
    %c0_73 = arith.constant 0 : index
    %c0_74 = arith.constant 0 : index
    %c0_75 = arith.constant 0 : index
    %248 = vector.load %arg9[%c0_73, %c0_74, %c0_75] : memref<2x64x32xf32, #tpu.memory_space<vmem>>, vector<2x64x32xf32>
    tpu.vector_store %arg9[%c0_73, %c0_74, %c0_75], %247 {strides = array<i32>} : memref<2x64x32xf32, #tpu.memory_space<vmem>>, vector<2x64x32xf32>,
    return
  }
  func.func @transform_0(%arg0: i32) -> (i32, i32, i32) {
    %c0_i32 = arith.constant 0 : i32
    %c0_i32_0 = arith.constant 0 : i32
    %c0_i32_1 = arith.constant 0 : i32
    return %arg0, %c0_i32, %c0_i32_0 : i32, i32, i32
  }
  func.func @transform_1(%arg0: i32) -> (i32, i32) {
    %c0_i32 = arith.constant 0 : i32
    %c0_i32_0 = arith.constant 0 : i32
    %c0_i32_1 = arith.constant 0 : i32
    return %c0_i32, %c0_i32_0 : i32, i32
  }
  func.func @transform_2(%arg0: i32) -> (i32, i32) {
    %c0_i32 = arith.constant 0 : i32
    %c0_i32_0 = arith.constant 0 : i32
    %c0_i32_1 = arith.constant 0 : i32
    return %c0_i32, %c0_i32_0 : i32, i32
  }
  func.func @transform_3(%arg0: i32) -> (i32, i32) {
    %c0_i32 = arith.constant 0 : i32
    %c0_i32_0 = arith.constant 0 : i32
    %c0_i32_1 = arith.constant 0 : i32
    return %c0_i32, %c0_i32_0 : i32, i32
  }
  func.func @transform_4(%arg0: i32) -> (i32, i32) {
    %c0_i32 = arith.constant 0 : i32
    %c0_i32_0 = arith.constant 0 : i32
    %c0_i32_1 = arith.constant 0 : i32
    return %c0_i32, %c0_i32_0 : i32, i32
  }
  func.func @transform_5(%arg0: i32) -> (i32, i32) {
    %c0_i32 = arith.constant 0 : i32
    %c0_i32_0 = arith.constant 0 : i32
    %c0_i32_1 = arith.constant 0 : i32
    return %c0_i32, %c0_i32_0 : i32, i32
  }
  func.func @transform_6(%arg0: i32) -> (i32, i32) {
    %c0_i32 = arith.constant 0 : i32
    %c0_i32_0 = arith.constant 0 : i32
    %c0_i32_1 = arith.constant 0 : i32
    return %c0_i32, %c0_i32_0 : i32, i32
  }
  func.func @transform_7(%arg0: i32) -> (i32, i32) {
    %c0_i32 = arith.constant 0 : i32
    %c0_i32_0 = arith.constant 0 : i32
    %c0_i32_1 = arith.constant 0 : i32
    return %c0_i32, %c0_i32_0 : i32, i32
  }
  func.func @transform_8(%arg0: i32) -> (i32, i32, i32) {
    %c0_i32 = arith.constant 0 : i32
    %c0_i32_0 = arith.constant 0 : i32
    %c0_i32_1 = arith.constant 0 : i32
    return %arg0, %c0_i32, %c0_i32_0 : i32, i32, i32
  }
}

</mosaic_0001>

<bundles_post_ra>
// kernel: tpu_custom_call.1
= control target key start
LH: loop header
LB: loop body
LE: loop exit
PB: predicated region body
PF: predicated region fallthrough
CT: control target
= control target key end

     0   :  { %vm47_vm0 = vcmask 261120   ;;  %vm473_vm1 = vcmask 64512   ;;  %s5321_s21 = smov 96   ;;  %s5322_s22 = smov 88   ;;  %vm563_vm2 = vcmask 523264   ;;  %vm1051_vm3 = vcmask 1043456   ;;  %s7184_s0 = inlined_call_operand.vmem [shape: f32[2,64,32], index: 0, kind: input, shape index: {}]   ;;  %s7185_s2 = inlined_call_operand.vmem [shape: bf16[32,96], index: 2, kind: input, shape index: {}]   ;;  %s7186_s1 = inlined_call_operand.vmem [shape: f32[6,32], index: 1, kind: input, shape index: {}]   ;;  %s7187_s3 = inlined_call_operand.vmem [shape: f32[1,96], index: 3, kind: input, shape index: {}]   ;;  %s7188_s4 = inlined_call_operand.vmem [shape: bf16[32,32], index: 4, kind: input, shape index: {}]   ;;  %s7189_s5 = inlined_call_operand.vmem [shape: bf16[32,128], index: 5, kind: input, shape index: {}]   ;;  %s7190_s7 = inlined_call_operand.vmem [shape: bf16[128,32], index: 7, kind: input, shape index: {}]   ;;  %s7191_s6 = inlined_call_operand.vmem [shape: f32[1,128], index: 6, kind: input, shape index: {}]   ;;  %s7192_s8 = inlined_call_operand.vmem [shape: f32[2,64,32], index: 8, kind: output, shape index: {}]  }
   0x1   :  { %v30_v0 = vld [vmem:[%s7184_s0] sm:$0xff]  ;;  %v32_v1 = vld [vmem:[%s7184_s0 + $0x10] sm:$0xff]  ;;  %v31_v2 = vld [vmem:[%s7184_s0 + $0x8] sm:$0xff]  ;;  %s5323_s23 = smov 120   ;;  %s5324_s24 = smov 64  }
   0x2   :  { %v48_v3 = vsel %vm47_vm0, %v30_v0, 0.0  ;;  %v54_v4 = vsel %vm47_vm0, %v32_v1, 0.0  ;;  %v33_v5 = vld [vmem:[%s7184_s0 + $0x18] sm:$0xff]  ;;  %v51_v6 = vsel %vm47_vm0, %v31_v2, 0.0  ;;  %v34_v8 = vld [vmem:[%s7184_s0 + $0x20] sm:$0xff]  ;;  %v35_v9 = vld [vmem:[%s7184_s0 + $0x28] sm:$0xff] }
   0x3   :  { %49 = vadd.xlane.f32.xlu0 %v48_v3  ;;  %55 = vadd.xlane.f32.xlu1 %v54_v4  ;;  %v57_v7 = vsel %vm47_vm0, %v33_v5, 0.0  ;;  %v60_v10 = vsel %vm47_vm0, %v34_v8, 0.0  ;;  %v63_v11 = vsel %vm47_vm0, %v35_v9, 0.0  ;;  %v36_v12 = vld [vmem:[%s7184_s0 + $0x30] sm:$0xff]  ;;  %v37_v13 = vld [vmem:[%s7184_s0 + $0x38] sm:$0xff]  ;;  %v5450_v54 = vld [vmem:[%s7184_s0 + $0x40] sm:$0xff] }
   0x4   :  { %v66_v14 = vsel %vm47_vm0, %v36_v12, 0.0  ;;  %v69_v15 = vsel %vm47_vm0, %v37_v13, 0.0  ;;  %v72_v57 = vsel %vm47_vm0, %v5450_v54, 0.0  ;;  %v5459_v58 = vld [vmem:[%s7184_s0 + $0x48] sm:$0xff]  ;;  %v5464_v59 = vld [vmem:[%s7184_s0 + $0x50] sm:$0xff]  ;;  %v5473_v62 = vld [vmem:[%s7184_s0 + $0x58] sm:$0xff] }
   0x5   :  { %v75_v60 = vsel %vm47_vm0, %v5459_v58, 0.0  ;;  %v78_v61 = vsel %vm47_vm0, %v5464_v59, 0.0  ;;  %v5478_v63 = vld [vmem:[%s7184_s0 + $0x60] sm:$0xff]  ;;  %v5492_v3 = vld [vmem:[%s7184_s0 + $0x70] sm:$0xff]  ;;  %s5325_s25 = smov 56   ;;  %s5326_s26 = smov 80  }
   0x6   :  { %s5327_s27 = smov 112   ;;  %s5328_s28 = smov 72  }
   0x7   :  { %52 = vadd.xlane.f32.xlu0 %v51_v6  ;;  %58 = vadd.xlane.f32.xlu1 %v57_v7  ;;  %v5501_v6 = vld [vmem:[%s7184_s0 + $0x78] sm:$0xff]  ;;  %s5329_s29 = smov 104   ;;  %s5330_s12 = smov 48  }
   0x8   :  { %v93_v7 = vsel %vm47_vm0, %v5501_v6, 0.0  ;;  %s5331_s16 = smov 40  }
   0xb   :  { %61 = vadd.xlane.f32.xlu0 %v60_v10  ;;  %64 = vadd.xlane.f32.xlu1 %v63_v11 }
   0xf   :  { %67 = vadd.xlane.f32.xlu0 %v66_v14  ;;  %70 = vadd.xlane.f32.xlu1 %v69_v15 }
  0x8c   :  { %v50_v16 = vpop.xlane.xlu0 %49  ;;  %v56_v17 = vpop.xlane.xlu1 %55 }
  0x8d   :  { %v97_v18 = vmul.f32 0.03125, %v50_v16  ;;  %v99_v19 = vmul.f32 0.03125, %v56_v17  ;;  %v257_v17 = vlaneseq }
  0x8f   :  { %v5409_v20 = vsub.f32 %v30_v0, %v97_v18  ;;  %v5411_v21 = vsub.f32 %v32_v1, %v99_v19  ;;  %v81_v0 = vsel %vm47_vm0, %v5473_v62, 0.0  ;;  %v84_v1 = vsel %vm47_vm0, %v5478_v63, 0.0 }
  0x90   :  { %v53_v22 = vpop.xlane.xlu0 %52  ;;  %v59_v23 = vpop.xlane.xlu1 %58 }
  0x91   :  { %v98_v24 = vmul.f32 0.03125, %v53_v22  ;;  %v100_v25 = vmul.f32 0.03125, %v59_v23  ;;  %v129_v26 = vmul.f32 %v5409_v20, %v5409_v20  ;;  %v131_v27 = vmul.f32 %v5411_v21, %v5411_v21 }
  0x93   :  { %v5417_v28 = vsub.f32 %v31_v2, %v98_v24  ;;  %v5419_v29 = vsub.f32 %v33_v5, %v100_v25  ;;  %v145_v30 = vsel %vm47_vm0, %v129_v26, 0.0  ;;  %v151_v33 = vsel %vm47_vm0, %v131_v27, 0.0  ;;  %v5487_v2 = vld [vmem:[%s7184_s0 + $0x68] sm:$0xff] }
  0x94   :  { %146 = vadd.xlane.f32.xlu0 %v145_v30  ;;  %v62_v31 = vpop.xlane.xlu0 %61  ;;  %v65_v32 = vpop.xlane.xlu1 %64  ;;  %v87_v4 = vsel %vm47_vm0, %v5487_v2, 0.0  ;;  %v90_v5 = vsel %vm47_vm0, %v5492_v3, 0.0  ;;  %v5511_v26 = vshrl.u32 %v257_v17, 7 }
  0x95   :  { %v101_v34 = vmul.f32 0.03125, %v62_v31  ;;  %v102_v35 = vmul.f32 0.03125, %v65_v32  ;;  %v130_v36 = vmul.f32 %v5417_v28, %v5417_v28  ;;  %v132_v37 = vmul.f32 %v5419_v29, %v5419_v29 }
  0x97   :  { %v5427_v38 = vsub.f32 %v34_v8, %v101_v34  ;;  %v5429_v39 = vsub.f32 %v35_v9, %v102_v35  ;;  %v148_v40 = vsel %vm47_vm0, %v130_v36, 0.0  ;;  %v154_v43 = vsel %vm47_vm0, %v132_v37, 0.0  ;;  %v4950_v8 = vld [vmem:[%s7185_s2 + $0x8] sm:$0xff]   ;;  %v4951_v9 = vld [vmem:[%s7185_s2] sm:$0xff]  }
  0x98   :  { %152 = vadd.xlane.f32.xlu0 %v151_v33  ;;  %149 = vadd.xlane.f32.xlu1 %v148_v40  ;;  %v68_v41 = vpop.xlane.xlu0 %67  ;;  %v71_v42 = vpop.xlane.xlu1 %70  ;;  %v259_v35 = vsub.s32 0, %v5511_v26  ;;  %v46_v40 = vld [vmem:[%s7186_s1] sm:$0x3f] }
  0x99   :  { %v103_v44 = vmul.f32 0.03125, %v68_v41  ;;  %v104_v45 = vmul.f32 0.03125, %v71_v42  ;;  %v133_v46 = vmul.f32 %v5427_v38, %v5427_v38  ;;  %v134_v47 = vmul.f32 %v5429_v39, %v5429_v39  ;;  %4491 = vmatprep.subr.bf16.mxu1 %v4950_v8 }
  0x9a   :  { %4492 = vmatpush3.bf16.msra.mxu1 %v4950_v8 }
  0x9b   :  { %v5437_v48 = vsub.f32 %v36_v12, %v103_v44  ;;  %v5439_v49 = vsub.f32 %v37_v13, %v104_v45  ;;  %v157_v50 = vsel %vm47_vm0, %v133_v46, 0.0  ;;  %v160_v51 = vsel %vm47_vm0, %v134_v47, 0.0  ;;  %4493 = vmatprep.subr.bf16.mxu1 %v4951_v9 }
  0x9c   :  { %155 = vadd.xlane.f32.xlu1 %v154_v43  ;;  %158 = vadd.xlane.f32.xlu0 %v157_v50  ;;  %v5517_v46 = vrot.slane %v46_v40, %v259_v35  ;;  %v279_v47 = vsub.s32 1, %v5511_v26 }
  0x9d   :  { %v135_v52 = vmul.f32 %v5437_v48, %v5437_v48  ;;  %v136_v53 = vmul.f32 %v5439_v49, %v5439_v49 }
  0x9e   :  { %4494 = vmatpush3.bf16.msra.mxu1 %v4951_v9 }
  0x9f   :  { %v163_v55 = vsel %vm47_vm0, %v135_v52, 0.0  ;;  %v166_v56 = vsel %vm47_vm0, %v136_v53, 0.0 }
  0xa0   :  { %161 = vadd.xlane.f32.xlu1 %v160_v51  ;;  %164 = vadd.xlane.f32.xlu0 %v163_v55 }
  0xa4   :  { %167 = vadd.xlane.f32.xlu1 %v166_v56  ;;  %73 = vadd.xlane.f32.xlu0 %v72_v57 }
  0xa8   :  { %76 = vadd.xlane.f32.xlu1 %v75_v60  ;;  %79 = vadd.xlane.f32.xlu0 %v78_v61 }
  0xac   :  { %82 = vadd.xlane.f32.xlu1 %v81_v0  ;;  %85 = vadd.xlane.f32.xlu0 %v84_v1  ;;  %v5525_v0 = vrot.slane %v46_v40, %v279_v47 }
  0xb0   :  { %88 = vadd.xlane.f32.xlu1 %v87_v4  ;;  %91 = vadd.xlane.f32.xlu0 %v90_v5 }
  0xb4   :  { %94 = vadd.xlane.f32.xlu1 %v93_v7 }
 0x11d   :  { %v147_v10 = vpop.xlane.xlu0 %146 }
 0x11e   :  { %v193_v11 = vmul.f32 0.03125, %v147_v10 }
 0x120   :  { %v209_v12 = vadd.f32 1e-05, %v193_v11 }
 0x121   :  { %v150_v13 = vpop.xlane.xlu1 %149  ;;  %v153_v14 = vpop.xlane.xlu0 %152 }
 0x122   :  { %4962 = vrsqrt.f32 %v209_v12  ;;  %v194_v15 = vmul.f32 0.03125, %v150_v13  ;;  %v195_v16 = vmul.f32 0.03125, %v153_v14 }
 0x124   :  { %v210_v18 = vadd.f32 1e-05, %v194_v15  ;;  %v211_v19 = vadd.f32 1e-05, %v195_v16 }
 0x125   :  { %v156_v22 = vpop.xlane.xlu1 %155  ;;  %v159_v23 = vpop.xlane.xlu0 %158 }
 0x126   :  { %4964 = vrsqrt.f32 %v210_v18  ;;  %v196_v24 = vmul.f32 0.03125, %v156_v22  ;;  %v197_v25 = vmul.f32 0.03125, %v159_v23 }
 0x127   :  { %4966 = vrsqrt.f32 %v211_v19 }
 0x128   :  { %v212_v27 = vadd.f32 1e-05, %v196_v24  ;;  %v213_v30 = vadd.f32 1e-05, %v197_v25 }
 0x129   :  { %v162_v31 = vpop.xlane.xlu1 %161  ;;  %v165_v32 = vpop.xlane.xlu0 %164 }
 0x12a   :  { %4968 = vrsqrt.f32 %v212_v27  ;;  %v198_v33 = vmul.f32 0.03125, %v162_v31  ;;  %v199_v34 = vmul.f32 0.03125, %v165_v32 }
 0x12b   :  { %4970 = vrsqrt.f32 %v213_v30 }
 0x12c   :  { %v214_v36 = vadd.f32 1e-05, %v198_v33  ;;  %v215_v37 = vadd.f32 1e-05, %v199_v34 }
 0x12d   :  { %v168_v41 = vpop.xlane.xlu1 %167  ;;  %v74_v42 = vpop.xlane.xlu0 %73 }
 0x12e   :  { %4972 = vrsqrt.f32 %v214_v36  ;;  %v200_v43 = vmul.f32 0.03125, %v168_v41  ;;  %v105_v44 = vmul.f32 0.03125, %v74_v42 }
 0x12f   :  { %v4963_v45 = vpop.eup %4962  ;;  %4974 = vrsqrt.f32 %v215_v37 }
 0x130   :  { %v216_v50 = vadd.f32 1e-05, %v200_v43  ;;  %v5521_v51 = vsub.f32 %v5450_v54, %v105_v44  ;;  %v241_v52 = vmul.f32 %v4963_v45, %v5409_v20 }
 0x131   :  { %v77_v53 = vpop.xlane.xlu1 %76  ;;  %v80_v55 = vpop.xlane.xlu0 %79 }
 0x132   :  { %4976 = vrsqrt.f32 %v216_v50  ;;  %v106_v56 = vmul.f32 0.03125, %v77_v53  ;;  %v107_v57 = vmul.f32 0.03125, %v80_v55  ;;  %v261_v61 = vmul.f32 %v5517_v46, %v241_v52 }
 0x133   :  { %v4965_v60 = vpop.eup %4964  ;;  %v137_v1 = vmul.f32 %v5521_v51, %v5521_v51 }
 0x134   :  { %v4967_v4 = vpop.eup %4966  ;;  %v5530_v5 = vsub.f32 %v5459_v58, %v106_v56  ;;  %v242_v54 = vmul.f32 %v4965_v60, %v5417_v28  ;;  %v5534_v20 = vsub.f32 %v5464_v59, %v107_v57  ;;  %v5542_v28 = vadd.f32 %v5525_v0, %v261_v61 }
 0x135   :  { %v83_v7 = vpop.xlane.xlu1 %82  ;;  %v243_v8 = vmul.f32 %v4967_v4, %v5411_v21  ;;  %v86_v9 = vpop.xlane.xlu0 %85  ;;  %v169_v10 = vsel %vm47_vm0, %v137_v1, 0.0 }
 0x136   :  { %v262_v11 = vmul.f32 %v5517_v46, %v242_v54  ;;  %v108_v12 = vmul.f32 0.03125, %v83_v7  ;;  %v138_v13 = vmul.f32 %v5530_v5, %v5530_v5  ;;  %v109_v14 = vmul.f32 0.03125, %v86_v9  ;;  %170 = vadd.xlane.f32.xlu0 %v169_v10 }
 0x137   :  { %v4969_v58 = vpop.eup %4968  ;;  %v263_v59 = vmul.f32 %v5517_v46, %v243_v8  ;;  %v139_v21 = vmul.f32 %v5534_v20, %v5534_v20 }
 0x138   :  { %v4971_v15 = vpop.eup %4970  ;;  %v5548_v16 = vadd.f32 %v5525_v0, %v262_v11  ;;  %v5551_v17 = vsub.f32 %v5473_v62, %v108_v12  ;;  %v244_v18 = vmul.f32 %v4969_v58, %v5419_v29  ;;  %v172_v19 = vsel %vm47_vm0, %v138_v13, 0.0 }
 0x139   :  { %173 = vadd.xlane.f32.xlu1 %v172_v19  ;;  %v5556_v22 = vsub.f32 %v5478_v63, %v109_v14  ;;  %v245_v23 = vmul.f32 %v4971_v15, %v5427_v38  ;;  %v89_v24 = vpop.xlane.xlu1 %88  ;;  %v175_v25 = vsel %vm47_vm0, %v139_v21, 0.0  ;;  %v92_v27 = vpop.xlane.xlu0 %91  ;;  %v5566_v63 = vadd.f32 %v5525_v0, %v263_v59 }
 0x13a   :  { %v297_v30 = vpack.c.bf16 %v5548_v16, %v5542_v28  ;;  %v264_v62 = vmul.f32 %v5517_v46, %v244_v18  ;;  %v140_v29 = vmul.f32 %v5551_v17, %v5551_v17  ;;  %v110_v31 = vmul.f32 0.03125, %v89_v24  ;;  %176 = vadd.xlane.f32.xlu0 %v175_v25 }
 0x13b   :  { %v4973_v32 = vpop.eup %4972  ;;  %v265_v38 = vmul.f32 %v5517_v46, %v245_v23  ;;  %v141_v33 = vmul.f32 %v5556_v22, %v5556_v22  ;;  %v111_v34 = vmul.f32 0.03125, %v92_v27 }
 0x13c   :  { %v4975_v35 = vpop.eup %4974  ;;  %4495 = vmatprep.mubr.msk.bf16.mxu1 %vm47_vm0, %v297_v30  ;;  %v5573_v36 = vadd.f32 %v5525_v0, %v264_v62  ;;  %v246_v37 = vmul.f32 %v4973_v32, %v5429_v39  ;;  %v178_v40 = vsel %vm47_vm0, %v140_v29, 0.0  ;;  %v5578_v41 = vsub.f32 %v5487_v2, %v110_v31 }
 0x13d   :  { %179 = vadd.xlane.f32.xlu1 %v178_v40  ;;  %v247_v42 = vmul.f32 %v4975_v35, %v5437_v48  ;;  %v181_v43 = vsel %vm47_vm0, %v141_v33, 0.0  ;;  %v5583_v44 = vsub.f32 %v5492_v3, %v111_v34  ;;  %v95_v45 = vpop.xlane.xlu1 %94  ;;  %v5592_v48 = vadd.f32 %v5525_v0, %v265_v38 }
 0x13e   :  { %v298_v47 = vpack.c.bf16 %v5573_v36, %v5566_v63  ;;  %v266_v50 = vmul.f32 %v5517_v46, %v246_v37  ;;  %v112_v39 = vmul.f32 0.03125, %v95_v45  ;;  %v142_v52 = vmul.f32 %v5578_v41, %v5578_v41 }
 0x13f   :  { %v4977_v2 = vpop.eup %4976  ;;  %v267_v55 = vmul.f32 %v5517_v46, %v247_v42  ;;  %v143_v56 = vmul.f32 %v5583_v44, %v5583_v44 }
 0x140   :  { %4496 = vmatmul.mubr.msk.bf16.vlgmr.msra.gmra.mxu1 %vm47_vm0, %v298_v47  ;;  %v5595_v53 = vadd.f32 %v5525_v0, %v266_v50  ;;  %v248_v3 = vmul.f32 %v4977_v2, %v5439_v49  ;;  %v5605_v61 = vsub.f32 %v5501_v6, %v112_v39  ;;  %v184_v1 = vsel %vm47_vm0, %v142_v52, 0.0 }
 0x141   :  { %182 = vadd.xlane.f32.xlu1 %v181_v43  ;;  %v5610_v49 = vadd.f32 %v5525_v0, %v267_v55  ;;  %v187_v7 = vsel %vm47_vm0, %v143_v56, 0.0 }
 0x142   :  { %v299_v57 = vpack.c.bf16 %v5595_v53, %v5592_v48  ;;  %v268_v60 = vmul.f32 %v5517_v46, %v248_v3  ;;  %v144_v6 = vmul.f32 %v5605_v61, %v5605_v61 }
 0x144   :  { %4499 = vmatprep.mubr.msk.bf16.mxu1 %vm47_vm0, %v299_v57  ;;  %v5613_v4 = vadd.f32 %v5525_v0, %v268_v60  ;;  %v190_v8 = vsel %vm47_vm0, %v144_v6, 0.0 }
 0x145   :  { %185 = vadd.xlane.f32.xlu1 %v184_v1 }
 0x146   :  { %v300_v54 = vpack.c.bf16 %v5613_v4, %v5610_v49 }
 0x148   :  { %4500 = vmatmul.mubr.msk.bf16.gmra.mxu1 %vm47_vm0, %v300_v54 }
 0x149   :  { %188 = vadd.xlane.f32.xlu1 %v187_v7 }
 0x14d   :  { %191 = vadd.xlane.f32.xlu1 %v190_v8 }
 0x1bf   :  { %v171_v9 = vpop.xlane.xlu0 %170 }
 0x1c0   :  { %v201_v10 = vmul.f32 0.03125, %v171_v9 }
 0x1c2   :  { %v174_v11 = vpop.xlane.xlu1 %173  ;;  %v217_v12 = vadd.f32 1e-05, %v201_v10 }
 0x1c3   :  { %v202_v13 = vmul.f32 0.03125, %v174_v11  ;;  %v177_v14 = vpop.xlane.xlu0 %176 }
 0x1c4   :  { %4978 = vrsqrt.f32 %v217_v12  ;;  %v203_v58 = vmul.f32 0.03125, %v177_v14 }
 0x1c5   :  { %v218_v59 = vadd.f32 1e-05, %v202_v13 }
 0x1c6   :  { %v180_v21 = vpop.xlane.xlu1 %179  ;;  %v219_v15 = vadd.f32 1e-05, %v203_v58 }
 0x1c7   :  { %4980 = vrsqrt.f32 %v218_v59  ;;  %v204_v18 = vmul.f32 0.03125, %v180_v21 }
 0x1c8   :  { %4982 = vrsqrt.f32 %v219_v15 }
 0x1c9   :  { %v220_v19 = vadd.f32 1e-05, %v204_v18 }
 0x1ca   :  { %v183_v23 = vpop.xlane.xlu1 %182 }
 0x1cb   :  { %4984 = vrsqrt.f32 %v220_v19  ;;  %v205_v24 = vmul.f32 0.03125, %v183_v23 }
 0x1cd   :  { %v221_v25 = vadd.f32 1e-05, %v205_v24 }
 0x1ce   :  { %v186_v27 = vpop.xlane.xlu1 %185 }
 0x1cf   :  { %4986 = vrsqrt.f32 %v221_v25  ;;  %v206_v30 = vmul.f32 0.03125, %v186_v27 }
 0x1d1   :  { %v4979_v62 = vpop.eup %4978  ;;  %v222_v29 = vadd.f32 1e-05, %v206_v30 }
 0x1d2   :  { %v189_v31 = vpop.xlane.xlu1 %188  ;;  %v249_v32 = vmul.f32 %v4979_v62, %v5521_v51 }
 0x1d3   :  { %4988 = vrsqrt.f32 %v222_v29  ;;  %v207_v38 = vmul.f32 0.03125, %v189_v31 }
 0x1d4   :  { %v4981_v33 = vpop.eup %4980  ;;  %v269_v34 = vmul.f32 %v5517_v46, %v249_v32 }
 0x1d5   :  { %v4983_v35 = vpop.eup %4982  ;;  %v223_v37 = vadd.f32 1e-05, %v207_v38  ;;  %v250_v40 = vmul.f32 %v4981_v33, %v5530_v5 }
 0x1d6   :  { %v192_v42 = vpop.xlane.xlu1 %191  ;;  %v251_v43 = vmul.f32 %v4983_v35, %v5534_v20  ;;  %v5628_v50 = vadd.f32 %v5525_v0, %v269_v34 }
 0x1d7   :  { %4990 = vrsqrt.f32 %v223_v37  ;;  %v208_v45 = vmul.f32 0.03125, %v192_v42  ;;  %v270_v47 = vmul.f32 %v5517_v46, %v250_v40 }
 0x1d8   :  { %v4985_v51 = vpop.eup %4984  ;;  %v271_v39 = vmul.f32 %v5517_v46, %v251_v43 }
 0x1d9   :  { %v224_v52 = vadd.f32 1e-05, %v208_v45  ;;  %v5632_v2 = vadd.f32 %v5525_v0, %v270_v47  ;;  %v252_v3 = vmul.f32 %v4985_v51, %v5551_v17 }
 0x1da   :  { %v5639_v55 = vadd.f32 %v5525_v0, %v271_v39 }
 0x1db   :  { %4992 = vrsqrt.f32 %v224_v52  ;;  %v301_v5 = vpack.c.bf16 %v5632_v2, %v5628_v50  ;;  %v272_v20 = vmul.f32 %v5517_v46, %v252_v3 }
 0x1dc   :  { %v4987_v56 = vpop.eup %4986 }
 0x1dd   :  { %4503 = vmatprep.mubr.msk.bf16.mxu1 %vm47_vm0, %v301_v5  ;;  %v5643_v57 = vadd.f32 %v5525_v0, %v272_v20  ;;  %v253_v60 = vmul.f32 %v4987_v56, %v5556_v22 }
 0x1df   :  { %7198 = vst [vmem:[#allocation2_spill] sm:$0xff] %v5643_v57  ;;  %v302_v17 = vpack.c.bf16 %v5643_v57, %v5639_v55  ;;  %v273_v1 = vmul.f32 %v5517_v46, %v253_v60 }
 0x1e0   :  { %v4989_v54 = vpop.eup %4988 }
 0x1e1   :  { %4504 = vmatmul.mubr.msk.bf16.gmra.mxu1 %vm47_vm0, %v302_v17  ;;  %v254_v7 = vmul.f32 %v4989_v54, %v5578_v41  ;;  %v5653_v8 = vadd.f32 %v5525_v0, %v273_v1 }
 0x1e3   :  { %v274_v6 = vmul.f32 %v5517_v46, %v254_v7  ;;  %7199 = vst [vmem:[#allocation3_spill] sm:$0xff] %v5653_v8 }
 0x1e4   :  { %v4991_v9 = vpop.eup %4990 }
 0x1e5   :  { %v5656_v10 = vadd.f32 %v5525_v0, %v274_v6  ;;  %v255_v22 = vmul.f32 %v4991_v9, %v5583_v44 }
 0x1e7   :  { %7200 = vst [vmem:[#allocation4_spill] sm:$0xff] %v5656_v10  ;;  %v303_v11 = vpack.c.bf16 %v5656_v10, %v5653_v8  ;;  %v275_v12 = vmul.f32 %v5517_v46, %v255_v22 }
 0x1e8   :  { %v4993_v13 = vpop.eup %4992 }
 0x1e9   :  { %4507 = vmatprep.mubr.msk.bf16.mxu1 %vm47_vm0, %v303_v11  ;;  %v256_v41 = vmul.f32 %v4993_v13, %v5605_v61  ;;  %v5666_v58 = vadd.f32 %v5525_v0, %v275_v12  ;;  %v5677_v61 = vld [vmem:[%s7187_s3] ss:$0 sm:$0xff] }
 0x1eb   :  { %v276_v14 = vmul.f32 %v5517_v46, %v256_v41  ;;  %7201 = vst [vmem:[#allocation5_spill] sm:$0xff] %v5666_v58 }
 0x1ed   :  { %v5669_v59 = vadd.f32 %v5525_v0, %v276_v14 }
 0x1ef   :  { %7202 = vst [vmem:[#allocation6_spill] sm:$0xff] %v5669_v59  ;;  %v304_v44 = vpack.c.bf16 %v5669_v59, %v5666_v58 }
 0x1f1   :  { %4508 = vmatmul.mubr.msk.bf16.gmra.mxu1 %vm47_vm0, %v304_v44 }
 0x200   :  { %v4497_v21 = vpop.f32.mrf.mxu1 }
 0x201   :  { %v395_v34 = vadd.f32 %v4497_v21, %v5677_v61 }
 0x202   :  { %v386_v15 = vpop.f32.mrf.mxu1 }
 0x203   :  { %v387_v19 = vadd.f32 %v5677_v61, %v386_v15 }
 0x204   :  { %v4498_v18 = vpop.f32.mrf.mxu1 }
 0x205   :  { %v398_v31 = vadd.f32 %v4498_v18, %v5677_v61 }
 0x206   :  { %v389_v46 = vpop.f32.mrf.mxu1 }
 0x207   :  { %v390_v23 = vadd.f32 %v5677_v61, %v389_v46  ;;  %v5697_v37 = vpack.c.bf16 %v398_v31, %v395_v34 }
 0x208   :  { %v4501_v0 = vpop.f32.mrf.mxu1 }
 0x209   :  { %v5681_v24 = vpack.c.bf16 %v390_v23, %v387_v19  ;;  %v411_v30 = vadd.f32 %v4501_v0, %v5677_v61 }
 0x20a   :  { %v402_v25 = vpop.f32.mrf.mxu1 }
 0x20b   :  { %4519 = vmatprep.mubr.msk.bf16.mxu0 %vm473_vm1, %v5681_v24  ;;  %v403_v32 = vadd.f32 %v5677_v61, %v402_v25 }
 0x20c   :  { %v4502_v27 = vpop.f32.mrf.mxu1 }
 0x20d   :  { %v414_v62 = vadd.f32 %v4502_v27, %v5677_v61 }
 0x20e   :  { %v405_v29 = vpop.f32.mrf.mxu1 }
 0x20f   :  { %v5689_v38 = vpack.c.bf16 %v414_v62, %v411_v30  ;;  %v406_v33 = vadd.f32 %v5677_v61, %v405_v29 }
 0x211   :  { %v5693_v35 = vpack.c.bf16 %v406_v33, %v403_v32  ;;  %471 = vrot.lane.b32.xlu0 %v5689_v38, %s5321_s21 }
 0x213   :  { %469 = vrot.lane.b32.xlu1 %v5693_v35, %s5321_s21 }
 0x215   :  { %467 = vrot.lane.b32.xlu0 %v5697_v37, %s5321_s21 }
 0x217   :  { %761 = vrot.lane.b32.xlu1 %v5693_v35, %s5322_s22 }
 0x219   :  { %763 = vrot.lane.b32.xlu0 %v5689_v38, %s5322_s22 }
 0x21b   :  { %757 = vrot.lane.b32.xlu1 %v5681_v24, %s5322_s22 }
 0x21d   :  { %465 = vrot.lane.b32.xlu0 %v5681_v24, %s5321_s21 }
 0x21f   :  { %751 = vrot.lane.b32.xlu1 %v5697_v37, %s5323_s23 }
 0x221   :  { %759 = vrot.lane.b32.xlu0 %v5697_v37, %s5322_s22 }
 0x223   :  { %755 = vrot.lane.b32.xlu1 %v5689_v38, %s5323_s23 }
 0x225   :  { %749 = vrot.lane.b32.xlu0 %v5681_v24, %s5323_s23 }
 0x227   :  { %660 = vrot.lane.b32.xlu1 %v5693_v35, %s5324_s24 }
 0x229   :  { %753 = vrot.lane.b32.xlu0 %v5693_v35, %s5323_s23 }
 0x22d   :  { %662 = vrot.lane.b32.xlu0 %v5689_v38, %s5324_s24 }
 0x231   :  { %658 = vrot.lane.b32.xlu0 %v5697_v37, %s5324_s24 }
 0x283   :  { %v472_v40 = vpop.permute.xlu0 %471 }
 0x284   :  { %4899 = vmatprep.subr.msk.bf16.mxu0 %vm473_vm1, %v472_v40  ;;  %v496_v42 = vsel %vm473_vm1, %v472_v40, 0 }
 0x285   :  { %v470_v43 = vpop.permute.xlu1 %469  ;;  %4512 = vmatpush3.bf16.xpose.msra.mxu0 %v496_v42 }
 0x286   :  { %4900 = vmatprep.subr.msk.bf16.mxu0 %vm473_vm1, %v470_v43  ;;  %v493_v51 = vsel %vm473_vm1, %v470_v43, 0 }
 0x287   :  { %v468_v45 = vpop.permute.xlu0 %467 }
 0x288   :  { %v490_v56 = vsel %vm473_vm1, %v468_v45, 0 }
 0x289   :  { %v762_v52 = vpop.permute.xlu1 %761 }
 0x28a   :  { %v784_v60 = vsel %vm473_vm1, %v762_v52, 0 }
 0x28b   :  { %v764_v47 = vpop.permute.xlu0 %763 }
 0x28c   :  { %4903 = vmatprep.subr.msk.bf16.mxu1 %vm473_vm1, %v764_v47  ;;  %v787_v39 = vsel %vm473_vm1, %v764_v47, 0 }
 0x28d   :  { %4514 = vmatpush3.bf16.xpose.msra.mxu0 %v493_v51  ;;  %4544 = vmatpush3.bf16.xpose.msra.mxu1 %v787_v39  ;;  %v758_v5 = vpop.permute.xlu1 %757 }
 0x28e   :  { %4901 = vmatprep.subr.msk.bf16.mxu0 %vm473_vm1, %v468_v45  ;;  %4904 = vmatprep.subr.msk.bf16.mxu1 %vm473_vm1, %v762_v52  ;;  %v778_v14 = vsel %vm473_vm1, %v758_v5, 0 }
 0x28f   :  { %v466_v3 = vpop.permute.xlu0 %465 }
 0x290   :  { %v487_v7 = vsel %vm473_vm1, %v466_v3, 0 }
 0x291   :  { %v752_v1 = vpop.permute.xlu1 %751 }
 0x293   :  { %v760_v20 = vpop.permute.xlu0 %759 }
 0x294   :  { %v781_v6 = vsel %vm473_vm1, %v760_v20, 0 }
 0x295   :  { %4516 = vmatpush3.bf16.xpose.msra.mxu0 %v490_v56  ;;  %4546 = vmatpush3.bf16.xpose.msra.mxu1 %v784_v60  ;;  %v756_v9 = vpop.permute.xlu1 %755 }
 0x296   :  { %4902 = vmatprep.subr.msk.bf16.mxu0 %vm473_vm1, %v466_v3  ;;  %4905 = vmatprep.subr.msk.bf16.mxu1 %vm473_vm1, %v760_v20 }
 0x297   :  { %v750_v17 = vpop.permute.xlu0 %749 }
 0x298   :  { %4551 = vmatprep.mubr.msk.bf16.mxu1 %vm473_vm1, %v750_v17 }
 0x299   :  { %v661_v41 = vpop.permute.xlu1 %660 }
 0x29b   :  { %v754_v54 = vpop.permute.xlu0 %753 }
 0x29d   :  { %4518 = vmatpush3.bf16.xpose.msra.mxu0 %v487_v7  ;;  %4548 = vmatpush3.bf16.xpose.msra.mxu1 %v781_v6 }
 0x29e   :  { %4906 = vmatprep.subr.msk.bf16.mxu1 %vm473_vm1, %v758_v5 }
 0x29f   :  { %v663_v22 = vpop.permute.xlu0 %662 }
 0x2a0   :  { %4527 = vmatprep.subr.bf16.mxu0 %v663_v22 }
 0x2a1   :  { %v4505_v11 = vpop.f32.mrf.mxu1 }
 0x2a2   :  { %v427_v13 = vadd.f32 %v4505_v11, %v5677_v61 }
 0x2a3   :  { %v5743_v12 = vpop.f32.mrf.mxu1  ;;  %v659_v18 = vpop.permute.xlu0 %658 }
 0x2a4   :  { %4520 = vmatmul.mubr.msk.bf16.vlgmr.msra.gmra.mxu0 %vm473_vm1, %v5697_v37 }
 0x2a5   :  { %4523 = vmatprep.mubr.msk.bf16.mxu0 %vm473_vm1, %v5693_v35  ;;  %4528 = vmatpush3.bf16.msra.mxu0 %v663_v22  ;;  %v4506_v44 = vpop.f32.mrf.mxu1 }
 0x2a6   :  { %4550 = vmatpush3.bf16.xpose.msra.mxu1 %v778_v14  ;;  %4529 = vmatprep.subr.bf16.mxu0 %v661_v41  ;;  %v430_v21 = vadd.f32 %v4506_v44, %v5677_v61 }
 0x2a7   :  { %v5758_v46 = vpop.f32.mrf.mxu1 }
 0x2a8   :  { %v5752_v15 = vpack.c.bf16 %v430_v21, %v427_v13 }
 0x2a9   :  { %4530 = vmatpush3.bf16.msra.mxu0 %v661_v41 }
 0x2aa   :  { %4531 = vmatprep.subr.bf16.mxu0 %v659_v18 }
 0x2ac   :  { %4524 = vmatmul.mubr.msk.bf16.gmra.mxu0 %vm473_vm1, %v5689_v38 }
 0x2ad   :  { %4552 = vmatmul.mubr.msk.bf16.vlgmr.msra.gmra.mxu1 %vm473_vm1, %v752_v1  ;;  %4532 = vmatpush3.bf16.msra.mxu0 %v659_v18 }
 0x2ae   :  { %4555 = vmatprep.mubr.msk.bf16.mxu1 %vm473_vm1, %v754_v54 }
 0x2b1   :  { %v4509_v19 = vpop.f32.mrf.mxu1 }
 0x2b2   :  { %v443_v0 = vadd.f32 %v4509_v19, %v5677_v61 }
 0x2b3   :  { %v5760_v23 = vpop.f32.mrf.mxu1 }
 0x2b5   :  { %4556 = vmatmul.mubr.msk.bf16.gmra.mxu1 %vm473_vm1, %v756_v9  ;;  %v4510_v25 = vpop.f32.mrf.mxu1 }
 0x2b6   :  { %v446_v27 = vadd.f32 %v4510_v25, %v5677_v61 }
 0x2b7   :  { %v5768_v32 = vpop.f32.mrf.mxu1 }
 0x2b8   :  { %v5765_v30 = vpack.c.bf16 %v446_v27, %v443_v0 }
 0x364   :  { %v4521_v62 = vpop.f32.mrf.mxu0 }
 0x365   :  { %v570_v29 = vsel %vm563_vm2, %v4521_v62, -inf }
 0x366   :  { %571 = vmax.xlane.f32.xlu0 %v570_v29  ;;  %v532_v31 = vpop.f32.mrf.mxu0 }
 0x367   :  { %v564_v47 = vsel %vm563_vm2, %v532_v31, -inf }
 0x368   :  { %v5770_v33 = vpop.f32.mrf.mxu0 }
 0x369   :  { %v573_v60 = vsel %vm563_vm2, %v5770_v33, -inf }
 0x36a   :  { %v5773_v42 = vpop.f32.mrf.mxu0 }
 0x36b   :  { %v567_v5 = vsel %vm563_vm2, %v5773_v42, -inf }
 0x36c   :  { %v5780_v39 = vpop.f32.mrf.mxu0 }
 0x36d   :  { %v4553_v34 = vpop.f32.mrf.mxu1  ;;  %v582_v7 = vsel %vm563_vm2, %v5780_v39, -inf }
 0x36e   :  { %v860_v40 = vsel %vm563_vm2, %v4553_v34, -inf  ;;  %v5787_v20 = vpop.f32.mrf.mxu0 }
 0x36f   :  { %861 = vmax.xlane.f32.xlu0 %v860_v40  ;;  %v823_v43 = vpop.f32.mrf.mxu1  ;;  %v576_v41 = vsel %vm563_vm2, %v5787_v20, -inf }
 0x370   :  { %v854_v3 = vsel %vm563_vm2, %v823_v43, -inf  ;;  %v5795_v1 = vpop.f32.mrf.mxu0 }
 0x371   :  { %v5775_v45 = vpop.f32.mrf.mxu1  ;;  %v585_v6 = vsel %vm563_vm2, %v5795_v1, -inf }
 0x372   :  { %v863_v51 = vsel %vm563_vm2, %v5775_v45, -inf  ;;  %v5809_v13 = vpop.f32.mrf.mxu0 }
 0x373   :  { %565 = vmax.xlane.f32.xlu0 %v564_v47  ;;  %864 = vmax.xlane.f32.xlu1 %v863_v51  ;;  %v5782_v52 = vpop.f32.mrf.mxu1  ;;  %v579_v14 = vsel %vm563_vm2, %v5809_v13, -inf }
 0x374   :  { %v857_v17 = vsel %vm563_vm2, %v5782_v52, -inf }
 0x375   :  { %v5789_v56 = vpop.f32.mrf.mxu1 }
 0x376   :  { %v872_v22 = vsel %vm563_vm2, %v5789_v56, -inf }
 0x377   :  { %855 = vmax.xlane.f32.xlu0 %v854_v3  ;;  %568 = vmax.xlane.f32.xlu1 %v567_v5  ;;  %v5797_v54 = vpop.f32.mrf.mxu1 }
 0x378   :  { %v866_v18 = vsel %vm563_vm2, %v5797_v54, -inf }
 0x379   :  { %v5803_v9 = vpop.f32.mrf.mxu1 }
 0x37a   :  { %v875_v11 = vsel %vm563_vm2, %v5803_v9, -inf }
 0x37b   :  { %574 = vmax.xlane.f32.xlu0 %v573_v60  ;;  %858 = vmax.xlane.f32.xlu1 %v857_v17  ;;  %v5815_v44 = vpop.f32.mrf.mxu1 }
 0x37c   :  { %v869_v21 = vsel %vm563_vm2, %v5815_v44, -inf }
 0x37f   :  { %583 = vmax.xlane.f32.xlu0 %v582_v7  ;;  %586 = vmax.xlane.f32.xlu1 %v585_v6 }
 0x383   :  { %873 = vmax.xlane.f32.xlu0 %v872_v22  ;;  %876 = vmax.xlane.f32.xlu1 %v875_v11 }
 0x387   :  { %577 = vmax.xlane.f32.xlu0 %v576_v41  ;;  %580 = vmax.xlane.f32.xlu1 %v579_v14 }
 0x38b   :  { %870 = vmax.xlane.f32.xlu1 %v869_v21 }
 0x39c   :  { %950 = vrot.lane.b32.xlu1 %v5693_v35, %s5325_s25 }
 0x39d   :  { %656 = vrot.lane.b32.xlu0 %v5681_v24, %s5324_s24 }
 0x3bc   :  { %867 = vmax.xlane.f32.xlu0 %v866_v18 }
 0x3d2   :  { %952 = vrot.lane.b32.xlu0 %v5689_v38, %s5325_s25 }
 0x3ef   :  { %v572_v19 = vpop.xlane.xlu0 %571 }
 0x3f0   :  { %v590_v0 = vsub.f32 %v4521_v62, %v572_v19 }
 0x3f2   :  { %v600_v25 = vmul.f32 1.442695, %v590_v0 }
 0x3f4   :  { %4994 = vpow2.f32 %v600_v25 }
 0x3f8   :  { %v862_v27 = vpop.xlane.xlu0 %861 }
 0x3f9   :  { %v880_v29 = vsub.f32 %v4553_v34, %v862_v27 }
 0x3fb   :  { %v890_v40 = vmul.f32 1.442695, %v880_v29 }
 0x3fc   :  { %v865_v47 = vpop.xlane.xlu1 %864  ;;  %v566_v51 = vpop.xlane.xlu0 %565 }
 0x3fd   :  { %4996 = vpow2.f32 %v890_v40  ;;  %v588_v3 = vsub.f32 %v532_v31, %v566_v51  ;;  %v881_v11 = vsub.f32 %v5775_v45, %v865_v47 }
 0x3ff   :  { %v596_v5 = vmul.f32 1.442695, %v588_v3  ;;  %v892_v21 = vmul.f32 1.442695, %v881_v11 }
 0x400   :  { %v569_v60 = vpop.xlane.xlu1 %568  ;;  %v856_v17 = vpop.xlane.xlu0 %855 }
 0x401   :  { %v5827_v7 = vpop.eup %4994  ;;  %v878_v6 = vsub.f32 %v823_v43, %v856_v17  ;;  %4998 = vpow2.f32 %v596_v5  ;;  %v589_v18 = vsub.f32 %v5773_v42, %v569_v60 }
 0x402   :  { %v618_v22 = vsel %vm563_vm2, %v5827_v7, 0.0 }
 0x403   :  { %v886_v62 = vmul.f32 1.442695, %v878_v6  ;;  %619 = vadd.xlane.f32.xlu0 %v618_v22  ;;  %v598_v29 = vmul.f32 1.442695, %v589_v18 }
 0x404   :  { %v575_v34 = vpop.xlane.xlu0 %574  ;;  %v859_v41 = vpop.xlane.xlu1 %858 }
 0x405   :  { %v591_v14 = vsub.f32 %v5770_v33, %v575_v34  ;;  %5000 = vpow2.f32 %v886_v62  ;;  %v879_v33 = vsub.f32 %v5782_v52, %v859_v41 }
 0x407   :  { %v602_v31 = vmul.f32 1.442695, %v591_v14  ;;  %v888_v42 = vmul.f32 1.442695, %v879_v33 }
 0x408   :  { %v584_v19 = vpop.xlane.xlu0 %583  ;;  %v587_v25 = vpop.xlane.xlu1 %586 }
 0x409   :  { %v594_v43 = vsub.f32 %v5780_v39, %v584_v19  ;;  %5002 = vpow2.f32 %v602_v31  ;;  %v595_v52 = vsub.f32 %v5795_v1, %v587_v25 }
 0x40a   :  { %v5835_v0 = vpop.eup %4996  ;;  %5004 = vpow2.f32 %v892_v21 }
 0x40b   :  { %v608_v27 = vmul.f32 1.442695, %v594_v43  ;;  %v908_v45 = vsel %vm563_vm2, %v5835_v0, 0.0  ;;  %v610_v34 = vmul.f32 1.442695, %v595_v52 }
 0x40c   :  { %909 = vadd.xlane.f32.xlu1 %v908_v45  ;;  %v874_v40 = vpop.xlane.xlu0 %873  ;;  %v877_v5 = vpop.xlane.xlu1 %876 }
 0x40d   :  { %5006 = vpow2.f32 %v608_v27  ;;  %v884_v39 = vsub.f32 %v5789_v56, %v874_v40 }
 0x40e   :  { %v5840_v47 = vpop.eup %4998  ;;  %5008 = vpow2.f32 %v598_v29 }
 0x40f   :  { %v612_v51 = vsel %vm563_vm2, %v5840_v47, 0.0  ;;  %5010 = vpow2.f32 %v888_v42  ;;  %v898_v22 = vmul.f32 1.442695, %v884_v39 }
 0x410   :  { %v578_v3 = vpop.xlane.xlu0 %577  ;;  %613 = vadd.xlane.f32.xlu0 %v612_v51  ;;  %v581_v41 = vpop.xlane.xlu1 %580 }
 0x411   :  { %v592_v60 = vsub.f32 %v5787_v20, %v578_v3  ;;  %v885_v20 = vsub.f32 %v5803_v9, %v877_v5  ;;  %v593_v18 = vsub.f32 %v5809_v13, %v581_v41 }
 0x412   :  { %v5846_v17 = vpop.eup %5000 }
 0x413   :  { %v604_v6 = vmul.f32 1.442695, %v592_v60  ;;  %v902_v62 = vsel %vm563_vm2, %v5846_v17, 0.0  ;;  %v900_v21 = vmul.f32 1.442695, %v885_v20 }
 0x414   :  { %v657_v11 = vpop.permute.xlu0 %656  ;;  %903 = vadd.xlane.f32.xlu1 %v902_v62  ;;  %v871_v25 = vpop.xlane.xlu1 %870  ;;  %v606_v27 = vmul.f32 1.442695, %v593_v18 }
 0x415   :  { %4533 = vmatprep.subr.bf16.mxu0 %v657_v11  ;;  %5012 = vpow2.f32 %v604_v6  ;;  %v883_v45 = vsub.f32 %v5815_v44, %v871_v25 }
 0x416   :  { %4534 = vmatpush3.bf16.msra.mxu0 %v657_v11  ;;  %v5851_v56 = vpop.eup %5002  ;;  %5014 = vpow2.f32 %v898_v22 }
 0x417   :  { %v621_v1 = vsel %vm563_vm2, %v5851_v56, 0.0  ;;  %v5856_v14 = vpop.eup %5004  ;;  %5016 = vpow2.f32 %v610_v34  ;;  %v896_v40 = vmul.f32 1.442695, %v883_v45 }
 0x418   :  { %622 = vadd.xlane.f32.xlu1 %v621_v1  ;;  %v911_v19 = vsel %vm563_vm2, %v5856_v14, 0.0  ;;  %5018 = vpow2.f32 %v900_v21  ;;  %v951_v18 = vpop.permute.xlu1 %950 }
 0x419   :  { %5020 = vpow2.f32 %v606_v27 }
 0x41a   :  { %v5858_v31 = vpop.eup %5006  ;;  %5022 = vpow2.f32 %v896_v40 }
 0x41b   :  { %v630_v43 = vsel %vm563_vm2, %v5858_v31, 0.0  ;;  %v5865_v9 = vpop.eup %5008 }
 0x41c   :  { %912 = vadd.xlane.f32.xlu1 %v911_v19  ;;  %631 = vadd.xlane.f32.xlu0 %v630_v43  ;;  %v615_v29 = vsel %vm563_vm2, %v5865_v9, 0.0  ;;  %v5870_v33 = vpop.eup %5010 }
 0x41d   :  { %v905_v42 = vsel %vm563_vm2, %v5870_v33, 0.0 }
 0x420   :  { %616 = vadd.xlane.f32.xlu1 %v615_v29 }
 0x422   :  { %v5872_v13 = vpop.eup %5012 }
 0x423   :  { %v624_v39 = vsel %vm563_vm2, %v5872_v13, 0.0  ;;  %v5878_v51 = vpop.eup %5014 }
 0x424   :  { %906 = vadd.xlane.f32.xlu1 %v905_v42  ;;  %625 = vadd.xlane.f32.xlu0 %v624_v39  ;;  %v5880_v44 = vpop.eup %5016  ;;  %v920_v3 = vsel %vm563_vm2, %v5878_v51, 0.0 }
 0x425   :  { %v633_v5 = vsel %vm563_vm2, %v5880_v44, 0.0  ;;  %v5886_v60 = vpop.eup %5018 }
 0x426   :  { %v923_v52 = vsel %vm563_vm2, %v5886_v60, 0.0  ;;  %v5890_v6 = vpop.eup %5020 }
 0x427   :  { %v627_v22 = vsel %vm563_vm2, %v5890_v6, 0.0  ;;  %v5894_v62 = vpop.eup %5022 }
 0x428   :  { %921 = vadd.xlane.f32.xlu1 %v920_v3  ;;  %v917_v11 = vsel %vm563_vm2, %v5894_v62, 0.0 }
 0x42c   :  { %634 = vadd.xlane.f32.xlu1 %v633_v5 }
 0x430   :  { %924 = vadd.xlane.f32.xlu1 %v923_v52 }
 0x434   :  { %628 = vadd.xlane.f32.xlu1 %v627_v22 }
 0x438   :  { %918 = vadd.xlane.f32.xlu1 %v917_v11 }
 0x445   :  { %v868_v34 = vpop.xlane.xlu0 %867 }
 0x446   :  { %v882_v41 = vsub.f32 %v5797_v54, %v868_v34 }
 0x448   :  { %v894_v20 = vmul.f32 1.442695, %v882_v41 }
 0x449   :  { %v5899_v1 = vpop.permute.xlu0 %952  ;;  %946 = vrot.lane.b32.xlu1 %v5681_v24, %s5325_s25 }
 0x44a   :  { %5024 = vpow2.f32 %v894_v20  ;;  %4559 = vmatprep.subr.bf16.mxu0 %v5899_v1 }
 0x44d   :  { %1208 = vrot.lane.b32.xlu1 %v5681_v24, %s5326_s26 }
 0x451   :  { %1202 = vrot.lane.b32.xlu1 %v5697_v37, %s5327_s27 }
 0x455   :  { %1206 = vrot.lane.b32.xlu1 %v5689_v38, %s5327_s27 }
 0x457   :  { %v5910_v54 = vpop.eup %5024 }
 0x458   :  { %v914_v21 = vsel %vm563_vm2, %v5910_v54, 0.0 }
 0x459   :  { %915 = vadd.xlane.f32.xlu0 %v914_v21  ;;  %1590 = vrot.lane.b32.xlu1 %v5693_v35, %s5328_s28 }
 0x45d   :  { %1586 = vrot.lane.b32.xlu1 %v5681_v24, %s5328_s28 }
 0x461   :  { %1580 = vrot.lane.b32.xlu1 %v5697_v37, %s5329_s29 }
 0x465   :  { %1584 = vrot.lane.b32.xlu1 %v5689_v38, %s5329_s29 }
 0x46f   :  { %948 = vrot.lane.b32.xlu0 %v5697_v37, %s5325_s25 }
 0x473   :  { %1214 = vrot.lane.b32.xlu0 %v5689_v38, %s5326_s26 }
 0x477   :  { %1212 = vrot.lane.b32.xlu0 %v5693_v35, %s5326_s26 }
 0x47b   :  { %1210 = vrot.lane.b32.xlu0 %v5697_v37, %s5326_s26 }
 0x47f   :  { %1200 = vrot.lane.b32.xlu0 %v5681_v24, %s5327_s27 }
 0x483   :  { %1204 = vrot.lane.b32.xlu0 %v5693_v35, %s5327_s27 }
 0x487   :  { %1592 = vrot.lane.b32.xlu0 %v5689_v38, %s5328_s28 }
 0x48b   :  { %1588 = vrot.lane.b32.xlu0 %v5697_v37, %s5328_s28 }
 0x48c   :  { %v620_v25 = vpop.xlane.xlu0 %619 }
 0x48f   :  { %1578 = vrot.lane.b32.xlu0 %v5681_v24, %s5329_s29 }
 0x493   :  { %1582 = vrot.lane.b32.xlu0 %v5693_v35, %s5329_s29 }
 0x495   :  { %v910_v19 = vpop.xlane.xlu1 %909 }
 0x499   :  { %v614_v45 = vpop.xlane.xlu0 %613 }
 0x49d   :  { %v904_v43 = vpop.xlane.xlu1 %903 }
 0x4a1   :  { %v623_v27 = vpop.xlane.xlu1 %622 }
 0x4a2   :  { %5026 = vrcp.f32 %v623_v27 }
 0x4a3   :  { %5028 = vrcp.f32 %v614_v45 }
 0x4a4   :  { %5030 = vrcp.f32 %v620_v25 }
 0x4a5   :  { %v913_v29 = vpop.xlane.xlu1 %912  ;;  %v632_v52 = vpop.xlane.xlu0 %631 }
 0x4a9   :  { %v617_v40 = vpop.xlane.xlu1 %616 }
 0x4aa   :  { %5032 = vrcp.f32 %v617_v40 }
 0x4ab   :  { %5034 = vrcp.f32 %v904_v43 }
 0x4ad   :  { %v907_v42 = vpop.xlane.xlu1 %906  ;;  %v626_v25 = vpop.xlane.xlu0 %625 }
 0x4ae   :  { %5036 = vrcp.f32 %v907_v42 }
 0x4af   :  { %v5027_v3 = vpop.eup %5026 }
 0x4b0   :  { %v5029_v5 = vpop.eup %5028  ;;  %v647_v41 = vmul.f32 %v5027_v3, %v5851_v56 }
 0x4b1   :  { %v922_v39 = vpop.xlane.xlu1 %921  ;;  %v5031_v11 = vpop.eup %5030  ;;  %v644_v20 = vmul.f32 %v5029_v5, %v5840_v47 }
 0x4b2   :  { %v646_v27 = vmul.f32 %v5031_v11, %v5827_v7 }
 0x4b4   :  { %v653_v59 = vpack.c.bf16 %v647_v41, %v646_v27 }
 0x4b5   :  { %v635_v22 = vpop.xlane.xlu1 %634 }
 0x4b6   :  { %5038 = vrcp.f32 %v635_v22 }
 0x4b7   :  { %v5033_v34 = vpop.eup %5032  ;;  %5040 = vrcp.f32 %v626_v25 }
 0x4b8   :  { %v645_v21 = vmul.f32 %v5033_v34, %v5865_v9  ;;  %5042 = vrcp.f32 %v632_v52  ;;  %v5035_v7 = vpop.eup %5034 }
 0x4b9   :  { %v925_v45 = vpop.xlane.xlu1 %924 }
 0x4ba   :  { %v652_v40 = vpack.c.bf16 %v645_v21, %v644_v20 }
 0x4bb   :  { %v5037_v47 = vpop.eup %5036 }
 0x4bc   :  { %4535 = vmatprep.mubr.msk.bf16.mxu0 %vm563_vm2, %v652_v40  ;;  %v935_v22 = vmul.f32 %v5037_v47, %v5870_v33 }
 0x4bd   :  { %v629_v10 = vpop.xlane.xlu1 %628  ;;  %4536 = vmatmul.mubr.msk.bf16.vlgmr.msra.gmra.mxu0 %vm563_vm2, %v653_v59 }
 0x4be   :  { %5044 = vrcp.f32 %v629_v10  ;;  %4560 = vmatpush3.bf16.msra.mxu0 %v5899_v1  ;;  %v934_v1 = vmul.f32 %v5035_v7, %v5846_v17 }
 0x4bf   :  { %4561 = vmatprep.subr.bf16.mxu0 %v951_v18  ;;  %5046 = vrcp.f32 %v913_v29  ;;  %v458_v29 = vld [vmem:[%s7188_s4 + $0x4] sm:$0xf] }
 0x4c0   :  { %v942_v11 = vpack.c.bf16 %v935_v22, %v934_v1  ;;  %5048 = vrcp.f32 %v910_v19  ;;  %v5965_v20 = vsel %vm1051_vm3, %v458_v29, 0 }
 0x4c1   :  { %5050 = vrcp.f32 %v925_v45 }
 0x4c2   :  { %4562 = vmatpush3.bf16.msra.mxu0 %v951_v18 }
 0x4c3   :  { %v5039_v56 = vpop.eup %5038 }
 0x4c4   :  { %v5041_v9 = vpop.eup %5040  ;;  %v651_v3 = vmul.f32 %v5039_v56, %v5880_v44 }
 0x4c5   :  { %v5043_v43 = vpop.eup %5042  ;;  %v648_v5 = vmul.f32 %v5041_v9, %v5872_v13  ;;  %v919_v13 = vpop.xlane.xlu1 %918  ;;  %v457_v9 = vld [vmem:[%s7188_s4] sm:$0xf] }
 0x4c6   :  { %v650_v10 = vmul.f32 %v5043_v43, %v5858_v31  ;;  %5052 = vrcp.f32 %v919_v13  ;;  %4908 = vmatprep.subr.msk.bf16.mxu1 %vm1051_vm3, %v457_v9 }
 0x4c7   :  { %5054 = vrcp.f32 %v922_v39 }
 0x4c8   :  { %v655_v18 = vpack.c.bf16 %v651_v3, %v650_v10 }
 0x4cb   :  { %v5045_v42 = vpop.eup %5044 }
 0x4cc   :  { %v649_v52 = vmul.f32 %v5045_v42, %v5890_v6  ;;  %v5047_v31 = vpop.eup %5046  ;;  %v947_v6 = vpop.permute.xlu1 %946 }
 0x4cd   :  { %v5049_v17 = vpop.eup %5048  ;;  %v937_v34 = vmul.f32 %v5047_v31, %v5856_v14 }
 0x4ce   :  { %v654_v59 = vpack.c.bf16 %v649_v52, %v648_v5  ;;  %v936_v19 = vmul.f32 %v5049_v17, %v5835_v0  ;;  %v5051_v39 = vpop.eup %5050 }
 0x4cf   :  { %v941_v40 = vmul.f32 %v5051_v39, %v5886_v60 }
 0x4d0   :  { %4539 = vmatprep.mubr.msk.bf16.mxu0 %vm563_vm2, %v654_v59  ;;  %v943_v41 = vpack.c.bf16 %v937_v34, %v936_v19 }
 0x4d1   :  { %4540 = vmatmul.mubr.msk.bf16.gmra.mxu0 %vm563_vm2, %v655_v18 }
 0x4d2   :  { %4567 = vmatprep.mubr.msk.bf16.mxu0 %vm563_vm2, %v942_v11 }
 0x4d3   :  { %v5053_v21 = vpop.eup %5052 }
 0x4d4   :  { %v5055_v27 = vpop.eup %5054  ;;  %v939_v45 = vmul.f32 %v5053_v21, %v5894_v62 }
 0x4d5   :  { %v940_v47 = vmul.f32 %v5055_v27, %v5878_v51 }
 0x4d7   :  { %v945_v56 = vpack.c.bf16 %v941_v40, %v940_v47 }
 0x4e2   :  { %v916_v33 = vpop.xlane.xlu0 %915 }
 0x4e3   :  { %5056 = vrcp.f32 %v916_v33 }
 0x4e6   :  { %v949_v44 = vpop.permute.xlu0 %948 }
 0x4e7   :  { %4563 = vmatprep.subr.bf16.mxu0 %v949_v44 }
 0x4e8   :  { %4564 = vmatpush3.bf16.msra.mxu0 %v949_v44 }
 0x4e9   :  { %4565 = vmatprep.subr.bf16.mxu0 %v947_v6 }
 0x4ea   :  { %v1215_v25 = vpop.permute.xlu0 %1214 }
 0x4ec   :  { %4566 = vmatpush3.bf16.msra.mxu0 %v947_v6 }
 0x4ed   :  { %4907 = vmatprep.subr.msk.bf16.mxu0 %vm1051_vm3, %v458_v29  ;;  %v1238_v29 = vsel %vm473_vm1, %v1215_v25, 0 }
 0x4ee   :  { %v1213_v33 = vpop.permute.xlu0 %1212 }
 0x4ef   :  { %4568 = vmatmul.mubr.msk.bf16.vlgmr.msra.gmra.mxu0 %vm563_vm2, %v943_v41 }
 0x4f0   :  { %v5057_v14 = vpop.eup %5056  ;;  %4576 = vmatpush3.bf16.msra.mxu0 %v5965_v20 }
 0x4f1   :  { %4909 = vmatprep.subr.msk.bf16.mxu0 %vm473_vm1, %v1215_v25  ;;  %v938_v0 = vmul.f32 %v5057_v14, %v5910_v54  ;;  %v5981_v54 = vsel %vm1051_vm3, %v457_v9, 0  ;;  %v1209_v25 = vpop.permute.xlu1 %1208 }
 0x4f2   :  { %4586 = vmatpush3.bf16.msra.mxu1 %v5981_v54  ;;  %v1211_v19 = vpop.permute.xlu0 %1210  ;;  %v1229_v47 = vsel %vm473_vm1, %v1209_v25, 0 }
 0x4f3   :  { %v944_v7 = vpack.c.bf16 %v939_v45, %v938_v0  ;;  %v1235_v0 = vsel %vm473_vm1, %v1213_v33, 0  ;;  %v1232_v45 = vsel %vm473_vm1, %v1211_v19, 0 }
 0x4f5   :  { %4571 = vmatprep.mubr.msk.bf16.mxu0 %vm563_vm2, %v944_v7  ;;  %v1203_v7 = vpop.permute.xlu1 %1202 }
 0x4f6   :  { %v1201_v14 = vpop.permute.xlu0 %1200 }
 0x4f7   :  { %4572 = vmatmul.mubr.msk.bf16.gmra.mxu0 %vm563_vm2, %v945_v56 }
 0x4f9   :  { %v1207_v9 = vpop.permute.xlu1 %1206 }
 0x4fa   :  { %v1205_v40 = vpop.permute.xlu0 %1204 }
 0x4fe   :  { %v1593_v56 = vpop.permute.xlu0 %1592 }
 0x57d   :  { %v4537_v60 = vpop.f32.mrf.mxu0 }
 0x57f   :  { %v714_v62 = vpop.f32.mrf.mxu0 }
 0x581   :  { %v4538_v43 = vpop.f32.mrf.mxu0 }
 0x582   :  { %v746_v3 = vpack.c.bf16 %v4538_v43, %v4537_v60  ;;  %v1616_v60 = vsel %vm473_vm1, %v1593_v56, 0  ;;  %v1589_v43 = vpop.permute.xlu0 %1588 }
 0x583   :  { %v717_v51 = vpop.f32.mrf.mxu0 }
 0x584   :  { %v745_v42 = vpack.c.bf16 %v717_v51, %v714_v62  ;;  %v1591_v62 = vpop.permute.xlu1 %1590 }
 0x586   :  { %4587 = vmatprep.mubr.msk.bf16.mxu1 %vm473_vm1, %v745_v42  ;;  %v1579_v51 = vpop.permute.xlu0 %1578  ;;  %v1613_v42 = vsel %vm473_vm1, %v1591_v62, 0 }
 0x587   :  { %4588 = vmatmul.mubr.msk.bf16.vlgmr.msra.gmra.mxu1 %vm473_vm1, %v746_v3  ;;  %v1610_v3 = vsel %vm473_vm1, %v1589_v43, 0 }
 0x591   :  { %v4541_v5 = vpop.f32.mrf.mxu0 }
 0x593   :  { %v730_v52 = vpop.f32.mrf.mxu0 }
 0x595   :  { %v4542_v22 = vpop.f32.mrf.mxu0 }
 0x596   :  { %v748_v1 = vpack.c.bf16 %v4542_v22, %v4541_v5  ;;  %v1587_v5 = vpop.permute.xlu1 %1586 }
 0x597   :  { %v733_v10 = vpop.f32.mrf.mxu0 }
 0x598   :  { %v747_v59 = vpack.c.bf16 %v733_v10, %v730_v52  ;;  %v1607_v52 = vsel %vm473_vm1, %v1587_v5, 0  ;;  %v1583_v10 = vpop.permute.xlu0 %1582 }
 0x59a   :  { %4591 = vmatprep.mubr.msk.bf16.mxu1 %vm473_vm1, %v747_v59  ;;  %v1581_v22 = vpop.permute.xlu1 %1580  ;;  %v419_v59 = vadd.f32 %v5677_v61, %v5743_v12 }
 0x59b   :  { %4592 = vmatmul.mubr.msk.bf16.gmra.mxu1 %vm473_vm1, %v748_v1  ;;  %v422_v1 = vadd.f32 %v5677_v61, %v5758_v46 }
 0x5af   :  { %v4569_v18 = vpop.f32.mrf.mxu0 }
 0x5b1   :  { %v1004_v11 = vpop.f32.mrf.mxu0 }
 0x5b3   :  { %v4570_v13 = vpop.f32.mrf.mxu0 }
 0x5b4   :  { %v1036_v17 = vpack.c.bf16 %v4570_v13, %v4569_v18  ;;  %v6018_v18 = vpack.c.bf16 %v422_v1, %v419_v59 }
 0x5b5   :  { %v1007_v31 = vpop.f32.mrf.mxu0 }
 0x5b6   :  { %v1035_v44 = vpack.c.bf16 %v1007_v31, %v1004_v11  ;;  %v1585_v11 = vpop.permute.xlu1 %1584 }
 0x5b7   :  { %v4573_v6 = vpop.f32.mrf.mxu0 }
 0x5b8   :  { %4577 = vmatprep.mubr.msk.bf16.mxu0 %vm473_vm1, %v1035_v44 }
 0x5b9   :  { %v1020_v34 = vpop.f32.mrf.mxu0  ;;  %4578 = vmatmul.mubr.msk.bf16.vlgmr.msra.gmra.mxu0 %vm473_vm1, %v1036_v17 }
 0x5ba   :  { %4596 = vmatpush3.bf16.xpose.msra.mxu0 %v1238_v29 }
 0x5bb   :  { %4910 = vmatprep.subr.msk.bf16.mxu0 %vm473_vm1, %v1213_v33  ;;  %v4574_v39 = vpop.f32.mrf.mxu0 }
 0x5bc   :  { %v1038_v27 = vpack.c.bf16 %v4574_v39, %v4573_v6 }
 0x5bd   :  { %v1023_v41 = vpop.f32.mrf.mxu0 }
 0x5be   :  { %v1037_v21 = vpack.c.bf16 %v1023_v41, %v1020_v34 }
 0x5c0   :  { %4581 = vmatprep.mubr.msk.bf16.mxu0 %vm473_vm1, %v1037_v21 }
 0x5c1   :  { %4582 = vmatmul.mubr.msk.bf16.gmra.mxu0 %vm473_vm1, %v1038_v27 }
 0x5c2   :  { %4598 = vmatpush3.bf16.xpose.msra.mxu0 %v1235_v0  ;;  %4603 = vmatprep.mubr.msk.bf16.mxu0 %vm473_vm1, %v1201_v14 }
 0x5c3   :  { %4911 = vmatprep.subr.msk.bf16.mxu0 %vm473_vm1, %v1211_v19 }
 0x5ca   :  { %4600 = vmatpush3.bf16.xpose.msra.mxu0 %v1232_v45 }
 0x5cb   :  { %4912 = vmatprep.subr.msk.bf16.mxu0 %vm473_vm1, %v1209_v25 }
 0x5d2   :  { %4602 = vmatpush3.bf16.xpose.msra.mxu0 %v1229_v47 }
 0x5d3   :  { %4914 = vmatprep.subr.msk.bf16.mxu0 %vm473_vm1, %v1593_v56 }
 0x5d9   :  { %4604 = vmatmul.mubr.msk.bf16.vlgmr.msra.gmra.mxu0 %vm473_vm1, %v1203_v7 }
 0x5da   :  { %4607 = vmatprep.mubr.msk.bf16.mxu0 %vm473_vm1, %v1205_v40  ;;  %4638 = vmatpush3.bf16.xpose.msra.mxu0 %v1616_v60 }
 0x5db   :  { %4915 = vmatprep.subr.msk.bf16.mxu0 %vm473_vm1, %v1591_v62 }
 0x5e1   :  { %4608 = vmatmul.mubr.msk.bf16.gmra.mxu0 %vm473_vm1, %v1207_v9 }
 0x5e2   :  { %4640 = vmatpush3.bf16.xpose.msra.mxu0 %v1613_v42  ;;  %4645 = vmatprep.mubr.msk.bf16.mxu0 %vm473_vm1, %v1579_v51 }
 0x5e3   :  { %4916 = vmatprep.subr.msk.bf16.mxu0 %vm473_vm1, %v1589_v43 }
 0x5ea   :  { %4642 = vmatpush3.bf16.xpose.msra.mxu0 %v1610_v3 }
 0x5eb   :  { %4917 = vmatprep.subr.msk.bf16.mxu0 %vm473_vm1, %v1587_v5 }
 0x5f2   :  { %4644 = vmatpush3.bf16.xpose.msra.mxu0 %v1607_v52 }
 0x5f9   :  { %4646 = vmatmul.mubr.msk.bf16.vlgmr.msra.gmra.mxu0 %vm473_vm1, %v1581_v22 }
 0x5fa   :  { %4649 = vmatprep.mubr.msk.bf16.mxu0 %vm473_vm1, %v1583_v10 }
 0x601   :  { %4650 = vmatmul.mubr.msk.bf16.gmra.mxu0 %vm473_vm1, %v1585_v11 }
 0x602   :  { %4687 = vmatprep.mubr.msk.bf16.mxu0 %vm473_vm1, %v6018_v18 }
 0x647   :  { %v4589_v13 = vpop.f32.mrf.mxu1 }
 0x649   :  { %v1169_v33 = vpop.f32.mrf.mxu1 }
 0x64b   :  { %v4590_v31 = vpop.f32.mrf.mxu1 }
 0x64d   :  { %v1172_v6 = vpop.f32.mrf.mxu1 }
 0x65b   :  { %v4593_v29 = vpop.f32.mrf.mxu1 }
 0x65d   :  { %v1185_v41 = vpop.f32.mrf.mxu1 }
 0x65f   :  { %v4594_v25 = vpop.f32.mrf.mxu1 }
 0x679   :  { %v4579_v44 = vpop.f32.mrf.mxu0 }
 0x67a   :  { %v6023_v17 = vadd.f32 %v4589_v13, %v4579_v44 }
 0x67b   :  { %v1089_v34 = vpop.f32.mrf.mxu0 }
 0x67c   :  { %v6025_v12 = vadd.f32 %v1169_v33, %v1089_v34 }
 0x67d   :  { %v4580_v61 = vpop.f32.mrf.mxu0 }
 0x67e   :  { %v6027_v46 = vadd.f32 %v4590_v31, %v4580_v61 }
 0x67f   :  { %v1092_v19 = vpop.f32.mrf.mxu0 }
 0x680   :  { %v6029_v39 = vadd.f32 %v1172_v6, %v1092_v19 }
 0x681   :  { %v4583_v21 = vpop.f32.mrf.mxu0 }
 0x682   :  { %v6031_v27 = vadd.f32 %v4593_v29, %v4583_v21 }
 0x683   :  { %v1105_v14 = vpop.f32.mrf.mxu0 }
 0x684   :  { %v6033_v0 = vadd.f32 %v1185_v41, %v1105_v14 }
 0x685   :  { %v4584_v45 = vpop.f32.mrf.mxu0 }
 0x686   :  { %v6035_v40 = vadd.f32 %v4594_v25, %v4584_v45 }
 0x687   :  { %v6037_v7 = vpop.f32.mrf.mxu0 }
 0x699   :  { %v4605_v47 = vpop.f32.mrf.mxu0 }
 0x69a   :  { %v1311_v43 = vsel %vm563_vm2, %v4605_v47, -inf }
 0x69b   :  { %v1274_v56 = vpop.f32.mrf.mxu0 }
 0x69c   :  { %v1305_v9 = vsel %vm563_vm2, %v1274_v56, -inf }
 0x69d   :  { %1306 = vmax.xlane.f32.xlu0 %v1305_v9  ;;  %v4606_v60 = vpop.f32.mrf.mxu0 }
 0x69e   :  { %v1314_v5 = vsel %vm563_vm2, %v4606_v60, -inf }
 0x69f   :  { %v1277_v62 = vpop.f32.mrf.mxu0 }
 0x6a0   :  { %v1308_v51 = vsel %vm563_vm2, %v1277_v62, -inf }
 0x6a1   :  { %1312 = vmax.xlane.f32.xlu0 %v1311_v43  ;;  %1309 = vmax.xlane.f32.xlu1 %v1308_v51  ;;  %v4609_v42 = vpop.f32.mrf.mxu0 }
 0x6a2   :  { %v1323_v1 = vsel %vm563_vm2, %v4609_v42, -inf }
 0x6a3   :  { %v1290_v3 = vpop.f32.mrf.mxu0 }
 0x6a4   :  { %v1317_v10 = vsel %vm563_vm2, %v1290_v3, -inf }
 0x6a5   :  { %1315 = vmax.xlane.f32.xlu0 %v1314_v5  ;;  %v4610_v52 = vpop.f32.mrf.mxu0 }
 0x6a6   :  { %v1326_v11 = vsel %vm563_vm2, %v4610_v52, -inf }
 0x6a7   :  { %v1293_v22 = vpop.f32.mrf.mxu0 }
 0x6a8   :  { %v1320_v59 = vsel %vm563_vm2, %v1293_v22, -inf }
 0x6a9   :  { %1318 = vmax.xlane.f32.xlu0 %v1317_v10  ;;  %1321 = vmax.xlane.f32.xlu1 %v1320_v59 }
 0x6ad   :  { %1324 = vmax.xlane.f32.xlu0 %v1323_v1  ;;  %1327 = vmax.xlane.f32.xlu1 %v1326_v11 }
 0x726   :  { %v1307_v13 = vpop.xlane.xlu0 %1306 }
 0x727   :  { %v1329_v33 = vsub.f32 %v1274_v56, %v1307_v13 }
 0x729   :  { %v1337_v61 = vmul.f32 1.442695, %v1329_v33 }
 0x72a   :  { %v1310_v31 = vpop.xlane.xlu1 %1309  ;;  %v1313_v44 = vpop.xlane.xlu0 %1312 }
 0x72b   :  { %v1331_v6 = vsub.f32 %v4605_v47, %v1313_v44  ;;  %v1330_v34 = vsub.f32 %v1277_v62, %v1310_v31 }
 0x72d   :  { %v1341_v29 = vmul.f32 1.442695, %v1331_v6  ;;  %v1339_v21 = vmul.f32 1.442695, %v1330_v34 }
 0x72e   :  { %v1316_v19 = vpop.xlane.xlu0 %1315 }
 0x72f   :  { %v1332_v41 = vsub.f32 %v4606_v60, %v1316_v19  ;;  %5058 = vpow2.f32 %v1341_v29 }
 0x730   :  { %5060 = vpow2.f32 %v1337_v61 }
 0x731   :  { %v1343_v14 = vmul.f32 1.442695, %v1332_v41 }
 0x732   :  { %v1319_v25 = vpop.xlane.xlu0 %1318  ;;  %v1322_v31 = vpop.xlane.xlu1 %1321 }
 0x733   :  { %5062 = vpow2.f32 %v1343_v14  ;;  %v1333_v45 = vsub.f32 %v1290_v3, %v1319_v25  ;;  %v1334_v34 = vsub.f32 %v1293_v22, %v1322_v31 }
 0x734   :  { %5064 = vpow2.f32 %v1339_v21 }
 0x735   :  { %v1345_v56 = vmul.f32 1.442695, %v1333_v45  ;;  %v1347_v61 = vmul.f32 1.442695, %v1334_v34 }
 0x736   :  { %v1325_v9 = vpop.xlane.xlu0 %1324  ;;  %v1328_v44 = vpop.xlane.xlu1 %1327 }
 0x737   :  { %v1335_v43 = vsub.f32 %v4609_v42, %v1325_v9  ;;  %v1336_v6 = vsub.f32 %v4610_v52, %v1328_v44  ;;  %v6087_v52 = vpop.f32.mrf.mxu0 }
 0x739   :  { %v1349_v51 = vmul.f32 1.442695, %v1335_v43  ;;  %v1351_v29 = vmul.f32 1.442695, %v1336_v6  ;;  %v6091_v14 = vpop.f32.mrf.mxu0  ;;  %v1689_v43 = vsel %vm563_vm2, %v6087_v52, -inf }
 0x73a   :  { %v1683_v45 = vsel %vm563_vm2, %v6091_v14, -inf }
 0x73b   :  { %5066 = vpow2.f32 %v1349_v51  ;;  %v6093_v25 = vpop.f32.mrf.mxu0 }
 0x73c   :  { %v6047_v5 = vpop.eup %5058  ;;  %5068 = vpow2.f32 %v1345_v56  ;;  %v5314_v56 = vld [vmem:[%s7187_s3] ss:$0 sm:$0xff] }
 0x73d   :  { %v1359_v47 = vsel %vm563_vm2, %v6047_v5, 0.0  ;;  %v6051_v60 = vpop.eup %5060  ;;  %5070 = vpow2.f32 %v1351_v29  ;;  %v6097_v9 = vpop.f32.mrf.mxu0 }
 0x73e   :  { %1360 = vadd.xlane.f32.xlu0 %v1359_v47  ;;  %v1353_v42 = vsel %vm563_vm2, %v6051_v60, 0.0  ;;  %5072 = vpow2.f32 %v1347_v61  ;;  %v435_v47 = vadd.f32 %v5314_v56, %v5760_v23  ;;  %v1686_v31 = vsel %vm563_vm2, %v6097_v9, -inf }
 0x73f   :  { %v6101_v51 = vpop.f32.mrf.mxu0 }
 0x740   :  { %v6053_v62 = vpop.eup %5062  ;;  %v1701_v23 = vsel %vm563_vm2, %v6101_v51, -inf }
 0x741   :  { %v1362_v10 = vsel %vm563_vm2, %v6053_v62, 0.0  ;;  %v6057_v3 = vpop.eup %5064 }
 0x742   :  { %1363 = vadd.xlane.f32.xlu1 %v1362_v10  ;;  %1354 = vadd.xlane.f32.xlu0 %v1353_v42  ;;  %v1356_v59 = vsel %vm563_vm2, %v6057_v3, 0.0  ;;  %v438_v10 = vadd.f32 %v5314_v56, %v5768_v32  ;;  %v1692_v42 = vsel %vm563_vm2, %v6093_v25, -inf }
 0x746   :  { %1357 = vadd.xlane.f32.xlu1 %v1356_v59  ;;  %v6110_v59 = vpop.f32.mrf.mxu0 }
 0x748   :  { %v6063_v1 = vpop.eup %5066  ;;  %v6124_v32 = vpop.f32.mrf.mxu0 }
 0x749   :  { %v1371_v11 = vsel %vm563_vm2, %v6063_v1, 0.0  ;;  %v6067_v13 = vpop.eup %5068  ;;  %v1704_v34 = vsel %vm563_vm2, %v6124_v32, -inf }
 0x74a   :  { %1372 = vadd.xlane.f32.xlu0 %v1371_v11  ;;  %v1365_v33 = vsel %vm563_vm2, %v6067_v13, 0.0  ;;  %v6081_v19 = vpop.eup %5070  ;;  %v6114_v11 = vpack.c.bf16 %v438_v10, %v435_v47  ;;  %v6128_v44 = vpop.f32.mrf.mxu0 }
 0x74b   :  { %v1374_v41 = vsel %vm563_vm2, %v6081_v19, 0.0  ;;  %v6085_v21 = vpop.eup %5072  ;;  %v1698_v6 = vsel %vm563_vm2, %v6128_v44, -inf }
 0x74c   :  { %v1368_v22 = vsel %vm563_vm2, %v6085_v21, 0.0 }
 0x74e   :  { %1366 = vadd.xlane.f32.xlu0 %v1365_v33  ;;  %v1695_v33 = vsel %vm563_vm2, %v6110_v59, -inf }
 0x757   :  { %1401 = vrot.lane.b32.xlu1 %v5693_v35, %s5330_s12 }
 0x75b   :  { %1399 = vrot.lane.b32.xlu1 %v5697_v37, %s5330_s12 }
 0x764   :  { %1403 = vrot.lane.b32.xlu0 %v5689_v38, %s5330_s12 }
 0x768   :  { %1966 = vrot.lane.b32.xlu0 %v5765_v30, %s5321_s21 }
 0x76c   :  { %1962 = vrot.lane.b32.xlu0 %v5752_v15, %s5321_s21 }
 0x77f   :  { %1375 = vadd.xlane.f32.xlu1 %v1374_v41 }
 0x783   :  { %1369 = vadd.xlane.f32.xlu1 %v1368_v22 }
 0x78b   :  { %1684 = vmax.xlane.f32.xlu0 %v1683_v45 }
 0x78f   :  { %1690 = vmax.xlane.f32.xlu0 %v1689_v43 }
 0x793   :  { %1693 = vmax.xlane.f32.xlu0 %v1692_v42 }
 0x794   :  { %1397 = vrot.lane.b32.xlu1 %v5681_v24, %s5330_s12 }
 0x797   :  { %1696 = vmax.xlane.f32.xlu0 %v1695_v33 }
 0x798   :  { %1964 = vrot.lane.b32.xlu1 %v6114_v11, %s5321_s21 }
 0x79b   :  { %1702 = vmax.xlane.f32.xlu0 %v1701_v23 }
 0x79c   :  { %1960 = vrot.lane.b32.xlu1 %v6018_v18, %s5321_s21 }
 0x7c0   :  { %1687 = vmax.xlane.f32.xlu1 %v1686_v31 }
 0x7c4   :  { %1699 = vmax.xlane.f32.xlu1 %v1698_v6 }
 0x7c7   :  { %v1361_v29 = vpop.xlane.xlu0 %1360 }
 0x7c8   :  { %1705 = vmax.xlane.f32.xlu1 %v1704_v34 }
 0x7cb   :  { %v1364_v61 = vpop.xlane.xlu1 %1363  ;;  %v1355_v41 = vpop.xlane.xlu0 %1354 }
 0x7cc   :  { %5074 = vrcp.f32 %v1355_v41 }
 0x7cf   :  { %v1358_v22 = vpop.xlane.xlu1 %1357 }
 0x7d0   :  { %5076 = vrcp.f32 %v1358_v22 }
 0x7d1   :  { %5078 = vrcp.f32 %v1364_v61 }
 0x7d2   :  { %5080 = vrcp.f32 %v1361_v29 }
 0x7d3   :  { %v1373_v45 = vpop.xlane.xlu0 %1372  ;;  %v1402_v47 = vpop.permute.xlu1 %1401 }
 0x7d7   :  { %v1367_v43 = vpop.xlane.xlu0 %1366  ;;  %v1400_v41 = vpop.permute.xlu1 %1399 }
 0x7d9   :  { %v5075_v56 = vpop.eup %5074 }
 0x7da   :  { %v1385_v33 = vmul.f32 %v5075_v56, %v6051_v60 }
 0x7db   :  { %v1404_v10 = vpop.permute.xlu0 %1403 }
 0x7dc   :  { %4611 = vmatprep.subr.bf16.mxu1 %v1404_v10 }
 0x7dd   :  { %v5077_v42 = vpop.eup %5076  ;;  %4612 = vmatpush3.bf16.msra.mxu1 %v1404_v10 }
 0x7de   :  { %v1386_v23 = vmul.f32 %v5077_v42, %v6057_v3  ;;  %4613 = vmatprep.subr.bf16.mxu1 %v1402_v47  ;;  %v5079_v60 = vpop.eup %5078 }
 0x7df   :  { %v1967_v31 = vpop.permute.xlu0 %1966  ;;  %v5081_v56 = vpop.eup %5080  ;;  %v1388_v10 = vmul.f32 %v5079_v60, %v6053_v62 }
 0x7e0   :  { %v1393_v6 = vpack.c.bf16 %v1386_v23, %v1385_v33  ;;  %4919 = vmatprep.subr.msk.bf16.mxu0 %vm473_vm1, %v1967_v31  ;;  %v1990_v34 = vsel %vm473_vm1, %v1967_v31, 0 }
 0x7e1   :  { %4614 = vmatpush3.bf16.msra.mxu1 %v1402_v47  ;;  %4680 = vmatpush3.bf16.xpose.msra.mxu0 %v1990_v34  ;;  %v1387_v47 = vmul.f32 %v5081_v56, %v6047_v5 }
 0x7e2   :  { %4615 = vmatprep.subr.bf16.mxu1 %v1400_v41  ;;  %4619 = vmatprep.mubr.msk.bf16.mxu1 %vm563_vm2, %v1393_v6 }
 0x7e3   :  { %v1963_v33 = vpop.permute.xlu0 %1962  ;;  %v1394_v23 = vpack.c.bf16 %v1388_v10, %v1387_v47 }
 0x7e5   :  { %4616 = vmatpush3.bf16.msra.mxu1 %v1400_v41 }
 0x808   :  { %v1376_v22 = vpop.xlane.xlu1 %1375 }
 0x809   :  { %5082 = vrcp.f32 %v1376_v22 }
 0x80a   :  { %5084 = vrcp.f32 %v1367_v43 }
 0x80b   :  { %5086 = vrcp.f32 %v1373_v45 }
 0x80c   :  { %v1370_v3 = vpop.xlane.xlu1 %1369 }
 0x80d   :  { %5088 = vrcp.f32 %v1370_v3 }
 0x810   :  { %v1398_v42 = vpop.permute.xlu1 %1397 }
 0x811   :  { %4617 = vmatprep.subr.bf16.mxu1 %v1398_v42 }
 0x812   :  { %4618 = vmatpush3.bf16.msra.mxu1 %v1398_v42 }
 0x814   :  { %v1965_v31 = vpop.permute.xlu1 %1964  ;;  %v1685_v61 = vpop.xlane.xlu0 %1684 }
 0x815   :  { %4620 = vmatmul.mubr.msk.bf16.vlgmr.msra.gmra.mxu1 %vm563_vm2, %v1394_v23  ;;  %4920 = vmatprep.subr.msk.bf16.mxu0 %vm473_vm1, %v1965_v31  ;;  %v1987_v29 = vsel %vm473_vm1, %v1965_v31, 0  ;;  %v1707_v43 = vsub.f32 %v6091_v14, %v1685_v61  ;;  %v1984_v23 = vsel %vm473_vm1, %v1963_v33, 0 }
 0x816   :  { %4682 = vmatpush3.bf16.xpose.msra.mxu0 %v1987_v29  ;;  %v5083_v45 = vpop.eup %5082 }
 0x817   :  { %4921 = vmatprep.subr.msk.bf16.mxu0 %vm473_vm1, %v1963_v33  ;;  %v5085_v62 = vpop.eup %5084  ;;  %v1392_v22 = vmul.f32 %v5083_v45, %v6081_v19  ;;  %v1715_v56 = vmul.f32 1.442695, %v1707_v43 }
 0x818   :  { %v5087_v5 = vpop.eup %5086  ;;  %v1691_v6 = vpop.xlane.xlu0 %1690  ;;  %v1389_v60 = vmul.f32 %v5085_v62, %v6067_v13 }
 0x819   :  { %v1709_v41 = vsub.f32 %v6087_v52, %v1691_v6  ;;  %v1391_v42 = vmul.f32 %v5087_v5, %v6063_v1  ;;  %v1961_v14 = vpop.permute.xlu1 %1960 }
 0x81a   :  { %v5089_v34 = vpop.eup %5088  ;;  %v1981_v33 = vsel %vm473_vm1, %v1961_v14, 0 }
 0x81b   :  { %v1390_v3 = vmul.f32 %v5089_v34, %v6085_v21  ;;  %v1719_v10 = vmul.f32 1.442695, %v1709_v41  ;;  %v1396_v52 = vpack.c.bf16 %v1392_v22, %v1391_v42 }
 0x81c   :  { %v1694_v47 = vpop.xlane.xlu0 %1693 }
 0x81d   :  { %v1395_v31 = vpack.c.bf16 %v1390_v3, %v1389_v60  ;;  %5090 = vpow2.f32 %v1719_v10  ;;  %v1710_v61 = vsub.f32 %v6093_v25, %v1694_v47 }
 0x81e   :  { %4684 = vmatpush3.bf16.xpose.msra.mxu0 %v1984_v23  ;;  %5092 = vpow2.f32 %v1715_v56  ;;  %v459_v56 = vld [vmem:[%s7188_s4 + $0x8] sm:$0xf] }
 0x81f   :  { %4623 = vmatprep.mubr.msk.bf16.mxu1 %vm563_vm2, %v1395_v31  ;;  %4922 = vmatprep.subr.msk.bf16.mxu0 %vm473_vm1, %v1961_v14  ;;  %v1721_v13 = vmul.f32 1.442695, %v1710_v61  ;;  %v6191_v42 = vsel %vm1051_vm3, %v459_v56, 0 }
 0x820   :  { %4624 = vmatmul.mubr.msk.bf16.gmra.mxu1 %vm563_vm2, %v1396_v52  ;;  %v1697_v19 = vpop.xlane.xlu0 %1696  ;;  %4913 = vmatprep.subr.msk.bf16.mxu1 %vm1051_vm3, %v459_v56 }
 0x821   :  { %5094 = vpow2.f32 %v1721_v13  ;;  %v1711_v1 = vsub.f32 %v6110_v59, %v1697_v19  ;;  %4628 = vmatpush3.bf16.msra.mxu1 %v6191_v42 }
 0x823   :  { %v1723_v25 = vmul.f32 1.442695, %v1711_v1 }
 0x824   :  { %v1703_v21 = vpop.xlane.xlu0 %1702 }
 0x825   :  { %v1713_v29 = vsub.f32 %v6101_v51, %v1703_v21 }
 0x826   :  { %4686 = vmatpush3.bf16.xpose.msra.mxu0 %v1981_v33 }
 0x827   :  { %v1727_v45 = vmul.f32 1.442695, %v1713_v29 }
 0x829   :  { %5096 = vpow2.f32 %v1727_v45 }
 0x82a   :  { %v6159_v62 = vpop.eup %5090  ;;  %5098 = vpow2.f32 %v1723_v25  ;;  %v6222_v25 = vpop.f32.mrf.mxu1 }
 0x82b   :  { %v1737_v43 = vsel %vm563_vm2, %v6159_v62, 0.0  ;;  %v6163_v5 = vpop.eup %5092 }
 0x82c   :  { %1738 = vadd.xlane.f32.xlu0 %v1737_v43  ;;  %v1731_v59 = vsel %vm563_vm2, %v6163_v5, 0.0 }
 0x82d   :  { %4688 = vmatmul.mubr.msk.bf16.vlgmr.msra.gmra.mxu0 %vm473_vm1, %v5752_v15 }
 0x82e   :  { %4691 = vmatprep.mubr.msk.bf16.mxu0 %vm473_vm1, %v6114_v11  ;;  %v6169_v51 = vpop.eup %5094 }
 0x82f   :  { %v1740_v6 = vsel %vm563_vm2, %v6169_v51, 0.0 }
 0x830   :  { %1732 = vadd.xlane.f32.xlu0 %v1731_v59  ;;  %1741 = vadd.xlane.f32.xlu1 %v1740_v6 }
 0x835   :  { %4692 = vmatmul.mubr.msk.bf16.gmra.mxu0 %vm473_vm1, %v5765_v30 }
 0x836   :  { %v6177_v34 = vpop.eup %5096 }
 0x837   :  { %v1749_v41 = vsel %vm563_vm2, %v6177_v34, 0.0  ;;  %v6181_v22 = vpop.eup %5098 }
 0x838   :  { %1750 = vadd.xlane.f32.xlu0 %v1749_v41  ;;  %v1743_v60 = vsel %vm563_vm2, %v6181_v22, 0.0 }
 0x83c   :  { %1744 = vadd.xlane.f32.xlu0 %v1743_v60 }
 0x849   :  { %v1688_v3 = vpop.xlane.xlu1 %1687 }
 0x84a   :  { %v1708_v10 = vsub.f32 %v6097_v9, %v1688_v3 }
 0x84c   :  { %v1717_v47 = vmul.f32 1.442695, %v1708_v10 }
 0x84d   :  { %v1700_v9 = vpop.xlane.xlu1 %1699 }
 0x84e   :  { %5100 = vpow2.f32 %v1717_v47  ;;  %v1712_v52 = vsub.f32 %v6128_v44, %v1700_v9 }
 0x851   :  { %v1706_v14 = vpop.xlane.xlu1 %1705 }
 0x852   :  { %1781 = vrot.lane.b32.xlu0 %v5689_v38, %s5331_s16  ;;  %v1714_v61 = vsub.f32 %v6124_v32, %v1706_v14  ;;  %v1725_v38 = vmul.f32 1.442695, %v1712_v52 }
 0x854   :  { %v1729_v13 = vmul.f32 1.442695, %v1714_v61 }
 0x856   :  { %5102 = vpow2.f32 %v1729_v13 }
 0x857   :  { %5104 = vpow2.f32 %v1725_v38 }
 0x85b   :  { %v6196_v23 = vpop.eup %5100 }
 0x85c   :  { %v1734_v31 = vsel %vm563_vm2, %v6196_v23, 0.0 }
 0x85d   :  { %1735 = vadd.xlane.f32.xlu1 %v1734_v31 }
 0x863   :  { %v6206_v19 = vpop.eup %5102 }
 0x864   :  { %v1752_v1 = vsel %vm563_vm2, %v6206_v19, 0.0  ;;  %v6210_v21 = vpop.eup %5104 }
 0x86e   :  { %1779 = vrot.lane.b32.xlu1 %v5693_v35, %s5331_s16  ;;  %v1746_v35 = vsel %vm563_vm2, %v6210_v21, 0.0 }
 0x872   :  { %1777 = vrot.lane.b32.xlu1 %v5697_v37, %s5331_s16 }
 0x896   :  { %1753 = vadd.xlane.f32.xlu1 %v1752_v1 }
 0x89a   :  { %1747 = vadd.xlane.f32.xlu1 %v1746_v35 }
 0x8ab   :  { %1775 = vrot.lane.b32.xlu1 %v5681_v24, %s5331_s16 }
 0x8b5   :  { %v6216_v37 = vpop.xlane.xlu0 %1738 }
 0x8b9   :  { %v1733_v32 = vpop.xlane.xlu0 %1732  ;;  %v1742_v3 = vpop.xlane.xlu1 %1741 }
 0x8ba   :  { %5106 = vrcp.f32 %v1733_v32 }
 0x8c1   :  { %v6218_v44 = vpop.xlane.xlu0 %1750 }
 0x8c5   :  { %v6220_v33 = vpop.xlane.xlu0 %1744 }
 0x8c7   :  { %v5107_v32 = vpop.eup %5106 }
 0x8c9   :  { %v1782_v29 = vpop.permute.xlu0 %1781 }
 0x8ca   :  { %4653 = vmatprep.subr.bf16.mxu1 %v1782_v29 }
 0x8d5   :  { %v4621_v45 = vpop.f32.mrf.mxu1 }
 0x8d7   :  { %v1455_v43 = vpop.f32.mrf.mxu1 }
 0x8d9   :  { %v4622_v59 = vpop.f32.mrf.mxu1 }
 0x8da   :  { %v1487_v60 = vpack.c.bf16 %v4622_v59, %v4621_v45 }
 0x8db   :  { %v1458_v6 = vpop.f32.mrf.mxu1 }
 0x8dc   :  { %v1486_v41 = vpack.c.bf16 %v1458_v6, %v1455_v43 }
 0x8de   :  { %4629 = vmatprep.mubr.msk.bf16.mxu1 %vm473_vm1, %v1486_v41  ;;  %v1763_v41 = vmul.f32 %v5107_v32, %v6163_v5 }
 0x8df   :  { %4630 = vmatmul.mubr.msk.bf16.vlgmr.msra.gmra.mxu1 %vm473_vm1, %v1487_v60 }
 0x8e0   :  { %4654 = vmatpush3.bf16.msra.mxu1 %v1782_v29  ;;  %v4625_v24 = vpop.f32.mrf.mxu1 }
 0x8e2   :  { %v1471_v56 = vpop.f32.mrf.mxu1 }
 0x8e4   :  { %v4626_v10 = vpop.f32.mrf.mxu1 }
 0x8e5   :  { %v1489_v14 = vpack.c.bf16 %v4626_v10, %v4625_v24 }
 0x8e6   :  { %v1474_v47 = vpop.f32.mrf.mxu1  ;;  %v1736_v31 = vpop.xlane.xlu1 %1735 }
 0x8e7   :  { %v1488_v9 = vpack.c.bf16 %v1474_v47, %v1471_v56  ;;  %5108 = vrcp.f32 %v1736_v31 }
 0x8e8   :  { %5110 = vrcp.f32 %v1742_v3 }
 0x8e9   :  { %4633 = vmatprep.mubr.msk.bf16.mxu1 %vm473_vm1, %v1488_v9  ;;  %5112 = vrcp.f32 %v6216_v37  ;;  %v460_v37 = vld [vmem:[%s7188_s4 + $0xc] sm:$0xf] }
 0x8ea   :  { %4634 = vmatmul.mubr.msk.bf16.gmra.mxu1 %vm473_vm1, %v1489_v14  ;;  %v1780_v61 = vpop.permute.xlu1 %1779 }
 0x8eb   :  { %4655 = vmatprep.subr.bf16.mxu1 %v1780_v61 }
 0x8ec   :  { %4656 = vmatpush3.bf16.msra.mxu1 %v1780_v61 }
 0x8ed   :  { %v6228_v52 = vpop.f32.mrf.mxu0 }
 0x8ee   :  { %v1778_v13 = vpop.permute.xlu1 %1777  ;;  %v2063_v59 = vsel %vm563_vm2, %v6228_v52, -inf }
 0x8ef   :  { %4657 = vmatprep.subr.bf16.mxu1 %v1778_v13  ;;  %v6230_v38 = vpop.f32.mrf.mxu0 }
 0x8f0   :  { %4658 = vmatpush3.bf16.msra.mxu1 %v1778_v13  ;;  %v2057_v1 = vsel %vm563_vm2, %v6230_v38, -inf }
 0x8f1   :  { %v6234_v35 = vpop.f32.mrf.mxu0  ;;  %2058 = vmax.xlane.f32.xlu0 %v2057_v1 }
 0x8f2   :  { %v2066_v10 = vsel %vm563_vm2, %v6234_v35, -inf }
 0x8f3   :  { %v6236_v29 = vpop.f32.mrf.mxu0 }
 0x8f4   :  { %v5109_v45 = vpop.eup %5108  ;;  %v2060_v43 = vsel %vm563_vm2, %v6236_v29, -inf }
 0x8f5   :  { %v6242_v6 = vpop.f32.mrf.mxu0  ;;  %2061 = vmax.xlane.f32.xlu1 %v2060_v43  ;;  %2064 = vmax.xlane.f32.xlu0 %v2063_v59  ;;  %v1764_v60 = vmul.f32 %v5109_v45, %v6196_v23  ;;  %v5111_v13 = vpop.eup %5110 }
 0x8f6   :  { %v2075_v14 = vsel %vm563_vm2, %v6242_v6, -inf  ;;  %v5113_v3 = vpop.eup %5112  ;;  %v1766_v32 = vmul.f32 %v5111_v13, %v6169_v51 }
 0x8f7   :  { %v6246_v24 = vpop.f32.mrf.mxu0  ;;  %v1771_v56 = vpack.c.bf16 %v1764_v60, %v1763_v41  ;;  %v1765_v43 = vmul.f32 %v5113_v3, %v6159_v62 }
 0x8f8   :  { %v2069_v5 = vsel %vm563_vm2, %v6246_v24, -inf }
 0x8f9   :  { %v6250_v47 = vpop.f32.mrf.mxu0  ;;  %2067 = vmax.xlane.f32.xlu0 %v2066_v10  ;;  %4661 = vmatprep.mubr.msk.bf16.mxu1 %vm563_vm2, %v1771_v56  ;;  %v1772_v59 = vpack.c.bf16 %v1766_v32, %v1765_v43 }
 0x8fa   :  { %v2078_v23 = vsel %vm563_vm2, %v6250_v47, -inf }
 0x8fb   :  { %v6253_v31 = vpop.f32.mrf.mxu0 }
 0x8fc   :  { %v2072_v9 = vsel %vm563_vm2, %v6253_v31, -inf }
 0x8fd   :  { %2073 = vmax.xlane.f32.xlu1 %v2072_v9  ;;  %2070 = vmax.xlane.f32.xlu0 %v2069_v5 }
 0x901   :  { %2079 = vmax.xlane.f32.xlu1 %v2078_v23  ;;  %2076 = vmax.xlane.f32.xlu0 %v2075_v14 }
 0x912   :  { %2153 = vrot.lane.b32.xlu1 %v6114_v11, %s5324_s24 }
 0x916   :  { %2151 = vrot.lane.b32.xlu1 %v5752_v15, %s5324_s24 }
 0x917   :  { %2155 = vrot.lane.b32.xlu0 %v5765_v30, %s5324_s24 }
 0x91a   :  { %2149 = vrot.lane.b32.xlu1 %v6018_v18, %s5324_s24 }
 0x91f   :  { %v1754_v61 = vpop.xlane.xlu1 %1753 }
 0x920   :  { %5114 = vrcp.f32 %v1754_v61 }
 0x921   :  { %5116 = vrcp.f32 %v6220_v33  ;;  %v6281_v33 = vsel %vm1051_vm3, %v460_v37, 0 }
 0x922   :  { %5118 = vrcp.f32 %v6218_v44 }
 0x923   :  { %v1748_v1 = vpop.xlane.xlu1 %1747 }
 0x924   :  { %5120 = vrcp.f32 %v1748_v1 }
 0x927   :  { %v1776_v45 = vpop.permute.xlu1 %1775 }
 0x928   :  { %4659 = vmatprep.subr.bf16.mxu1 %v1776_v45 }
 0x929   :  { %4660 = vmatpush3.bf16.msra.mxu1 %v1776_v45 }
 0x92a   :  { %4918 = vmatprep.subr.msk.bf16.mxu1 %vm1051_vm3, %v460_v37 }
 0x92c   :  { %4662 = vmatmul.mubr.msk.bf16.vlgmr.msra.gmra.mxu1 %vm563_vm2, %v1772_v59 }
 0x92d   :  { %4670 = vmatpush3.bf16.msra.mxu1 %v6281_v33  ;;  %v5115_v51 = vpop.eup %5114 }
 0x92e   :  { %v5117_v44 = vpop.eup %5116  ;;  %v1770_v56 = vmul.f32 %v5115_v51, %v6206_v19 }
 0x92f   :  { %v5119_v41 = vpop.eup %5118  ;;  %v1767_v62 = vmul.f32 %v5117_v44, %v6181_v22 }
 0x930   :  { %v1769_v9 = vmul.f32 %v5119_v41, %v6177_v34 }
 0x931   :  { %v5121_v60 = vpop.eup %5120 }
 0x932   :  { %v1768_v10 = vmul.f32 %v5121_v60, %v6210_v21  ;;  %v1774_v23 = vpack.c.bf16 %v1770_v56, %v1769_v9 }
 0x934   :  { %v1773_v5 = vpack.c.bf16 %v1768_v10, %v1767_v62 }
 0x936   :  { %4665 = vmatprep.mubr.msk.bf16.mxu1 %vm563_vm2, %v1773_v5 }
 0x937   :  { %4666 = vmatmul.mubr.msk.bf16.gmra.mxu1 %vm563_vm2, %v1774_v23 }
 0x97a   :  { %v2059_v14 = vpop.xlane.xlu0 %2058 }
 0x97b   :  { %v2081_v61 = vsub.f32 %v6230_v38, %v2059_v14 }
 0x97d   :  { %v2089_v32 = vmul.f32 1.442695, %v2081_v61 }
 0x97e   :  { %v2062_v13 = vpop.xlane.xlu1 %2061  ;;  %v2065_v1 = vpop.xlane.xlu0 %2064 }
 0x97f   :  { %v2083_v3 = vsub.f32 %v6228_v52, %v2065_v1  ;;  %v2082_v19 = vsub.f32 %v6236_v29, %v2062_v13 }
 0x981   :  { %v2093_v22 = vmul.f32 1.442695, %v2083_v3  ;;  %v2091_v45 = vmul.f32 1.442695, %v2082_v19 }
 0x982   :  { %v2068_v21 = vpop.xlane.xlu0 %2067 }
 0x983   :  { %v2084_v34 = vsub.f32 %v6234_v35, %v2068_v21  ;;  %5122 = vpow2.f32 %v2093_v22 }
 0x984   :  { %5124 = vpow2.f32 %v2089_v32 }
 0x985   :  { %v2095_v37 = vmul.f32 1.442695, %v2084_v34 }
 0x986   :  { %v2074_v43 = vpop.xlane.xlu1 %2073  ;;  %v2071_v59 = vpop.xlane.xlu0 %2070 }
 0x987   :  { %5126 = vpow2.f32 %v2095_v37  ;;  %v2085_v38 = vsub.f32 %v6246_v24, %v2071_v59  ;;  %v2086_v35 = vsub.f32 %v6253_v31, %v2074_v43 }
 0x988   :  { %5128 = vpow2.f32 %v2091_v45 }
 0x989   :  { %v2097_v51 = vmul.f32 1.442695, %v2085_v38  ;;  %v2099_v24 = vmul.f32 1.442695, %v2086_v35 }
 0x98a   :  { %v2080_v44 = vpop.xlane.xlu1 %2079  ;;  %v2077_v52 = vpop.xlane.xlu0 %2076 }
 0x98b   :  { %v2088_v29 = vsub.f32 %v6250_v47, %v2080_v44  ;;  %v2087_v41 = vsub.f32 %v6242_v6, %v2077_v52  ;;  %5130 = vpow2.f32 %v2097_v51 }
 0x98d   :  { %v2101_v60 = vmul.f32 1.442695, %v2087_v41  ;;  %v2103_v56 = vmul.f32 1.442695, %v2088_v29 }
 0x98e   :  { %v6299_v62 = vpop.permute.xlu0 %2155 }
 0x98f   :  { %4695 = vmatprep.subr.bf16.mxu1 %v6299_v62  ;;  %5132 = vpow2.f32 %v2101_v60 }
 0x990   :  { %v6302_v10 = vpop.eup %5122  ;;  %5134 = vpow2.f32 %v2103_v56 }
 0x991   :  { %v2111_v9 = vsel %vm563_vm2, %v6302_v10, 0.0  ;;  %v6306_v47 = vpop.eup %5124  ;;  %5136 = vpow2.f32 %v2099_v24 }
 0x992   :  { %2112 = vadd.xlane.f32.xlu0 %v2111_v9  ;;  %v2105_v23 = vsel %vm563_vm2, %v6306_v47, 0.0 }
 0x994   :  { %v6308_v6 = vpop.eup %5126 }
 0x995   :  { %v2114_v31 = vsel %vm563_vm2, %v6308_v6, 0.0  ;;  %v6312_v5 = vpop.eup %5128 }
 0x996   :  { %2115 = vadd.xlane.f32.xlu1 %v2114_v31  ;;  %2106 = vadd.xlane.f32.xlu0 %v2105_v23  ;;  %v2108_v14 = vsel %vm563_vm2, %v6312_v5, 0.0 }
 0x998   :  { %v6318_v61 = vpop.eup %5130 }
 0x999   :  { %v2117_v1 = vsel %vm563_vm2, %v6318_v61, 0.0 }
 0x99a   :  { %2109 = vadd.xlane.f32.xlu1 %v2108_v14 }
 0x99c   :  { %v6320_v13 = vpop.eup %5132 }
 0x99d   :  { %v2123_v3 = vsel %vm563_vm2, %v6320_v13, 0.0  ;;  %v6326_v19 = vpop.eup %5134 }
 0x99e   :  { %2118 = vadd.xlane.f32.xlu1 %v2117_v1  ;;  %2124 = vadd.xlane.f32.xlu0 %v2123_v3  ;;  %v2126_v45 = vsel %vm563_vm2, %v6326_v19, 0.0  ;;  %v6336_v37 = vpop.eup %5136 }
 0x99f   :  { %v4631_v22 = vpop.f32.mrf.mxu1 }
 0x9a0   :  { %v6329_v32 = vadd.f32 %v4631_v22, %v6023_v17  ;;  %v2120_v17 = vsel %vm563_vm2, %v6336_v37, 0.0 }
 0x9a1   :  { %v1539_v21 = vpop.f32.mrf.mxu1 }
 0x9a2   :  { %v6332_v34 = vadd.f32 %v1539_v21, %v6025_v12  ;;  %2127 = vadd.xlane.f32.xlu0 %v2126_v45 }
 0x9a3   :  { %v4632_v43 = vpop.f32.mrf.mxu1 }
 0x9a4   :  { %v6339_v59 = vadd.f32 %v4632_v43, %v6027_v46  ;;  %v1189_v46 = vadd.f32 %v6222_v25, %v6037_v7  ;;  %v2154_v25 = vpop.permute.xlu1 %2153 }
 0x9a5   :  { %v1542_v38 = vpop.f32.mrf.mxu1 }
 0x9a6   :  { %v6342_v51 = vadd.f32 %v1542_v38, %v6029_v39  ;;  %2121 = vadd.xlane.f32.xlu0 %v2120_v17 }
 0x9a8   :  { %v2152_v31 = vpop.permute.xlu1 %2151 }
 0x9aa   :  { %v4635_v12 = vpop.f32.mrf.mxu1 }
 0x9ab   :  { %v6347_v44 = vadd.f32 %v4635_v12, %v6031_v27 }
 0x9ac   :  { %v1555_v52 = vpop.f32.mrf.mxu1  ;;  %v2150_v22 = vpop.permute.xlu1 %2149 }
 0x9ad   :  { %v6350_v29 = vadd.f32 %v1555_v52, %v6033_v0 }
 0x9ae   :  { %v4636_v41 = vpop.f32.mrf.mxu1 }
 0x9af   :  { %v6355_v60 = vadd.f32 %v4636_v41, %v6035_v40  ;;  %2254 = vrot.lane.b32.xlu1 %v6114_v11, %s5322_s22 }
 0x9b0   :  { %v1558_v39 = vpop.f32.mrf.mxu1 }
 0x9b1   :  { %v6359_v35 = vadd.f32 %v1558_v39, %v1189_v46 }
 0x9b3   :  { %2252 = vrot.lane.b32.xlu1 %v5752_v15, %s5322_s22 }
 0x9b7   :  { %2250 = vrot.lane.b32.xlu1 %v6018_v18, %s5322_s22 }
 0x9bb   :  { %2244 = vrot.lane.b32.xlu1 %v5752_v15, %s5323_s23 }
 0x9bc   :  { %2256 = vrot.lane.b32.xlu0 %v5765_v30, %s5322_s22 }
 0x9bf   :  { %2248 = vrot.lane.b32.xlu1 %v5765_v30, %s5323_s23 }
 0x9c0   :  { %2242 = vrot.lane.b32.xlu0 %v6018_v18, %s5323_s23 }
 0x9c4   :  { %2246 = vrot.lane.b32.xlu0 %v6114_v11, %s5323_s23 }
 0x9ec   :  { %v4663_v27 = vpop.f32.mrf.mxu1 }
 0x9ee   :  { %v1833_v0 = vpop.f32.mrf.mxu1 }
 0x9f0   :  { %v4664_v40 = vpop.f32.mrf.mxu1 }
 0x9f1   :  { %v1865_v24 = vpack.c.bf16 %v4664_v40, %v4663_v27 }
 0x9f2   :  { %v1836_v7 = vpop.f32.mrf.mxu1 }
 0x9f3   :  { %v1864_v56 = vpack.c.bf16 %v1836_v7, %v1833_v0 }
 0x9f5   :  { %4671 = vmatprep.mubr.msk.bf16.mxu1 %vm473_vm1, %v1864_v56 }
 0x9f6   :  { %4672 = vmatmul.mubr.msk.bf16.vlgmr.msra.gmra.mxu1 %vm473_vm1, %v1865_v24 }
 0x9f7   :  { %4696 = vmatpush3.bf16.msra.mxu1 %v6299_v62  ;;  %v4667_v9 = vpop.f32.mrf.mxu1 }
 0x9f8   :  { %4697 = vmatprep.subr.bf16.mxu1 %v2154_v25 }
 0x9f9   :  { %v1849_v23 = vpop.f32.mrf.mxu1 }
 0x9fb   :  { %4698 = vmatpush3.bf16.msra.mxu1 %v2154_v25  ;;  %v4668_v14 = vpop.f32.mrf.mxu1 }
 0x9fc   :  { %4699 = vmatprep.subr.bf16.mxu1 %v2152_v31  ;;  %v1867_v21 = vpack.c.bf16 %v4668_v14, %v4667_v9 }
 0x9fd   :  { %v1852_v1 = vpop.f32.mrf.mxu1 }
 0x9fe   :  { %v1866_v3 = vpack.c.bf16 %v1852_v1, %v1849_v23 }
 0x9ff   :  { %4700 = vmatpush3.bf16.msra.mxu1 %v2152_v31 }
 0xa00   :  { %4701 = vmatprep.subr.bf16.mxu1 %v2150_v22  ;;  %4675 = vmatprep.mubr.msk.bf16.mxu1 %vm473_vm1, %v1866_v3 }
 0xa01   :  { %4676 = vmatmul.mubr.msk.bf16.gmra.mxu1 %vm473_vm1, %v1867_v21 }
 0xa03   :  { %4702 = vmatpush3.bf16.msra.mxu1 %v2150_v22 }
 0xa1b   :  { %v2113_v45 = vpop.xlane.xlu0 %2112 }
 0xa1f   :  { %v2116_v62 = vpop.xlane.xlu1 %2115  ;;  %v2107_v43 = vpop.xlane.xlu0 %2106 }
 0xa20   :  { %5138 = vrcp.f32 %v2116_v62 }
 0xa21   :  { %5140 = vrcp.f32 %v2107_v43 }
 0xa22   :  { %5142 = vrcp.f32 %v2113_v45 }
 0xa23   :  { %v2110_v38 = vpop.xlane.xlu1 %2109 }
 0xa24   :  { %5144 = vrcp.f32 %v2110_v38 }
 0xa27   :  { %v2125_v17 = vpop.xlane.xlu0 %2124  ;;  %v2119_v12 = vpop.xlane.xlu1 %2118 }
 0xa2b   :  { %v2128_v52 = vpop.xlane.xlu0 %2127  ;;  %v2255_v14 = vpop.permute.xlu1 %2254 }
 0xa2c   :  { %5146 = vrcp.f32 %v2128_v52  ;;  %v2277_v3 = vsel %vm473_vm1, %v2255_v14, 0 }
 0xa2d   :  { %v5139_v41 = vpop.eup %5138  ;;  %5148 = vrcp.f32 %v2119_v12 }
 0xa2e   :  { %v5141_v46 = vpop.eup %5140  ;;  %5150 = vrcp.f32 %v2125_v17  ;;  %v2140_v40 = vmul.f32 %v5139_v41, %v6308_v6 }
 0xa2f   :  { %v5143_v39 = vpop.eup %5142  ;;  %v2122_v27 = vpop.xlane.xlu0 %2121  ;;  %v2137_v7 = vmul.f32 %v5141_v46, %v6306_v47 }
 0xa30   :  { %5152 = vrcp.f32 %v2122_v27  ;;  %v2139_v56 = vmul.f32 %v5143_v39, %v6302_v10  ;;  %v2253_v45 = vpop.permute.xlu1 %2252 }
 0xa31   :  { %v5145_v0 = vpop.eup %5144 }
 0xa32   :  { %v2138_v25 = vmul.f32 %v5145_v0, %v6312_v5  ;;  %v2146_v31 = vpack.c.bf16 %v2140_v40, %v2139_v56 }
 0xa33   :  { %v2257_v24 = vpop.permute.xlu0 %2256 }
 0xa34   :  { %v2145_v9 = vpack.c.bf16 %v2138_v25, %v2137_v7  ;;  %4923 = vmatprep.subr.msk.bf16.mxu1 %vm473_vm1, %v2257_v24  ;;  %v2280_v23 = vsel %vm473_vm1, %v2257_v24, 0 }
 0xa36   :  { %4703 = vmatprep.mubr.msk.bf16.mxu1 %vm563_vm2, %v2145_v9 }
 0xa37   :  { %4704 = vmatmul.mubr.msk.bf16.vlgmr.msra.gmra.mxu1 %vm563_vm2, %v2146_v31  ;;  %v2243_v17 = vpop.permute.xlu0 %2242 }
 0xa38   :  { %4712 = vmatpush3.bf16.xpose.msra.mxu1 %v2280_v23 }
 0xa39   :  { %4924 = vmatprep.subr.msk.bf16.mxu1 %vm473_vm1, %v2255_v14  ;;  %v5147_v47 = vpop.eup %5146 }
 0xa3a   :  { %v5149_v6 = vpop.eup %5148  ;;  %v2144_v10 = vmul.f32 %v5147_v47, %v6326_v19  ;;  %v2274_v19 = vsel %vm473_vm1, %v2253_v45, 0 }
 0xa3b   :  { %v5151_v5 = vpop.eup %5150  ;;  %v2141_v22 = vmul.f32 %v5149_v6, %v6318_v61  ;;  %v2251_v61 = vpop.permute.xlu1 %2250 }
 0xa3c   :  { %v2143_v62 = vmul.f32 %v5151_v5, %v6320_v13  ;;  %v5315_v13 = vld [vmem:[%s7188_s4] sm:$0xf]  ;;  %v2247_v52 = vpop.permute.xlu0 %2246 }
 0xa3d   :  { %v5153_v1 = vpop.eup %5152 }
 0xa3e   :  { %v2142_v21 = vmul.f32 %v5153_v1, %v6336_v37  ;;  %v2148_v38 = vpack.c.bf16 %v2144_v10, %v2143_v62  ;;  %v2271_v37 = vsel %vm473_vm1, %v2251_v61, 0 }
 0xa3f   :  { %v2245_v12 = vpop.permute.xlu1 %2244 }
 0xa40   :  { %4714 = vmatpush3.bf16.xpose.msra.mxu1 %v2277_v3  ;;  %v2147_v43 = vpack.c.bf16 %v2142_v21, %v2141_v22 }
 0xa41   :  { %4925 = vmatprep.subr.msk.bf16.mxu1 %vm473_vm1, %v2253_v45 }
 0xa42   :  { %4707 = vmatprep.mubr.msk.bf16.mxu1 %vm563_vm2, %v2147_v43 }
 0xa43   :  { %4708 = vmatmul.mubr.msk.bf16.gmra.mxu1 %vm563_vm2, %v2148_v38  ;;  %v2249_v41 = vpop.permute.xlu1 %2248 }
 0xa44   :  { %4719 = vmatprep.mubr.msk.bf16.mxu1 %vm473_vm1, %v2243_v17 }
 0xa48   :  { %4716 = vmatpush3.bf16.xpose.msra.mxu1 %v2274_v19 }
 0xa49   :  { %4926 = vmatprep.subr.msk.bf16.mxu1 %vm473_vm1, %v2251_v61 }
 0xa50   :  { %4718 = vmatpush3.bf16.xpose.msra.mxu1 %v2271_v37 }
 0xa51   :  { %4928 = vmatprep.subr.msk.bf16.mxu1 %vm1051_vm3, %v5315_v13 }
 0xa57   :  { %4720 = vmatmul.mubr.msk.bf16.vlgmr.msra.gmra.mxu1 %vm473_vm1, %v2245_v12 }
 0xa58   :  { %4723 = vmatprep.mubr.msk.bf16.mxu1 %vm473_vm1, %v2247_v52  ;;  %4754 = vmatpush3.bf16.msra.mxu1 %v5981_v54 }
 0xa5f   :  { %4724 = vmatmul.mubr.msk.bf16.gmra.mxu1 %vm473_vm1, %v2249_v41 }
 0xab6   :  { %v4673_v46 = vpop.f32.mrf.mxu1 }
 0xab7   :  { %v6410_v39 = vadd.f32 %v4673_v46, %v6329_v32 }
 0xab8   :  { %v1917_v27 = vpop.f32.mrf.mxu1 }
 0xab9   :  { %v6413_v0 = vadd.f32 %v1917_v27, %v6332_v34 }
 0xaba   :  { %v4674_v40 = vpop.f32.mrf.mxu1 }
 0xabb   :  { %v6416_v7 = vadd.f32 %v4674_v40, %v6339_v59 }
 0xabc   :  { %v1920_v25 = vpop.f32.mrf.mxu1 }
 0xabd   :  { %v6419_v56 = vadd.f32 %v1920_v25, %v6342_v51 }
 0xac1   :  { %v4677_v54 = vpop.f32.mrf.mxu1 }
 0xac2   :  { %v6422_v24 = vadd.f32 %v4677_v54, %v6347_v44 }
 0xac3   :  { %v1933_v9 = vpop.f32.mrf.mxu1 }
 0xac4   :  { %v6425_v32 = vadd.f32 %v1933_v9, %v6350_v29 }
 0xac5   :  { %v4678_v31 = vpop.f32.mrf.mxu1 }
 0xac6   :  { %v6428_v34 = vadd.f32 %v4678_v31, %v6355_v60 }
 0xac7   :  { %v1936_v23 = vpop.f32.mrf.mxu1 }
 0xac8   :  { %v6431_v59 = vadd.f32 %v1936_v23, %v6359_v35 }
 0xaf7   :  { %v4705_v14 = vpop.f32.mrf.mxu1 }
 0xaf9   :  { %v2207_v47 = vpop.f32.mrf.mxu1 }
 0xafb   :  { %v4706_v51 = vpop.f32.mrf.mxu1 }
 0xafc   :  { %v2239_v1 = vpack.c.bf16 %v4706_v51, %v4705_v14 }
 0xafd   :  { %v2210_v6 = vpop.f32.mrf.mxu1 }
 0xafe   :  { %v2238_v5 = vpack.c.bf16 %v2210_v6, %v2207_v47 }
 0xb00   :  { %4755 = vmatprep.mubr.msk.bf16.mxu1 %vm473_vm1, %v2238_v5 }
 0xb01   :  { %4756 = vmatmul.mubr.msk.bf16.vlgmr.msra.gmra.mxu1 %vm473_vm1, %v2239_v1 }
 0xb03   :  { %v4709_v44 = vpop.f32.mrf.mxu1 }
 0xb05   :  { %v2223_v29 = vpop.f32.mrf.mxu1 }
 0xb07   :  { %v4710_v10 = vpop.f32.mrf.mxu1 }
 0xb08   :  { %v2241_v22 = vpack.c.bf16 %v4710_v10, %v4709_v44 }
 0xb09   :  { %v2226_v3 = vpop.f32.mrf.mxu1 }
 0xb0a   :  { %v2240_v60 = vpack.c.bf16 %v2226_v3, %v2223_v29 }
 0xb0c   :  { %4759 = vmatprep.mubr.msk.bf16.mxu1 %vm473_vm1, %v2240_v60 }
 0xb0d   :  { %4760 = vmatmul.mubr.msk.bf16.gmra.mxu1 %vm473_vm1, %v2241_v22 }
 0xb17   :  { %v4721_v35 = vpop.f32.mrf.mxu1 }
 0xb18   :  { %v2353_v38 = vsel %vm563_vm2, %v4721_v35, -inf }
 0xb19   :  { %v2316_v21 = vpop.f32.mrf.mxu1 }
 0xb1a   :  { %v2347_v45 = vsel %vm563_vm2, %v2316_v21, -inf }
 0xb1b   :  { %2348 = vmax.xlane.f32.xlu0 %v2347_v45  ;;  %v4722_v62 = vpop.f32.mrf.mxu1 }
 0xb1c   :  { %v2356_v37 = vsel %vm563_vm2, %v4722_v62, -inf }
 0xb1d   :  { %v2319_v43 = vpop.f32.mrf.mxu1 }
 0xb1e   :  { %v2350_v17 = vsel %vm563_vm2, %v2319_v43, -inf }
 0xb1f   :  { %2354 = vmax.xlane.f32.xlu0 %v2353_v38  ;;  %2351 = vmax.xlane.f32.xlu1 %v2350_v17  ;;  %v4725_v19 = vpop.f32.mrf.mxu1 }
 0xb20   :  { %v2365_v41 = vsel %vm563_vm2, %v4725_v19, -inf }
 0xb21   :  { %v2332_v61 = vpop.f32.mrf.mxu1 }
 0xb22   :  { %v2359_v27 = vsel %vm563_vm2, %v2332_v61, -inf }
 0xb23   :  { %2357 = vmax.xlane.f32.xlu0 %v2356_v37  ;;  %v4726_v13 = vpop.f32.mrf.mxu1 }
 0xb24   :  { %v2368_v12 = vsel %vm563_vm2, %v4726_v13, -inf }
 0xb25   :  { %2369 = vmax.xlane.f32.xlu1 %v2368_v12  ;;  %v2335_v52 = vpop.f32.mrf.mxu1 }
 0xb26   :  { %v2362_v46 = vsel %vm563_vm2, %v2335_v52, -inf }
 0xb27   :  { %2366 = vmax.xlane.f32.xlu0 %v2365_v41 }
 0xb29   :  { %2363 = vmax.xlane.f32.xlu1 %v2362_v46 }
 0xb2b   :  { %2360 = vmax.xlane.f32.xlu0 %v2359_v27 }
 0xb3a   :  { %2443 = vrot.lane.b32.xlu1 %v6114_v11, %s5325_s25 }
 0xb41   :  { %2445 = vrot.lane.b32.xlu0 %v5765_v30, %s5325_s25 }
 0xba4   :  { %v2349_v40 = vpop.xlane.xlu0 %2348 }
 0xba5   :  { %v2371_v25 = vsub.f32 %v2316_v21, %v2349_v40 }
 0xba7   :  { %v2379_v47 = vmul.f32 1.442695, %v2371_v25 }
 0xba8   :  { %v2352_v54 = vpop.xlane.xlu1 %2351  ;;  %v2355_v9 = vpop.xlane.xlu0 %2354 }
 0xba9   :  { %v2373_v31 = vsub.f32 %v4721_v35, %v2355_v9  ;;  %v2372_v23 = vsub.f32 %v2319_v43, %v2352_v54 }
 0xbab   :  { %v2383_v14 = vmul.f32 1.442695, %v2373_v31  ;;  %v2381_v1 = vmul.f32 1.442695, %v2372_v23 }
 0xbac   :  { %v2358_v51 = vpop.xlane.xlu0 %2357 }
 0xbad   :  { %v2374_v6 = vsub.f32 %v4722_v62, %v2358_v51  ;;  %5154 = vpow2.f32 %v2383_v14 }
 0xbae   :  { %v2370_v5 = vpop.xlane.xlu1 %2369  ;;  %5156 = vpow2.f32 %v2379_v47 }
 0xbaf   :  { %v2385_v44 = vmul.f32 1.442695, %v2374_v6  ;;  %v2378_v35 = vsub.f32 %v4726_v13, %v2370_v5 }
 0xbb0   :  { %v2367_v29 = vpop.xlane.xlu0 %2366 }
 0xbb1   :  { %5158 = vpow2.f32 %v2385_v44  ;;  %v2377_v3 = vsub.f32 %v4725_v19, %v2367_v29  ;;  %v2393_v12 = vmul.f32 1.442695, %v2378_v35 }
 0xbb2   :  { %v2364_v10 = vpop.xlane.xlu1 %2363  ;;  %5160 = vpow2.f32 %v2381_v1 }
 0xbb3   :  { %v2376_v60 = vsub.f32 %v2335_v52, %v2364_v10  ;;  %v2391_v43 = vmul.f32 1.442695, %v2377_v3 }
 0xbb4   :  { %v2361_v22 = vpop.xlane.xlu0 %2360 }
 0xbb5   :  { %v2389_v21 = vmul.f32 1.442695, %v2376_v60  ;;  %v2375_v45 = vsub.f32 %v2332_v61, %v2361_v22 }
 0xbb6   :  { %v2444_v62 = vpop.permute.xlu1 %2443 }
 0xbb7   :  { %5162 = vpow2.f32 %v2389_v21  ;;  %v2387_v38 = vmul.f32 1.442695, %v2375_v45 }
 0xbb8   :  { %v2446_v17 = vpop.permute.xlu0 %2445 }
 0xbb9   :  { %5164 = vpow2.f32 %v2387_v38  ;;  %4727 = vmatprep.subr.bf16.mxu0 %v2446_v17 }
 0xbba   :  { %4728 = vmatpush3.bf16.msra.mxu0 %v2446_v17  ;;  %v6449_v37 = vpop.eup %5154  ;;  %5166 = vpow2.f32 %v2391_v43 }
 0xbbb   :  { %4729 = vmatprep.subr.bf16.mxu0 %v2444_v62  ;;  %v2401_v19 = vsel %vm563_vm2, %v6449_v37, 0.0  ;;  %v6453_v52 = vpop.eup %5156  ;;  %5168 = vpow2.f32 %v2393_v12 }
 0xbbc   :  { %2402 = vadd.xlane.f32.xlu0 %v2401_v19  ;;  %v2395_v46 = vsel %vm563_vm2, %v6453_v52, 0.0 }
 0xbbe   :  { %v6455_v61 = vpop.eup %5158  ;;  %4730 = vmatpush3.bf16.msra.mxu0 %v2444_v62 }
 0xbbf   :  { %v2404_v13 = vsel %vm563_vm2, %v6455_v61, 0.0  ;;  %v5161_v41 = vpop.eup %5160 }
 0xbc0   :  { %2405 = vadd.xlane.f32.xlu1 %v2404_v13  ;;  %2396 = vadd.xlane.f32.xlu0 %v2395_v46  ;;  %v2398_v27 = vsel %vm563_vm2, %v5161_v41, 0.0 }
 0xbc4   :  { %v6462_v40 = vpop.eup %5162  ;;  %2399 = vadd.xlane.f32.xlu1 %v2398_v27 }
 0xbc5   :  { %v2410_v25 = vsel %vm563_vm2, %v6462_v40, 0.0 }
 0xbc6   :  { %v6466_v54 = vpop.eup %5164  ;;  %2411 = vadd.xlane.f32.xlu0 %v2410_v25  ;;  %v5316_v25 = vld [vmem:[%s7188_s4 + $0x4] sm:$0xf] }
 0xbc7   :  { %v2407_v9 = vsel %vm563_vm2, %v6466_v54, 0.0  ;;  %v6470_v31 = vpop.eup %5166 }
 0xbc8   :  { %2408 = vadd.xlane.f32.xlu1 %v2407_v9  ;;  %v2413_v23 = vsel %vm563_vm2, %v6470_v31, 0.0  ;;  %v6474_v14 = vpop.eup %5168 }
 0xbc9   :  { %v2416_v47 = vsel %vm563_vm2, %v6474_v14, 0.0 }
 0xbcc   :  { %2414 = vadd.xlane.f32.xlu1 %v2413_v23 }
 0xbd0   :  { %2417 = vadd.xlane.f32.xlu1 %v2416_v47 }
 0xbdc   :  { %2441 = vrot.lane.b32.xlu0 %v5752_v15, %s5325_s25 }
 0xbe0   :  { %2700 = vrot.lane.b32.xlu0 %v5765_v30, %s5326_s26 }
 0xbe1   :  { %2439 = vrot.lane.b32.xlu1 %v6018_v18, %s5325_s25 }
 0xbe4   :  { %2696 = vrot.lane.b32.xlu0 %v5752_v15, %s5326_s26 }
 0xbe5   :  { %2698 = vrot.lane.b32.xlu1 %v6114_v11, %s5326_s26 }
 0xbe8   :  { %2686 = vrot.lane.b32.xlu0 %v6018_v18, %s5327_s27 }
 0xbe9   :  { %2694 = vrot.lane.b32.xlu1 %v6018_v18, %s5326_s26 }
 0xbec   :  { %2690 = vrot.lane.b32.xlu0 %v6114_v11, %s5327_s27 }
 0xbed   :  { %2688 = vrot.lane.b32.xlu1 %v5752_v15, %s5327_s27 }
 0xbf0   :  { %3075 = vrot.lane.b32.xlu0 %v5765_v30, %s5328_s28 }
 0xbf1   :  { %2692 = vrot.lane.b32.xlu1 %v5765_v30, %s5327_s27 }
 0xbf4   :  { %3071 = vrot.lane.b32.xlu0 %v5752_v15, %s5328_s28 }
 0xbf5   :  { %3073 = vrot.lane.b32.xlu1 %v6114_v11, %s5328_s28 }
 0xbf8   :  { %3061 = vrot.lane.b32.xlu0 %v6018_v18, %s5329_s29 }
 0xbf9   :  { %3069 = vrot.lane.b32.xlu1 %v6018_v18, %s5328_s28 }
 0xbfc   :  { %3065 = vrot.lane.b32.xlu0 %v6114_v11, %s5329_s29 }
 0xbfd   :  { %3063 = vrot.lane.b32.xlu1 %v5752_v15, %s5329_s29 }
 0xc01   :  { %3067 = vrot.lane.b32.xlu1 %v5765_v30, %s5329_s29 }
 0xc45   :  { %v2403_v51 = vpop.xlane.xlu0 %2402 }
 0xc49   :  { %v2406_v6 = vpop.xlane.xlu1 %2405  ;;  %v2397_v5 = vpop.xlane.xlu0 %2396 }
 0xc4a   :  { %5170 = vrcp.f32 %v2406_v6 }
 0xc4b   :  { %5172 = vrcp.f32 %v2397_v5 }
 0xc4c   :  { %5174 = vrcp.f32 %v2403_v51 }
 0xc4d   :  { %v2400_v1 = vpop.xlane.xlu1 %2399 }
 0xc4e   :  { %5176 = vrcp.f32 %v2400_v1 }
 0xc4f   :  { %v2412_v44 = vpop.xlane.xlu0 %2411 }
 0xc50   :  { %5178 = vrcp.f32 %v2412_v44 }
 0xc51   :  { %v2409_v29 = vpop.xlane.xlu1 %2408 }
 0xc52   :  { %5180 = vrcp.f32 %v2409_v29 }
 0xc53   :  { %v2442_v10 = vpop.permute.xlu0 %2441 }
 0xc54   :  { %4731 = vmatprep.subr.bf16.mxu0 %v2442_v10 }
 0xc55   :  { %v2415_v3 = vpop.xlane.xlu1 %2414  ;;  %4732 = vmatpush3.bf16.msra.mxu0 %v2442_v10 }
 0xc56   :  { %5182 = vrcp.f32 %v2415_v3 }
 0xc57   :  { %v5171_v60 = vpop.eup %5170 }
 0xc58   :  { %v5173_v22 = vpop.eup %5172  ;;  %v2430_v43 = vmul.f32 %v5171_v60, %v6455_v61 }
 0xc59   :  { %v2418_v21 = vpop.xlane.xlu1 %2417  ;;  %v5175_v45 = vpop.eup %5174  ;;  %v2427_v38 = vmul.f32 %v5173_v22, %v6453_v52 }
 0xc5a   :  { %5184 = vrcp.f32 %v2418_v21  ;;  %v2429_v19 = vmul.f32 %v5175_v45, %v6449_v37 }
 0xc5b   :  { %v5177_v35 = vpop.eup %5176 }
 0xc5c   :  { %v2428_v17 = vmul.f32 %v5177_v35, %v5161_v41  ;;  %v2436_v27 = vpack.c.bf16 %v2430_v43, %v2429_v19  ;;  %v2701_v41 = vpop.permute.xlu0 %2700 }
 0xc5d   :  { %v5179_v62 = vpop.eup %5178  ;;  %v2440_v12 = vpop.permute.xlu1 %2439 }
 0xc5e   :  { %4733 = vmatprep.subr.bf16.mxu0 %v2440_v12  ;;  %v2435_v13 = vpack.c.bf16 %v2428_v17, %v2427_v38  ;;  %v2432_v61 = vmul.f32 %v5179_v62, %v6462_v40 }
 0xc5f   :  { %v5181_v46 = vpop.eup %5180  ;;  %4734 = vmatpush3.bf16.msra.mxu0 %v2440_v12 }
 0xc60   :  { %4735 = vmatprep.mubr.msk.bf16.mxu0 %vm563_vm2, %v2435_v13  ;;  %4927 = vmatprep.subr.msk.bf16.mxu0 %vm1051_vm3, %v5316_v25  ;;  %v2431_v52 = vmul.f32 %v5181_v46, %v6466_v54 }
 0xc61   :  { %v2699_v3 = vpop.permute.xlu1 %2698 }
 0xc62   :  { %4736 = vmatmul.mubr.msk.bf16.vlgmr.msra.gmra.mxu0 %vm563_vm2, %v2436_v27  ;;  %v2437_v37 = vpack.c.bf16 %v2432_v61, %v2431_v52  ;;  %v2721_v45 = vsel %vm473_vm1, %v2699_v3, 0 }
 0xc63   :  { %4744 = vmatpush3.bf16.msra.mxu0 %v5965_v20  ;;  %v5183_v9 = vpop.eup %5182  ;;  %v2724_v20 = vsel %vm473_vm1, %v2701_v41, 0 }
 0xc64   :  { %4739 = vmatprep.mubr.msk.bf16.mxu0 %vm563_vm2, %v2437_v37  ;;  %4929 = vmatprep.subr.msk.bf16.mxu0 %vm473_vm1, %v2701_v41  ;;  %v2433_v47 = vmul.f32 %v5183_v9, %v6470_v31 }
 0xc65   :  { %v2695_v38 = vpop.permute.xlu1 %2694 }
 0xc66   :  { %v2715_v19 = vsel %vm473_vm1, %v2695_v38, 0 }
 0xc67   :  { %v5185_v23 = vpop.eup %5184 }
 0xc68   :  { %v2434_v51 = vmul.f32 %v5185_v23, %v6474_v14  ;;  %v2697_v14 = vpop.permute.xlu0 %2696 }
 0xc69   :  { %v2718_v17 = vsel %vm473_vm1, %v2697_v14, 0  ;;  %v2689_v12 = vpop.permute.xlu1 %2688 }
 0xc6a   :  { %v2438_v6 = vpack.c.bf16 %v2434_v51, %v2433_v47 }
 0xc6c   :  { %4740 = vmatmul.mubr.msk.bf16.gmra.mxu0 %vm563_vm2, %v2438_v6  ;;  %v2687_v43 = vpop.permute.xlu0 %2686 }
 0xc6d   :  { %v2693_v46 = vpop.permute.xlu1 %2692 }
 0xc70   :  { %v2691_v62 = vpop.permute.xlu0 %2690 }
 0xc71   :  { %v3074_v25 = vpop.permute.xlu1 %3073 }
 0xc72   :  { %v3096_v37 = vsel %vm473_vm1, %v3074_v25, 0 }
 0xc74   :  { %v3076_v13 = vpop.permute.xlu0 %3075 }
 0xc75   :  { %v3099_v27 = vsel %vm473_vm1, %v3076_v13, 0  ;;  %v3070_v9 = vpop.permute.xlu1 %3069 }
 0xc76   :  { %v3090_v23 = vsel %vm473_vm1, %v3070_v9, 0 }
 0xc78   :  { %v3072_v52 = vpop.permute.xlu0 %3071 }
 0xc79   :  { %v3093_v41 = vsel %vm473_vm1, %v3072_v52, 0  ;;  %v3064_v47 = vpop.permute.xlu1 %3063 }
 0xc7c   :  { %v3062_v61 = vpop.permute.xlu0 %3061 }
 0xc7d   :  { %v3068_v6 = vpop.permute.xlu1 %3067 }
 0xc80   :  { %v3066_v51 = vpop.permute.xlu0 %3065 }
 0xd22   :  { %v4737_v40 = vpop.f32.mrf.mxu0 }
 0xd24   :  { %v2497_v54 = vpop.f32.mrf.mxu0 }
 0xd26   :  { %v4738_v5 = vpop.f32.mrf.mxu0 }
 0xd27   :  { %v2529_v29 = vpack.c.bf16 %v4738_v5, %v4737_v40 }
 0xd28   :  { %v2500_v1 = vpop.f32.mrf.mxu0 }
 0xd29   :  { %v2528_v44 = vpack.c.bf16 %v2500_v1, %v2497_v54 }
 0xd2b   :  { %4745 = vmatprep.mubr.msk.bf16.mxu0 %vm473_vm1, %v2528_v44 }
 0xd2c   :  { %v4741_v10 = vpop.f32.mrf.mxu0  ;;  %4746 = vmatmul.mubr.msk.bf16.vlgmr.msra.gmra.mxu0 %vm473_vm1, %v2529_v29 }
 0xd2d   :  { %4764 = vmatpush3.bf16.xpose.msra.mxu0 %v2724_v20 }
 0xd2e   :  { %4930 = vmatprep.subr.msk.bf16.mxu0 %vm473_vm1, %v2699_v3  ;;  %v2513_v31 = vpop.f32.mrf.mxu0 }
 0xd30   :  { %v4742_v60 = vpop.f32.mrf.mxu0 }
 0xd31   :  { %v2531_v35 = vpack.c.bf16 %v4742_v60, %v4741_v10 }
 0xd32   :  { %v2516_v22 = vpop.f32.mrf.mxu0 }
 0xd33   :  { %v2530_v21 = vpack.c.bf16 %v2516_v22, %v2513_v31 }
 0xd35   :  { %4766 = vmatpush3.bf16.xpose.msra.mxu0 %v2721_v45  ;;  %4749 = vmatprep.mubr.msk.bf16.mxu0 %vm473_vm1, %v2530_v21 }
 0xd36   :  { %4931 = vmatprep.subr.msk.bf16.mxu0 %vm473_vm1, %v2697_v14  ;;  %4750 = vmatmul.mubr.msk.bf16.gmra.mxu0 %vm473_vm1, %v2531_v35 }
 0xd37   :  { %4771 = vmatprep.mubr.msk.bf16.mxu0 %vm473_vm1, %v2687_v43 }
 0xd3d   :  { %4768 = vmatpush3.bf16.xpose.msra.mxu0 %v2718_v17 }
 0xd3e   :  { %4932 = vmatprep.subr.msk.bf16.mxu0 %vm473_vm1, %v2695_v38 }
 0xd45   :  { %4770 = vmatpush3.bf16.xpose.msra.mxu0 %v2715_v19 }
 0xd46   :  { %4934 = vmatprep.subr.msk.bf16.mxu0 %vm473_vm1, %v3076_v13 }
 0xd4c   :  { %4772 = vmatmul.mubr.msk.bf16.vlgmr.msra.gmra.mxu0 %vm473_vm1, %v2689_v12 }
 0xd4d   :  { %4775 = vmatprep.mubr.msk.bf16.mxu0 %vm473_vm1, %v2691_v62  ;;  %4806 = vmatpush3.bf16.xpose.msra.mxu0 %v3099_v27 }
 0xd4e   :  { %4935 = vmatprep.subr.msk.bf16.mxu0 %vm473_vm1, %v3074_v25 }
 0xd54   :  { %4776 = vmatmul.mubr.msk.bf16.gmra.mxu0 %vm473_vm1, %v2693_v46 }
 0xd55   :  { %4808 = vmatpush3.bf16.xpose.msra.mxu0 %v3096_v37  ;;  %4813 = vmatprep.mubr.msk.bf16.mxu0 %vm473_vm1, %v3062_v61 }
 0xd56   :  { %4936 = vmatprep.subr.msk.bf16.mxu0 %vm473_vm1, %v3072_v52 }
 0xd5d   :  { %4810 = vmatpush3.bf16.xpose.msra.mxu0 %v3093_v41 }
 0xd5e   :  { %4937 = vmatprep.subr.msk.bf16.mxu0 %vm473_vm1, %v3070_v9 }
 0xd65   :  { %4812 = vmatpush3.bf16.xpose.msra.mxu0 %v3090_v23 }
 0xd6c   :  { %4814 = vmatmul.mubr.msk.bf16.vlgmr.msra.gmra.mxu0 %vm473_vm1, %v3064_v47 }
 0xd6d   :  { %4817 = vmatprep.mubr.msk.bf16.mxu0 %vm473_vm1, %v3066_v51 }
 0xd74   :  { %4818 = vmatmul.mubr.msk.bf16.gmra.mxu0 %vm473_vm1, %v3068_v6 }
 0xdec   :  { %v6558_v40 = vpop.f32.mrf.mxu0 }
 0xdee   :  { %v6560_v54 = vpop.f32.mrf.mxu0 }
 0xdf0   :  { %v6562_v5 = vpop.f32.mrf.mxu0 }
 0xdf2   :  { %v6564_v1 = vpop.f32.mrf.mxu0 }
 0xdf6   :  { %v6566_v44 = vpop.f32.mrf.mxu0 }
 0xdf8   :  { %v6568_v29 = vpop.f32.mrf.mxu0 }
 0xdfa   :  { %v6570_v20 = vpop.f32.mrf.mxu0 }
 0xdfc   :  { %v6572_v10 = vpop.f32.mrf.mxu0 }
 0xe0c   :  { %v4773_v3 = vpop.f32.mrf.mxu0 }
 0xe0d   :  { %v2797_v21 = vsel %vm563_vm2, %v4773_v3, -inf }
 0xe0e   :  { %v2760_v31 = vpop.f32.mrf.mxu0 }
 0xe0f   :  { %v2791_v14 = vsel %vm563_vm2, %v2760_v31, -inf }
 0xe10   :  { %2792 = vmax.xlane.f32.xlu0 %v2791_v14  ;;  %v4774_v60 = vpop.f32.mrf.mxu0 }
 0xe11   :  { %v2800_v38 = vsel %vm563_vm2, %v4774_v60, -inf }
 0xe12   :  { %v2763_v22 = vpop.f32.mrf.mxu0 }
 0xe13   :  { %v2794_v45 = vsel %vm563_vm2, %v2763_v22, -inf }
 0xe14   :  { %2798 = vmax.xlane.f32.xlu0 %v2797_v21  ;;  %2795 = vmax.xlane.f32.xlu1 %v2794_v45  ;;  %v4777_v35 = vpop.f32.mrf.mxu0 }
 0xe15   :  { %v2809_v13 = vsel %vm563_vm2, %v4777_v35, -inf }
 0xe16   :  { %v2776_v43 = vpop.f32.mrf.mxu0 }
 0xe17   :  { %v2803_v12 = vsel %vm563_vm2, %v2776_v43, -inf }
 0xe18   :  { %2801 = vmax.xlane.f32.xlu0 %v2800_v38  ;;  %v4778_v17 = vpop.f32.mrf.mxu0 }
 0xe19   :  { %v2812_v46 = vsel %vm563_vm2, %v4778_v17, -inf }
 0xe1a   :  { %v2779_v62 = vpop.f32.mrf.mxu0 }
 0xe1b   :  { %v2806_v19 = vsel %vm563_vm2, %v2779_v62, -inf }
 0xe1c   :  { %2804 = vmax.xlane.f32.xlu0 %v2803_v12  ;;  %2807 = vmax.xlane.f32.xlu1 %v2806_v19 }
 0xe20   :  { %2810 = vmax.xlane.f32.xlu0 %v2809_v13  ;;  %2813 = vmax.xlane.f32.xlu1 %v2812_v46 }
 0xe99   :  { %v2793_v27 = vpop.xlane.xlu0 %2792 }
 0xe9a   :  { %v2815_v25 = vsub.f32 %v2760_v31, %v2793_v27 }
 0xe9c   :  { %v2823_v23 = vmul.f32 1.442695, %v2815_v25 }
 0xe9d   :  { %v2796_v52 = vpop.xlane.xlu1 %2795  ;;  %v2799_v61 = vpop.xlane.xlu0 %2798 }
 0xe9e   :  { %v2817_v37 = vsub.f32 %v4773_v3, %v2799_v61  ;;  %v2816_v41 = vsub.f32 %v2763_v22, %v2796_v52 }
 0xea0   :  { %v2827_v9 = vmul.f32 1.442695, %v2817_v37  ;;  %v2825_v6 = vmul.f32 1.442695, %v2816_v41 }
 0xea1   :  { %v2802_v47 = vpop.xlane.xlu0 %2801 }
 0xea2   :  { %v2818_v51 = vsub.f32 %v4774_v60, %v2802_v47  ;;  %5186 = vpow2.f32 %v2827_v9 }
 0xea3   :  { %5188 = vpow2.f32 %v2823_v23 }
 0xea4   :  { %v2829_v14 = vmul.f32 1.442695, %v2818_v51 }
 0xea5   :  { %v2805_v21 = vpop.xlane.xlu0 %2804  ;;  %v2808_v41 = vpop.xlane.xlu1 %2807 }
 0xea6   :  { %5190 = vpow2.f32 %v2829_v14  ;;  %v2819_v45 = vsub.f32 %v2776_v43, %v2805_v21  ;;  %v2820_v47 = vsub.f32 %v2779_v62, %v2808_v41  ;;  %v6612_v14 = vpop.f32.mrf.mxu0 }
 0xea7   :  { %5192 = vpow2.f32 %v2825_v6 }
 0xea8   :  { %v2831_v31 = vmul.f32 1.442695, %v2819_v45  ;;  %v2833_v6 = vmul.f32 1.442695, %v2820_v47  ;;  %v6616_v45 = vpop.f32.mrf.mxu0 }
 0xea9   :  { %v2811_v38 = vpop.xlane.xlu0 %2810  ;;  %v2814_v9 = vpop.xlane.xlu1 %2813  ;;  %v3166_v62 = vsel %vm563_vm2, %v6616_v45, -inf }
 0xeaa   :  { %v2821_v12 = vsub.f32 %v4777_v35, %v2811_v38  ;;  %v2822_v23 = vsub.f32 %v4778_v17, %v2814_v9 }
 0xeac   :  { %v2835_v19 = vmul.f32 1.442695, %v2821_v12  ;;  %v2837_v51 = vmul.f32 1.442695, %v2822_v23 }
 0xeae   :  { %5194 = vpow2.f32 %v2835_v19  ;;  %v6622_v19 = vpop.f32.mrf.mxu0 }
 0xeaf   :  { %v6582_v13 = vpop.eup %5186  ;;  %5196 = vpow2.f32 %v2831_v31 }
 0xeb0   :  { %v2845_v3 = vsel %vm563_vm2, %v6582_v13, 0.0  ;;  %v6586_v60 = vpop.eup %5188  ;;  %5198 = vpow2.f32 %v2837_v51  ;;  %v6628_v31 = vpop.f32.mrf.mxu0 }
 0xeb1   :  { %2846 = vadd.xlane.f32.xlu0 %v2845_v3  ;;  %v2839_v35 = vsel %vm563_vm2, %v6586_v60, 0.0  ;;  %5200 = vpow2.f32 %v2833_v6  ;;  %v3172_v3 = vsel %vm563_vm2, %v6612_v14, -inf  ;;  %v3169_v9 = vsel %vm563_vm2, %v6628_v31, -inf }
 0xeb3   :  { %v6588_v22 = vpop.eup %5190 }
 0xeb4   :  { %v2848_v46 = vsel %vm563_vm2, %v6588_v22, 0.0  ;;  %v6592_v43 = vpop.eup %5192 }
 0xeb5   :  { %2849 = vadd.xlane.f32.xlu1 %v2848_v46  ;;  %2840 = vadd.xlane.f32.xlu0 %v2839_v35  ;;  %v2842_v27 = vsel %vm563_vm2, %v6592_v43, 0.0  ;;  %v6632_v46 = vpop.f32.mrf.mxu0  ;;  %v3175_v35 = vsel %vm563_vm2, %v6622_v19, -inf }
 0xeb9   :  { %2843 = vadd.xlane.f32.xlu1 %v2842_v27  ;;  %v6636_v27 = vpop.f32.mrf.mxu0 }
 0xebb   :  { %v6598_v25 = vpop.eup %5194  ;;  %v6644_v41 = vpop.f32.mrf.mxu0 }
 0xebc   :  { %v2857_v52 = vsel %vm563_vm2, %v6598_v25, 0.0  ;;  %v6602_v61 = vpop.eup %5196  ;;  %v3187_v51 = vsel %vm563_vm2, %v6644_v41, -inf }
 0xebd   :  { %2858 = vadd.xlane.f32.xlu0 %v2857_v52  ;;  %v2851_v37 = vsel %vm563_vm2, %v6602_v61, 0.0  ;;  %v6614_v21 = vpop.eup %5198  ;;  %v3178_v52 = vsel %vm563_vm2, %v6636_v27, -inf  ;;  %v6648_v23 = vpop.f32.mrf.mxu0 }
 0xebe   :  { %v2860_v38 = vsel %vm563_vm2, %v6614_v21, 0.0  ;;  %v6620_v12 = vpop.eup %5200  ;;  %v3181_v47 = vsel %vm563_vm2, %v6648_v23, -inf }
 0xebf   :  { %v2854_v17 = vsel %vm563_vm2, %v6620_v12, 0.0 }
 0xec1   :  { %2852 = vadd.xlane.f32.xlu0 %v2851_v37  ;;  %v3184_v37 = vsel %vm563_vm2, %v6632_v46, -inf }
 0xeca   :  { %2887 = vrot.lane.b32.xlu1 %v6114_v11, %s5330_s12 }
 0xece   :  { %2885 = vrot.lane.b32.xlu1 %v5752_v15, %s5330_s12 }
 0xed7   :  { %2889 = vrot.lane.b32.xlu0 %v5765_v30, %s5330_s12 }
 0xef2   :  { %2861 = vadd.xlane.f32.xlu1 %v2860_v38 }
 0xef6   :  { %2855 = vadd.xlane.f32.xlu1 %v2854_v17  ;;  %3167 = vmax.xlane.f32.xlu0 %v3166_v62 }
 0xefa   :  { %3173 = vmax.xlane.f32.xlu0 %v3172_v3 }
 0xefe   :  { %3176 = vmax.xlane.f32.xlu0 %v3175_v35 }
 0xf02   :  { %3179 = vmax.xlane.f32.xlu0 %v3178_v52 }
 0xf06   :  { %3185 = vmax.xlane.f32.xlu0 %v3184_v37 }
 0xf07   :  { %2883 = vrot.lane.b32.xlu1 %v6018_v18, %s5330_s12 }
 0xf2b   :  { %3170 = vmax.xlane.f32.xlu1 %v3169_v9 }
 0xf2f   :  { %3182 = vmax.xlane.f32.xlu1 %v3181_v47 }
 0xf33   :  { %3188 = vmax.xlane.f32.xlu1 %v3187_v51 }
 0xf3a   :  { %v2847_v6 = vpop.xlane.xlu0 %2846 }
 0xf3e   :  { %v2850_v38 = vpop.xlane.xlu1 %2849  ;;  %v2841_v17 = vpop.xlane.xlu0 %2840 }
 0xf3f   :  { %5202 = vrcp.f32 %v2841_v17 }
 0xf42   :  { %v2844_v62 = vpop.xlane.xlu1 %2843 }
 0xf43   :  { %5204 = vrcp.f32 %v2844_v62 }
 0xf44   :  { %5206 = vrcp.f32 %v2850_v38  ;;  %v5317_v38 = vld [vmem:[%s7188_s4 + $0x8] sm:$0xf] }
 0xf45   :  { %5208 = vrcp.f32 %v2847_v6 }
 0xf46   :  { %v2859_v3 = vpop.xlane.xlu0 %2858  ;;  %v2888_v37 = vpop.permute.xlu1 %2887 }
 0xf4a   :  { %v2853_v35 = vpop.xlane.xlu0 %2852  ;;  %v2886_v57 = vpop.permute.xlu1 %2885 }
 0xf4c   :  { %v5203_v52 = vpop.eup %5202 }
 0xf4d   :  { %v2871_v47 = vmul.f32 %v5203_v52, %v6586_v60 }
 0xf4e   :  { %v2890_v58 = vpop.permute.xlu0 %2889 }
 0xf4f   :  { %4779 = vmatprep.subr.bf16.mxu1 %v2890_v58 }
 0xf50   :  { %v5205_v9 = vpop.eup %5204  ;;  %4780 = vmatpush3.bf16.msra.mxu1 %v2890_v58 }
 0xf51   :  { %v2872_v8 = vmul.f32 %v5205_v9, %v6592_v43  ;;  %4781 = vmatprep.subr.bf16.mxu1 %v2888_v37  ;;  %v5207_v62 = vpop.eup %5206 }
 0xf52   :  { %v5209_v52 = vpop.eup %5208  ;;  %v2874_v43 = vmul.f32 %v5207_v62, %v6588_v22 }
 0xf53   :  { %v2879_v51 = vpack.c.bf16 %v2872_v8, %v2871_v47  ;;  %v2873_v9 = vmul.f32 %v5209_v52, %v6582_v13 }
 0xf54   :  { %4782 = vmatpush3.bf16.msra.mxu1 %v2888_v37 }
 0xf55   :  { %4787 = vmatprep.mubr.msk.bf16.mxu1 %vm563_vm2, %v2879_v51  ;;  %4783 = vmatprep.subr.bf16.mxu1 %v2886_v57  ;;  %v2880_v6 = vpack.c.bf16 %v2874_v43, %v2873_v9 }
 0xf58   :  { %4784 = vmatpush3.bf16.msra.mxu1 %v2886_v57 }
 0xf7b   :  { %v2862_v17 = vpop.xlane.xlu1 %2861 }
 0xf7c   :  { %5210 = vrcp.f32 %v2862_v17 }
 0xf7d   :  { %5212 = vrcp.f32 %v2853_v35 }
 0xf7e   :  { %5214 = vrcp.f32 %v2859_v3 }
 0xf7f   :  { %v2856_v58 = vpop.xlane.xlu1 %2855  ;;  %v3168_v60 = vpop.xlane.xlu0 %3167 }
 0xf80   :  { %5216 = vrcp.f32 %v2856_v58  ;;  %v3190_v8 = vsub.f32 %v6616_v45, %v3168_v60 }
 0xf82   :  { %v3198_v3 = vmul.f32 1.442695, %v3190_v8 }
 0xf83   :  { %v2884_v37 = vpop.permute.xlu1 %2883  ;;  %v3174_v47 = vpop.xlane.xlu0 %3173 }
 0xf84   :  { %4785 = vmatprep.subr.bf16.mxu1 %v2884_v37  ;;  %v3192_v57 = vsub.f32 %v6612_v14, %v3174_v47 }
 0xf85   :  { %4786 = vmatpush3.bf16.msra.mxu1 %v2884_v37 }
 0xf86   :  { %4933 = vmatprep.subr.msk.bf16.mxu1 %vm1051_vm3, %v5317_v38  ;;  %v3202_v35 = vmul.f32 1.442695, %v3192_v57 }
 0xf87   :  { %v3177_v22 = vpop.xlane.xlu0 %3176 }
 0xf88   :  { %4788 = vmatmul.mubr.msk.bf16.vlgmr.msra.gmra.mxu1 %vm563_vm2, %v2880_v6  ;;  %5218 = vpow2.f32 %v3202_v35  ;;  %v3193_v13 = vsub.f32 %v6622_v19, %v3177_v22 }
 0xf89   :  { %4796 = vmatpush3.bf16.msra.mxu1 %v6191_v42  ;;  %v5211_v45 = vpop.eup %5210  ;;  %5220 = vpow2.f32 %v3198_v3 }
 0xf8a   :  { %v5213_v14 = vpop.eup %5212  ;;  %v3204_v51 = vmul.f32 1.442695, %v3193_v13  ;;  %v2878_v60 = vmul.f32 %v5211_v45, %v6614_v21 }
 0xf8b   :  { %v5215_v17 = vpop.eup %5214  ;;  %v3180_v62 = vpop.xlane.xlu0 %3179  ;;  %v2875_v52 = vmul.f32 %v5213_v14, %v6602_v61 }
 0xf8c   :  { %5222 = vpow2.f32 %v3204_v51  ;;  %v3194_v8 = vsub.f32 %v6636_v27, %v3180_v62  ;;  %v2877_v19 = vmul.f32 %v5215_v17, %v6598_v25  ;;  %v3438_v62 = vsub.s32 2, %v5511_v26 }
 0xf8d   :  { %v5217_v58 = vpop.eup %5216 }
 0xf8e   :  { %v2876_v43 = vmul.f32 %v5217_v58, %v6620_v12  ;;  %v2882_v47 = vpack.c.bf16 %v2878_v60, %v2877_v19  ;;  %v3206_v57 = vmul.f32 1.442695, %v3194_v8  ;;  %v6707_v58 = vld [vmem:[%s7186_s1] sm:$0x3f] }
 0xf8f   :  { %v3186_v37 = vpop.xlane.xlu0 %3185 }
 0xf90   :  { %v2881_v42 = vpack.c.bf16 %v2876_v43, %v2875_v52  ;;  %v3196_v9 = vsub.f32 %v6632_v46, %v3186_v37 }
 0xf92   :  { %4791 = vmatprep.mubr.msk.bf16.mxu1 %vm563_vm2, %v2881_v42  ;;  %v3210_v6 = vmul.f32 1.442695, %v3196_v9 }
 0xf93   :  { %4792 = vmatmul.mubr.msk.bf16.gmra.mxu1 %vm563_vm2, %v2882_v47 }
 0xf94   :  { %5224 = vpow2.f32 %v3210_v6 }
 0xf95   :  { %v6676_v21 = vpop.eup %5218  ;;  %5226 = vpow2.f32 %v3206_v57 }
 0xf96   :  { %v3220_v61 = vsel %vm563_vm2, %v6676_v21, 0.0  ;;  %v6680_v12 = vpop.eup %5220 }
 0xf97   :  { %3221 = vadd.xlane.f32.xlu0 %v3220_v61  ;;  %v3214_v46 = vsel %vm563_vm2, %v6680_v12, 0.0 }
 0xf99   :  { %v6682_v25 = vpop.eup %5222 }
 0xf9a   :  { %v3223_v27 = vsel %vm563_vm2, %v6682_v25, 0.0 }
 0xf9b   :  { %3215 = vadd.xlane.f32.xlu0 %v3214_v46  ;;  %3224 = vadd.xlane.f32.xlu1 %v3223_v27  ;;  %v6763_v46 = vpop.f32.mrf.mxu1 }
 0xfa1   :  { %v6688_v38 = vpop.eup %5224 }
 0xfa2   :  { %v3232_v3 = vsel %vm563_vm2, %v6688_v38, 0.0  ;;  %v6692_v35 = vpop.eup %5226 }
 0xfa3   :  { %3233 = vadd.xlane.f32.xlu0 %v3232_v3  ;;  %v3226_v22 = vsel %vm563_vm2, %v6692_v35, 0.0  ;;  %v6765_v3 = vpop.f32.mrf.mxu1 }
 0xfa7   :  { %3227 = vadd.xlane.f32.xlu0 %v3226_v22 }
 0xfb4   :  { %v3171_v13 = vpop.xlane.xlu1 %3170 }
 0xfb5   :  { %v3191_v45 = vsub.f32 %v6628_v31, %v3171_v13  ;;  %v6710_v31 = vrot.slane %v6707_v58, %v3438_v62 }
 0xfb7   :  { %v3200_v14 = vmul.f32 1.442695, %v3191_v45  ;;  %v3440_v60 = vadd.f32 %v6710_v31, %v6413_v0  ;;  %v3443_v8 = vadd.f32 %v6710_v31, %v6416_v7  ;;  %v3446_v0 = vadd.f32 %v6710_v31, %v6422_v24  ;;  %v6769_v45 = vpop.f32.mrf.mxu1 }
 0xfb8   :  { %v3441_v22 = vadd.f32 %v6710_v31, %v6419_v56 }
 0xfb9   :  { %5228 = vpow2.f32 %v3200_v14  ;;  %v6717_v52 = vadd.f32 %v3440_v60, %v5542_v28  ;;  %v6731_v28 = vadd.f32 %v3443_v8, %v5573_v36  ;;  %v6745_v36 = vadd.f32 %v3446_v0, %v5610_v49  ;;  %v6776_v62 = vpop.f32.mrf.mxu1 }
 0xfba   :  { %v6772_v14 = vadd.f32 %v3441_v22, %v5548_v16  ;;  %v3447_v60 = vadd.f32 %v6710_v31, %v6428_v34 }
 0xfbb   :  { %v3472_v19 = vsel %vm47_vm0, %v6717_v52, 0.0  ;;  %v6785_v8 = vpop.f32.mrf.mxu1 }
 0xfbc   :  { %v3475_v56 = vsel %vm47_vm0, %v6772_v14, 0.0  ;;  %v6788_v16 = vadd.f32 %v3447_v60, %v5613_v4 }
 0xfbd   :  { %3264 = vrot.lane.b32.xlu0 %v5765_v30, %s5331_s16  ;;  %v3442_v30 = vadd.f32 %v6710_v31, %v6410_v39  ;;  %v3183_v39 = vpop.xlane.xlu1 %3182 }
 0xfbe   :  { %v3195_v9 = vsub.f32 %v6648_v23, %v3183_v39  ;;  %v3493_v34 = vsel %vm47_vm0, %v6788_v16, 0.0 }
 0xfbf   :  { %v6722_v43 = vadd.f32 %v3442_v30, %v5566_v63 }
 0xfc0   :  { %v3208_v47 = vmul.f32 1.442695, %v3195_v9 }
 0xfc1   :  { %v3478_v63 = vsel %vm47_vm0, %v6722_v43, 0.0  ;;  %v3189_v37 = vpop.xlane.xlu1 %3188 }
 0xfc6   :  { %v6699_v51 = vpop.eup %5228 }
 0xfc7   :  { %v3217_v17 = vsel %vm563_vm2, %v6699_v51, 0.0 }
 0xfc8   :  { %3218 = vadd.xlane.f32.xlu1 %v3217_v17  ;;  %v3445_v17 = vadd.f32 %v6710_v31, %v6431_v59 }
 0xfca   :  { %v6781_v30 = vadd.f32 %v3445_v17, %v5595_v53 }
 0xfcc   :  { %v3487_v59 = vsel %vm47_vm0, %v6781_v30, 0.0 }
 0xfd9   :  { %3262 = vrot.lane.b32.xlu1 %v6114_v11, %s5331_s16  ;;  %v3444_v11 = vadd.f32 %v6710_v31, %v6425_v32  ;;  %v3197_v32 = vsub.f32 %v6644_v41, %v3189_v37 }
 0xfdb   :  { %v6740_v7 = vadd.f32 %v3444_v11, %v5592_v48  ;;  %v3212_v24 = vmul.f32 1.442695, %v3197_v32  ;;  %v3490_v48 = vsel %vm47_vm0, %v6745_v36, 0.0 }
 0xfdc   :  { %3473 = vadd.xlane.f32.xlu0 %v3472_v19  ;;  %v6792_v19 = vpop.f32.mrf.mxu1 }
 0xfdd   :  { %3260 = vrot.lane.b32.xlu1 %v5752_v15, %s5331_s16  ;;  %v3481_v15 = vsel %vm47_vm0, %v6731_v28, 0.0  ;;  %v3484_v42 = vsel %vm47_vm0, %v6740_v7, 0.0  ;;  %5230 = vpow2.f32 %v3212_v24 }
 0xfde   :  { %5232 = vpow2.f32 %v3208_v47  ;;  %v6796_v53 = vpop.f32.mrf.mxu1 }
 0xfe0   :  { %3479 = vadd.xlane.f32.xlu0 %v3478_v63  ;;  %v6798_v39 = vpop.f32.mrf.mxu1 }
 0xfe4   :  { %3482 = vadd.xlane.f32.xlu0 %v3481_v15 }
 0xfe8   :  { %3485 = vadd.xlane.f32.xlu0 %v3484_v42 }
 0xfea   :  { %v6753_v57 = vpop.eup %5230 }
 0xfeb   :  { %v3235_v49 = vsel %vm563_vm2, %v6753_v57, 0.0  ;;  %v6757_v41 = vpop.eup %5232 }
 0xfec   :  { %3491 = vadd.xlane.f32.xlu0 %v3490_v48  ;;  %v3229_v6 = vsel %vm563_vm2, %v6757_v41, 0.0 }
0x1001   :  { %3236 = vadd.xlane.f32.xlu1 %v3235_v49 }
0x1005   :  { %3230 = vadd.xlane.f32.xlu1 %v3229_v6 }
0x1016   :  { %3258 = vrot.lane.b32.xlu1 %v6018_v18, %s5331_s16 }
0x1020   :  { %v3222_v23 = vpop.xlane.xlu0 %3221 }
0x1024   :  { %v3216_v61 = vpop.xlane.xlu0 %3215  ;;  %v3225_v15 = vpop.xlane.xlu1 %3224 }
0x1025   :  { %5234 = vrcp.f32 %v3216_v61 }
0x102c   :  { %v3234_v27 = vpop.xlane.xlu0 %3233 }
0x1030   :  { %v3228_v13 = vpop.xlane.xlu0 %3227 }
0x1032   :  { %v5235_v61 = vpop.eup %5234 }
0x1034   :  { %v3265_v18 = vpop.permute.xlu0 %3264 }
0x1035   :  { %4821 = vmatprep.subr.bf16.mxu1 %v3265_v18 }
0x103a   :  { %3476 = vadd.xlane.f32.xlu1 %v3475_v56 }
0x103e   :  { %3488 = vadd.xlane.f32.xlu1 %v3487_v59 }
0x1042   :  { %3494 = vadd.xlane.f32.xlu1 %v3493_v34 }
0x1048   :  { %v4789_v11 = vpop.f32.mrf.mxu1 }
0x104a   :  { %v2941_v63 = vpop.f32.mrf.mxu1 }
0x104c   :  { %v4790_v0 = vpop.f32.mrf.mxu1 }
0x104d   :  { %v2973_v32 = vpack.c.bf16 %v4790_v0, %v4789_v11 }
0x104e   :  { %v2944_v4 = vpop.f32.mrf.mxu1 }
0x104f   :  { %v2972_v37 = vpack.c.bf16 %v2944_v4, %v2941_v63 }
0x1051   :  { %4797 = vmatprep.mubr.msk.bf16.mxu1 %vm473_vm1, %v2972_v37  ;;  %v3219_v42 = vpop.xlane.xlu1 %3218 }
0x1052   :  { %5236 = vrcp.f32 %v3219_v42  ;;  %4798 = vmatmul.mubr.msk.bf16.vlgmr.msra.gmra.mxu1 %vm473_vm1, %v2973_v32 }
0x1053   :  { %4822 = vmatpush3.bf16.msra.mxu1 %v3265_v18  ;;  %v4793_v9 = vpop.f32.mrf.mxu1  ;;  %v3246_v18 = vmul.f32 %v5235_v61, %v6680_v12  ;;  %5238 = vrcp.f32 %v3225_v15 }
0x1054   :  { %5240 = vrcp.f32 %v3222_v23  ;;  %v5319_v23 = vld [vmem:[%s7188_s4 + $0xc] sm:$0xf] }
0x1055   :  { %v2957_v24 = vpop.f32.mrf.mxu1  ;;  %v3263_v48 = vpop.permute.xlu1 %3262 }
0x1056   :  { %4823 = vmatprep.subr.bf16.mxu1 %v3263_v48 }
0x1057   :  { %v4794_v47 = vpop.f32.mrf.mxu1  ;;  %4824 = vmatpush3.bf16.msra.mxu1 %v3263_v48 }
0x1058   :  { %v2975_v17 = vpack.c.bf16 %v4794_v47, %v4793_v9 }
0x1059   :  { %v2960_v49 = vpop.f32.mrf.mxu1  ;;  %v3261_v6 = vpop.permute.xlu1 %3260 }
0x105a   :  { %v2974_v22 = vpack.c.bf16 %v2960_v49, %v2957_v24  ;;  %4825 = vmatprep.subr.bf16.mxu1 %v3261_v6  ;;  %v2656_v49 = vadd.f32 %v6765_v3, %v6560_v54  ;;  %v2672_v54 = vadd.f32 %v6792_v19, %v6568_v29 }
0x105b   :  { %4826 = vmatpush3.bf16.msra.mxu1 %v3261_v6 }
0x105c   :  { %4801 = vmatprep.mubr.msk.bf16.mxu1 %vm473_vm1, %v2974_v22  ;;  %v2659_v22 = vadd.f32 %v6776_v62, %v6564_v1  ;;  %v2675_v1 = vadd.f32 %v6798_v39, %v6572_v10 }
0x105d   :  { %4802 = vmatmul.mubr.msk.bf16.gmra.mxu1 %vm473_vm1, %v2975_v17 }
0x105f   :  { %v5237_v60 = vpop.eup %5236 }
0x1060   :  { %v3247_v56 = vmul.f32 %v5237_v60, %v6699_v51  ;;  %v5239_v11 = vpop.eup %5238 }
0x1061   :  { %v5241_v0 = vpop.eup %5240  ;;  %v3249_v4 = vmul.f32 %v5239_v11, %v6682_v25 }
0x1062   :  { %v3254_v59 = vpack.c.bf16 %v3247_v56, %v3246_v18  ;;  %v3248_v12 = vmul.f32 %v5241_v0, %v6676_v21 }
0x1064   :  { %4829 = vmatprep.mubr.msk.bf16.mxu1 %vm563_vm2, %v3254_v59  ;;  %v3255_v51 = vpack.c.bf16 %v3249_v4, %v3248_v12 }
0x1065   :  { %v3474_v39 = vpop.xlane.xlu0 %3473 }
0x108a   :  { %v3237_v34 = vpop.xlane.xlu1 %3236 }
0x108b   :  { %5242 = vrcp.f32 %v3237_v34 }
0x108c   :  { %5244 = vrcp.f32 %v3228_v13 }
0x108d   :  { %5246 = vrcp.f32 %v3234_v27 }
0x108e   :  { %v3231_v63 = vpop.xlane.xlu1 %3230 }
0x108f   :  { %5248 = vrcp.f32 %v3231_v63 }
0x1092   :  { %v3259_v37 = vpop.permute.xlu1 %3258 }
0x1093   :  { %4827 = vmatprep.subr.bf16.mxu1 %v3259_v37 }
0x1094   :  { %4828 = vmatpush3.bf16.msra.mxu1 %v3259_v37 }
0x1095   :  { %4938 = vmatprep.subr.msk.bf16.mxu1 %vm1051_vm3, %v5319_v23 }
0x1097   :  { %4830 = vmatmul.mubr.msk.bf16.vlgmr.msra.gmra.mxu1 %vm563_vm2, %v3255_v51 }
0x1098   :  { %4838 = vmatpush3.bf16.msra.mxu1 %v6281_v33  ;;  %v5243_v27 = vpop.eup %5242  ;;  %v2664_v33 = vadd.f32 %v6763_v46, %v6558_v40  ;;  %v2680_v40 = vadd.f32 %v6785_v8, %v6566_v44 }
0x1099   :  { %v5245_v13 = vpop.eup %5244  ;;  %v3253_v32 = vmul.f32 %v5243_v27, %v6753_v57 }
0x109a   :  { %v5247_v15 = vpop.eup %5246  ;;  %v3250_v21 = vmul.f32 %v5245_v13, %v6692_v35  ;;  %v2667_v35 = vadd.f32 %v6769_v45, %v6562_v5  ;;  %v2683_v5 = vadd.f32 %v6796_v53, %v6570_v20 }
0x109b   :  { %v3252_v9 = vmul.f32 %v5247_v15, %v6688_v38 }
0x109c   :  { %v5249_v25 = vpop.eup %5248 }
0x109d   :  { %v3251_v42 = vmul.f32 %v5249_v25, %v6757_v41  ;;  %v3257_v48 = vpack.c.bf16 %v3253_v32, %v3252_v9 }
0x109f   :  { %v3256_v24 = vpack.c.bf16 %v3251_v42, %v3250_v21  ;;  %v3480_v42 = vpop.xlane.xlu0 %3479 }
0x10a1   :  { %4833 = vmatprep.mubr.msk.bf16.mxu1 %vm563_vm2, %v3256_v24 }
0x10a2   :  { %4834 = vmatmul.mubr.msk.bf16.gmra.mxu1 %vm563_vm2, %v3257_v48 }
0x1112   :  { %v4799_v47 = vpop.f32.mrf.mxu1 }
0x1113   :  { %v3055_v57 = vadd.f32 %v4799_v47, %v2664_v33 }
0x1114   :  { %v3022_v6 = vpop.f32.mrf.mxu1 }
0x1115   :  { %v3053_v41 = vadd.f32 %v3022_v6, %v2656_v49 }
0x1116   :  { %v4800_v38 = vpop.f32.mrf.mxu1 }
0x1117   :  { %v3056_v17 = vadd.f32 %v4800_v38, %v2667_v35 }
0x1118   :  { %v3025_v61 = vpop.f32.mrf.mxu1 }
0x1119   :  { %v3054_v60 = vadd.f32 %v3025_v61, %v2659_v22 }
0x111d   :  { %v4803_v46 = vpop.f32.mrf.mxu1 }
0x111e   :  { %v3059_v3 = vadd.f32 %v4803_v46, %v2680_v40 }
0x111f   :  { %v3038_v18 = vpop.f32.mrf.mxu1 }
0x1120   :  { %v3057_v45 = vadd.f32 %v3038_v18, %v2672_v54 }
0x1121   :  { %v4804_v56 = vpop.f32.mrf.mxu1 }
0x1122   :  { %v3060_v62 = vadd.f32 %v4804_v56, %v2683_v5  ;;  %v7204_v56 = vld [vmem:[#allocation3_spill] sm:$0xff] }
0x1123   :  { %v3041_v59 = vpop.f32.mrf.mxu1 }
0x1124   :  { %v3058_v34 = vadd.f32 %v3041_v59, %v2675_v1 }
0x1157   :  { %v4831_v11 = vpop.f32.mrf.mxu1 }
0x1159   :  { %v3316_v63 = vpop.f32.mrf.mxu1 }
0x115b   :  { %v4832_v44 = vpop.f32.mrf.mxu1 }
0x115c   :  { %v3348_v4 = vpack.c.bf16 %v4832_v44, %v4831_v11  ;;  %v3522_v11 = vmul.f32 0.03125, %v3480_v42 }
0x115d   :  { %v3319_v8 = vpop.f32.mrf.mxu1 }
0x115e   :  { %v3347_v0 = vpack.c.bf16 %v3319_v8, %v3316_v63  ;;  %v7205_v8 = vld [vmem:[#allocation5_spill] sm:$0xff] }
0x1160   :  { %4839 = vmatprep.mubr.msk.bf16.mxu1 %vm473_vm1, %v3347_v0 }
0x1161   :  { %4840 = vmatmul.mubr.msk.bf16.vlgmr.msra.gmra.mxu1 %vm473_vm1, %v3348_v4 }
0x1162   :  { %v4835_v29 = vpop.f32.mrf.mxu1 }
0x1164   :  { %v3332_v20 = vpop.f32.mrf.mxu1 }
0x1166   :  { %v4836_v19 = vpop.f32.mrf.mxu1 }
0x1167   :  { %v3350_v12 = vpack.c.bf16 %v4836_v19, %v4835_v29  ;;  %v6884_v19 = vsub.f32 %v6722_v43, %v3522_v11 }
0x1168   :  { %v3335_v53 = vpop.f32.mrf.mxu1 }
0x1169   :  { %v3349_v37 = vpack.c.bf16 %v3335_v53, %v3332_v20  ;;  %v7206_v20 = vld [vmem:[#allocation4_spill] sm:$0xff] }
0x116b   :  { %4843 = vmatprep.mubr.msk.bf16.mxu1 %vm473_vm1, %v3349_v37 }
0x116c   :  { %4844 = vmatmul.mubr.msk.bf16.gmra.mxu1 %vm473_vm1, %v3350_v12 }
0x1221   :  { %v4841_v10 = vpop.f32.mrf.mxu1 }
0x1222   :  { %v3430_v51 = vadd.f32 %v4841_v10, %v3055_v57 }
0x1223   :  { %v3397_v23 = vpop.f32.mrf.mxu1 }
0x1224   :  { %v3428_v27 = vadd.f32 %v3397_v23, %v3053_v41  ;;  %v3450_v15 = vadd.f32 %v6710_v31, %v3430_v51  ;;  %v3483_v41 = vpop.xlane.xlu0 %3482 }
0x1225   :  { %v4842_v13 = vpop.f32.mrf.mxu1  ;;  %v3523_v53 = vmul.f32 0.03125, %v3483_v41 }
0x1226   :  { %v3448_v25 = vadd.f32 %v6710_v31, %v3428_v27  ;;  %v3431_v32 = vadd.f32 %v4842_v13, %v3056_v17  ;;  %v6847_v48 = vadd.f32 %v3450_v15, %v5639_v55 }
0x1227   :  { %v3400_v21 = vpop.f32.mrf.mxu1  ;;  %v6899_v15 = vsub.f32 %v6731_v28, %v3523_v53 }
0x1228   :  { %v6844_v9 = vadd.f32 %v3448_v25, %v5628_v50  ;;  %v3429_v24 = vadd.f32 %v3400_v21, %v3054_v60  ;;  %v3451_v33 = vadd.f32 %v6710_v31, %v3431_v32  ;;  %v7203_v50 = vld [vmem:[#allocation2_spill] sm:$0xff]  ;;  %v3502_v55 = vsel %vm47_vm0, %v6847_v48, 0.0  ;;  %v3486_v63 = vpop.xlane.xlu0 %3485 }
0x1229   :  { %v3520_v60 = vmul.f32 0.03125, %v3474_v39  ;;  %v3524_v37 = vmul.f32 0.03125, %v3486_v63  ;;  %v3554_v21 = vmul.f32 %v6884_v19, %v6884_v19 }
0x122a   :  { %v3449_v47 = vadd.f32 %v6710_v31, %v3429_v24  ;;  %v3496_v49 = vsel %vm47_vm0, %v6844_v9, 0.0  ;;  %v6857_v38 = vadd.f32 %v3451_v33, %v7203_v50 }
0x122b   :  { %3497 = vadd.xlane.f32.xlu0 %v3496_v49  ;;  %v6902_v25 = vsub.f32 %v6740_v7, %v3524_v37 }
0x122c   :  { %v6854_v57 = vadd.f32 %v3449_v47, %v5632_v2  ;;  %v4845_v6 = vpop.f32.mrf.mxu1  ;;  %v3477_v2 = vpop.xlane.xlu1 %3476  ;;  %v3505_v5 = vsel %vm47_vm0, %v6857_v38, 0.0 }
0x122d   :  { %v3434_v35 = vadd.f32 %v4845_v6, %v3059_v3  ;;  %v3521_v44 = vmul.f32 0.03125, %v3477_v2  ;;  %v3492_v13 = vpop.xlane.xlu0 %3491  ;;  %v3574_v6 = vsel %vm47_vm0, %v3554_v21, 0.0  ;;  %v3556_v41 = vmul.f32 %v6902_v25, %v6902_v25 }
0x122e   :  { %v3413_v22 = vpop.f32.mrf.mxu1  ;;  %v3499_v17 = vsel %vm47_vm0, %v6854_v57, 0.0  ;;  %v3526_v42 = vmul.f32 0.03125, %v3492_v13 }
0x122f   :  { %v3432_v61 = vadd.f32 %v3413_v22, %v3057_v45  ;;  %3503 = vadd.xlane.f32.xlu0 %v3502_v55  ;;  %3500 = vadd.xlane.f32.xlu1 %v3499_v17  ;;  %v3454_v46 = vadd.f32 %v6710_v31, %v3434_v35  ;;  %v6871_v45 = vsub.f32 %v6717_v52, %v3520_v60 }
0x1230   :  { %v4846_v40 = vpop.f32.mrf.mxu1  ;;  %v3489_v12 = vpop.xlane.xlu1 %3488  ;;  %v6889_v39 = vsub.f32 %v6772_v14, %v3521_v44  ;;  %v3555_v35 = vmul.f32 %v6899_v15, %v6899_v15  ;;  %v6917_v50 = vsub.f32 %v6745_v36, %v3526_v42 }
0x1231   :  { %v3452_v54 = vadd.f32 %v6710_v31, %v3432_v61  ;;  %v3435_v3 = vadd.f32 %v4846_v40, %v3060_v62  ;;  %v6874_v0 = vadd.f32 %v3454_v46, %v7205_v8  ;;  %v3552_v10 = vmul.f32 %v6871_v45, %v6871_v45 }
0x1232   :  { %v3416_v18 = vpop.f32.mrf.mxu1  ;;  %v3525_v24 = vmul.f32 0.03125, %v3489_v12  ;;  %v3553_v47 = vmul.f32 %v6889_v39, %v6889_v39  ;;  %v3577_v61 = vsel %vm47_vm0, %v3555_v35, 0.0  ;;  %v3580_v40 = vsel %vm47_vm0, %v3556_v41, 0.0 }
0x1233   :  { %v6868_v1 = vadd.f32 %v3452_v54, %v7204_v56  ;;  %v3433_v59 = vadd.f32 %v3416_v18, %v3058_v34  ;;  %3506 = vadd.xlane.f32.xlu1 %v3505_v5  ;;  %v3455_v62 = vadd.f32 %v6710_v31, %v3435_v3  ;;  %v3514_v23 = vsel %vm47_vm0, %v6874_v0, 0.0  ;;  %v4952_v56 = vld [vmem:[%s7189_s5 + $0x8] sm:$0xff]  }
0x1234   :  { %v3568_v32 = vsel %vm47_vm0, %v3552_v10, 0.0  ;;  %v3495_v49 = vpop.xlane.xlu1 %3494  ;;  %v6920_v22 = vsub.f32 %v6781_v30, %v3525_v24  ;;  %v3571_v17 = vsel %vm47_vm0, %v3553_v47, 0.0  ;;  %v3558_v46 = vmul.f32 %v6917_v50, %v6917_v50  ;;  %4847 = vmatprep.subr.bf16.mxu0 %v4952_v56 }
0x1235   :  { %v3453_v4 = vadd.f32 %v6710_v31, %v3433_v59  ;;  %v3508_v29 = vsel %vm47_vm0, %v6868_v1, 0.0  ;;  %v7207_v31 = vld [vmem:[#allocation6_spill] sm:$0xff]  ;;  %v3527_v55 = vmul.f32 0.03125, %v3495_v49  ;;  %4848 = vmatpush3.bf16.msra.mxu0 %v4952_v56 }
0x1236   :  { %3509 = vadd.xlane.f32.xlu0 %v3508_v29  ;;  %v6892_v51 = vadd.f32 %v3455_v62, %v7207_v31  ;;  %v3557_v2 = vmul.f32 %v6920_v22, %v6920_v22  ;;  %v3586_v3 = vsel %vm47_vm0, %v3558_v46, 0.0  ;;  %v4953_v59 = vld [vmem:[%s7189_s5] sm:$0xff]  }
0x1237   :  { %v6881_v34 = vadd.f32 %v3453_v4, %v7206_v20  ;;  %v6925_v60 = vsub.f32 %v6788_v16, %v3527_v55  ;;  %4849 = vmatprep.subr.bf16.mxu0 %v4953_v59 }
0x1238   :  { %v3517_v33 = vsel %vm47_vm0, %v6892_v51, 0.0  ;;  %v3583_v54 = vsel %vm47_vm0, %v3557_v2, 0.0 }
0x1239   :  { %v3511_v27 = vsel %vm47_vm0, %v6881_v34, 0.0  ;;  %v3559_v18 = vmul.f32 %v6925_v60, %v6925_v60  ;;  %4850 = vmatpush3.bf16.msra.mxu0 %v4953_v59 }
0x123a   :  { %3515 = vadd.xlane.f32.xlu0 %v3514_v23  ;;  %3512 = vadd.xlane.f32.xlu1 %v3511_v27 }
0x123b   :  { %v3589_v5 = vsel %vm47_vm0, %v3559_v18, 0.0 }
0x123e   :  { %3518 = vadd.xlane.f32.xlu1 %v3517_v33  ;;  %3569 = vadd.xlane.f32.xlu0 %v3568_v32 }
0x1242   :  { %3572 = vadd.xlane.f32.xlu1 %v3571_v17  ;;  %3575 = vadd.xlane.f32.xlu0 %v3574_v6 }
0x1246   :  { %3578 = vadd.xlane.f32.xlu1 %v3577_v61  ;;  %3581 = vadd.xlane.f32.xlu0 %v3580_v40 }
0x124a   :  { %3584 = vadd.xlane.f32.xlu1 %v3583_v54  ;;  %3587 = vadd.xlane.f32.xlu0 %v3586_v3 }
0x124e   :  { %3590 = vadd.xlane.f32.xlu1 %v3589_v5 }
0x12b4   :  { %v3498_v11 = vpop.xlane.xlu0 %3497 }
0x12b5   :  { %v3528_v63 = vmul.f32 0.03125, %v3498_v11 }
0x12b7   :  { %v6944_v44 = vsub.f32 %v6844_v9, %v3528_v63 }
0x12b8   :  { %v3501_v8 = vpop.xlane.xlu1 %3500  ;;  %v3504_v62 = vpop.xlane.xlu0 %3503 }
0x12b9   :  { %v3529_v4 = vmul.f32 0.03125, %v3501_v8  ;;  %v3530_v29 = vmul.f32 0.03125, %v3504_v62  ;;  %v3560_v20 = vmul.f32 %v6944_v44, %v6944_v44 }
0x12bb   :  { %v6949_v53 = vsub.f32 %v6854_v57, %v3529_v4  ;;  %v6952_v37 = vsub.f32 %v6847_v48, %v3530_v29  ;;  %v3592_v12 = vsel %vm47_vm0, %v3560_v20, 0.0 }
0x12bc   :  { %v3507_v10 = vpop.xlane.xlu1 %3506  ;;  %3593 = vadd.xlane.f32.xlu0 %v3592_v12 }
0x12bd   :  { %v3531_v31 = vmul.f32 0.03125, %v3507_v10  ;;  %v3561_v23 = vmul.f32 %v6949_v53, %v6949_v53  ;;  %v3562_v27 = vmul.f32 %v6952_v37, %v6952_v37 }
0x12bf   :  { %v6960_v13 = vsub.f32 %v6857_v38, %v3531_v31  ;;  %v3510_v32 = vpop.xlane.xlu0 %3509  ;;  %v3595_v21 = vsel %vm47_vm0, %v3561_v23, 0.0  ;;  %v3598_v42 = vsel %vm47_vm0, %v3562_v27, 0.0 }
0x12c0   :  { %v3532_v24 = vmul.f32 0.03125, %v3510_v32  ;;  %3596 = vadd.xlane.f32.xlu1 %v3595_v21  ;;  %3599 = vadd.xlane.f32.xlu0 %v3598_v42 }
0x12c1   :  { %v3563_v33 = vmul.f32 %v6960_v13, %v6960_v13 }
0x12c2   :  { %v6967_v47 = vsub.f32 %v6868_v1, %v3532_v24 }
0x12c3   :  { %v3513_v49 = vpop.xlane.xlu1 %3512  ;;  %v3516_v6 = vpop.xlane.xlu0 %3515  ;;  %v3601_v35 = vsel %vm47_vm0, %v3563_v33, 0.0 }
0x12c4   :  { %v3533_v41 = vmul.f32 0.03125, %v3513_v49  ;;  %v3534_v55 = vmul.f32 0.03125, %v3516_v6  ;;  %3602 = vadd.xlane.f32.xlu1 %v3601_v35  ;;  %v3564_v17 = vmul.f32 %v6967_v47, %v6967_v47 }
0x12c6   :  { %v6973_v61 = vsub.f32 %v6881_v34, %v3533_v41  ;;  %v6976_v40 = vsub.f32 %v6874_v0, %v3534_v55  ;;  %v3604_v2 = vsel %vm47_vm0, %v3564_v17, 0.0  ;;  %v3682_v55 = vsub.s32 3, %v5511_v26 }
0x12c7   :  { %v3519_v46 = vpop.xlane.xlu1 %3518  ;;  %3605 = vadd.xlane.f32.xlu0 %v3604_v2  ;;  %v3570_v54 = vpop.xlane.xlu0 %3569 }
0x12c8   :  { %v3535_v3 = vmul.f32 0.03125, %v3519_v46  ;;  %v3616_v18 = vmul.f32 0.03125, %v3570_v54  ;;  %v3565_v5 = vmul.f32 %v6973_v61, %v6973_v61  ;;  %v3566_v56 = vmul.f32 %v6976_v40, %v6976_v40 }
0x12ca   :  { %v6984_v59 = vsub.f32 %v6892_v51, %v3535_v3  ;;  %v3632_v11 = vadd.f32 1e-05, %v3616_v18  ;;  %v3607_v63 = vsel %vm47_vm0, %v3565_v5, 0.0  ;;  %v3610_v8 = vsel %vm47_vm0, %v3566_v56, 0.0 }
0x12cb   :  { %v3573_v62 = vpop.xlane.xlu1 %3572  ;;  %3608 = vadd.xlane.f32.xlu1 %v3607_v63  ;;  %3611 = vadd.xlane.f32.xlu0 %v3610_v8  ;;  %v3576_v4 = vpop.xlane.xlu0 %3575  ;;  %v6993_v18 = vrot.slane %v6707_v58, %v3682_v55 }
0x12cc   :  { %5250 = vrsqrt.f32 %v3632_v11  ;;  %v3617_v29 = vmul.f32 0.03125, %v3573_v62  ;;  %v3618_v20 = vmul.f32 0.03125, %v3576_v4  ;;  %v3567_v12 = vmul.f32 %v6984_v59, %v6984_v59 }
0x12cd   :  { %v3702_v11 = vsub.s32 4, %v5511_v26 }
0x12ce   :  { %v3633_v10 = vadd.f32 1e-05, %v3617_v29  ;;  %v3634_v31 = vadd.f32 1e-05, %v3618_v20  ;;  %v3613_v23 = vsel %vm47_vm0, %v3567_v12, 0.0 }
0x12cf   :  { %3614 = vadd.xlane.f32.xlu1 %v3613_v23  ;;  %v3579_v27 = vpop.xlane.xlu1 %3578  ;;  %v3582_v32 = vpop.xlane.xlu0 %3581  ;;  %v7000_v29 = vrot.slane %v6707_v58, %v3702_v11  ;;  %v4956_v11 = vld [vmem:[%s7190_s7 + $0x28] sm:$0xff]  }
0x12d0   :  { %5252 = vrsqrt.f32 %v3633_v10  ;;  %v3619_v21 = vmul.f32 0.03125, %v3579_v27  ;;  %v3620_v42 = vmul.f32 0.03125, %v3582_v32 }
0x12d1   :  { %5254 = vrsqrt.f32 %v3634_v31 }
0x12d2   :  { %v3635_v24 = vadd.f32 1e-05, %v3619_v21  ;;  %v3636_v33 = vadd.f32 1e-05, %v3620_v42 }
0x12d3   :  { %v3585_v49 = vpop.xlane.xlu1 %3584  ;;  %v3588_v6 = vpop.xlane.xlu0 %3587 }
0x12d4   :  { %5256 = vrsqrt.f32 %v3635_v24  ;;  %v3621_v35 = vmul.f32 0.03125, %v3585_v49  ;;  %v3622_v41 = vmul.f32 0.03125, %v3588_v6 }
0x12d5   :  { %5258 = vrsqrt.f32 %v3636_v33 }
0x12d6   :  { %v3637_v17 = vadd.f32 1e-05, %v3621_v35  ;;  %v3638_v2 = vadd.f32 1e-05, %v3622_v41 }
0x12d7   :  { %v3591_v46 = vpop.xlane.xlu1 %3590 }
0x12d8   :  { %5260 = vrsqrt.f32 %v3637_v17  ;;  %v3623_v54 = vmul.f32 0.03125, %v3591_v46 }
0x12d9   :  { %v5251_v3 = vpop.eup %5250  ;;  %5262 = vrsqrt.f32 %v3638_v2 }
0x12da   :  { %v3639_v5 = vadd.f32 1e-05, %v3623_v54  ;;  %v3664_v56 = vmul.f32 %v5251_v3, %v6871_v45 }
0x12dc   :  { %5264 = vrsqrt.f32 %v3639_v5  ;;  %v3684_v4 = vmul.f32 %v6993_v18, %v3664_v56  ;;  %v4954_v56 = vld [vmem:[%s7190_s7 + $0x38] sm:$0xff]  }
0x12dd   :  { %v5253_v63 = vpop.eup %5252  ;;  %4867 = vmatprep.subr.bf16.mxu1 %v4954_v56 }
0x12de   :  { %v5255_v8 = vpop.eup %5254  ;;  %v3665_v62 = vmul.f32 %v5253_v63, %v6889_v39  ;;  %v3704_v27 = vadd.f32 %v7000_v29, %v3684_v4  ;;  %4868 = vmatpush3.bf16.msra.mxu1 %v4954_v56  ;;  %v4957_v63 = vld [vmem:[%s7190_s7 + $0x20] sm:$0xff]   ;;  %v4960_v4 = vld [vmem:[%s7190_s7 + $0x8] sm:$0xff]  }
0x12df   :  { %v3666_v20 = vmul.f32 %v5255_v8, %v6884_v19  ;;  %v4958_v8 = vld [vmem:[%s7190_s7 + $0x18] sm:$0xff]  }
0x12e0   :  { %v3685_v12 = vmul.f32 %v6993_v18, %v3665_v62  ;;  %v4959_v62 = vld [vmem:[%s7190_s7 + $0x10] sm:$0xff]  }
0x12e1   :  { %v5257_v10 = vpop.eup %5256  ;;  %v3686_v45 = vmul.f32 %v6993_v18, %v3666_v20 }
0x12e2   :  { %v5259_v31 = vpop.eup %5258  ;;  %v3667_v23 = vmul.f32 %v5257_v10, %v6899_v15  ;;  %v3705_v32 = vadd.f32 %v7000_v29, %v3685_v12  ;;  %v4961_v10 = vld [vmem:[%s7190_s7] sm:$0xff]  }
0x12e3   :  { %v3668_v39 = vmul.f32 %v5259_v31, %v6902_v25  ;;  %v3706_v19 = vadd.f32 %v7000_v29, %v3686_v45 }
0x12e4   :  { %v3687_v21 = vmul.f32 %v6993_v18, %v3667_v23  ;;  %v3720_v58 = vpack.c.bf16 %v3705_v32, %v3704_v27 }
0x12e5   :  { %v5261_v42 = vpop.eup %5260  ;;  %v3688_v15 = vmul.f32 %v6993_v18, %v3668_v39 }
0x12e6   :  { %v5263_v24 = vpop.eup %5262  ;;  %4851 = vmatprep.mubr.msk.bf16.mxu0 %vm47_vm0, %v3720_v58  ;;  %v3707_v33 = vadd.f32 %v7000_v29, %v3687_v21  ;;  %v3669_v49 = vmul.f32 %v5261_v42, %v6920_v22 }
0x12e7   :  { %v3670_v6 = vmul.f32 %v5263_v24, %v6917_v50  ;;  %v3708_v55 = vadd.f32 %v7000_v29, %v3688_v15 }
0x12e8   :  { %v3721_v35 = vpack.c.bf16 %v3707_v33, %v3706_v19  ;;  %v3689_v25 = vmul.f32 %v6993_v18, %v3669_v49 }
0x12e9   :  { %v5265_v41 = vpop.eup %5264  ;;  %v3690_v46 = vmul.f32 %v6993_v18, %v3670_v6 }
0x12ea   :  { %4852 = vmatmul.mubr.msk.bf16.vlgmr.msra.gmra.mxu0 %vm47_vm0, %v3721_v35  ;;  %v3709_v17 = vadd.f32 %v7000_v29, %v3689_v25  ;;  %v3671_v2 = vmul.f32 %v5265_v41, %v6925_v60  ;;  %v4955_v60 = vld [vmem:[%s7190_s7 + $0x30] sm:$0xff]  }
0x12eb   :  { %v3710_v50 = vadd.f32 %v7000_v29, %v3690_v46  ;;  %4869 = vmatprep.subr.bf16.mxu1 %v4955_v60 }
0x12ec   :  { %v3722_v54 = vpack.c.bf16 %v3709_v17, %v3708_v55  ;;  %v3691_v22 = vmul.f32 %v6993_v18, %v3671_v2  ;;  %4870 = vmatpush3.bf16.msra.mxu1 %v4955_v60 }
0x12ed   :  { %4871 = vmatprep.subr.bf16.mxu1 %v4956_v11 }
0x12ee   :  { %4855 = vmatprep.mubr.msk.bf16.mxu0 %vm47_vm0, %v3722_v54  ;;  %v3711_v3 = vadd.f32 %v7000_v29, %v3691_v22 }
0x12f0   :  { %v3723_v5 = vpack.c.bf16 %v3711_v3, %v3710_v50  ;;  %4872 = vmatpush3.bf16.msra.mxu1 %v4956_v11 }
0x12f1   :  { %4873 = vmatprep.subr.bf16.mxu1 %v4957_v63 }
0x12f2   :  { %4856 = vmatmul.mubr.msk.bf16.gmra.mxu0 %vm47_vm0, %v3723_v5 }
0x12f4   :  { %4874 = vmatpush3.bf16.msra.mxu1 %v4957_v63 }
0x12f5   :  { %4875 = vmatprep.subr.bf16.mxu1 %v4958_v8 }
0x12f8   :  { %4876 = vmatpush3.bf16.msra.mxu1 %v4958_v8 }
0x12f9   :  { %4877 = vmatprep.subr.bf16.mxu1 %v4959_v62 }
0x12fc   :  { %4878 = vmatpush3.bf16.msra.mxu1 %v4959_v62 }
0x12fd   :  { %4879 = vmatprep.subr.bf16.mxu1 %v4960_v4 }
0x1300   :  { %4880 = vmatpush3.bf16.msra.mxu1 %v4960_v4 }
0x1301   :  { %4881 = vmatprep.subr.bf16.mxu1 %v4961_v10 }
0x1304   :  { %4882 = vmatpush3.bf16.msra.mxu1 %v4961_v10 }
0x1345   :  { %v3594_v20 = vpop.xlane.xlu0 %3593 }
0x1346   :  { %v3624_v12 = vmul.f32 0.03125, %v3594_v20 }
0x1348   :  { %v3640_v31 = vadd.f32 1e-05, %v3624_v12 }
0x1349   :  { %v3597_v45 = vpop.xlane.xlu1 %3596  ;;  %v3600_v23 = vpop.xlane.xlu0 %3599 }
0x134a   :  { %5266 = vrsqrt.f32 %v3640_v31  ;;  %v3625_v27 = vmul.f32 0.03125, %v3597_v45  ;;  %v3626_v32 = vmul.f32 0.03125, %v3600_v23 }
0x134c   :  { %v3641_v39 = vadd.f32 1e-05, %v3625_v27  ;;  %v3642_v21 = vadd.f32 1e-05, %v3626_v32 }
0x134d   :  { %v3603_v58 = vpop.xlane.xlu1 %3602 }
0x134e   :  { %5268 = vrsqrt.f32 %v3641_v39  ;;  %v3627_v42 = vmul.f32 0.03125, %v3603_v58 }
0x134f   :  { %5270 = vrsqrt.f32 %v3642_v21 }
0x1350   :  { %v3643_v24 = vadd.f32 1e-05, %v3627_v42  ;;  %v3606_v19 = vpop.xlane.xlu0 %3605 }
0x1351   :  { %v3628_v33 = vmul.f32 0.03125, %v3606_v19 }
0x1352   :  { %5272 = vrsqrt.f32 %v3643_v24 }
0x1353   :  { %v3644_v49 = vadd.f32 1e-05, %v3628_v33 }
0x1354   :  { %v3609_v15 = vpop.xlane.xlu1 %3608  ;;  %v3612_v6 = vpop.xlane.xlu0 %3611 }
0x1355   :  { %5274 = vrsqrt.f32 %v3644_v49  ;;  %v3629_v35 = vmul.f32 0.03125, %v3609_v15  ;;  %v3630_v25 = vmul.f32 0.03125, %v3612_v6  ;;  %v7082_v6 = vld [vmem:[%s7191_s6] ss:$0 sm:$0xff] }
0x1357   :  { %v5267_v41 = vpop.eup %5266  ;;  %v3645_v55 = vadd.f32 1e-05, %v3629_v35  ;;  %v3646_v17 = vadd.f32 1e-05, %v3630_v25 }
0x1358   :  { %v3615_v2 = vpop.xlane.xlu1 %3614  ;;  %v3672_v46 = vmul.f32 %v5267_v41, %v6944_v44 }
0x1359   :  { %5276 = vrsqrt.f32 %v3645_v55  ;;  %v3631_v54 = vmul.f32 0.03125, %v3615_v2 }
0x135a   :  { %5278 = vrsqrt.f32 %v3646_v17  ;;  %v3692_v56 = vmul.f32 %v6993_v18, %v3672_v46 }
0x135b   :  { %v5269_v22 = vpop.eup %5268  ;;  %v3647_v50 = vadd.f32 1e-05, %v3631_v54 }
0x135c   :  { %v5271_v3 = vpop.eup %5270  ;;  %v3673_v5 = vmul.f32 %v5269_v22, %v6949_v53  ;;  %v3712_v8 = vadd.f32 %v7000_v29, %v3692_v56 }
0x135d   :  { %5280 = vrsqrt.f32 %v3647_v50  ;;  %v3674_v60 = vmul.f32 %v5271_v3, %v6952_v37 }
0x135e   :  { %v3693_v11 = vmul.f32 %v6993_v18, %v3673_v5 }
0x135f   :  { %v5273_v63 = vpop.eup %5272  ;;  %v3694_v4 = vmul.f32 %v6993_v18, %v3674_v60 }
0x1360   :  { %v3713_v44 = vadd.f32 %v7000_v29, %v3693_v11  ;;  %v3675_v62 = vmul.f32 %v5273_v63, %v6960_v13 }
0x1361   :  { %v3714_v37 = vadd.f32 %v7000_v29, %v3694_v4 }
0x1362   :  { %v5275_v20 = vpop.eup %5274  ;;  %v3724_v12 = vpack.c.bf16 %v3713_v44, %v3712_v8  ;;  %v3695_v53 = vmul.f32 %v6993_v18, %v3675_v62 }
0x1363   :  { %v3676_v10 = vmul.f32 %v5275_v20, %v6967_v47 }
0x1364   :  { %4859 = vmatprep.mubr.msk.bf16.mxu0 %vm47_vm0, %v3724_v12  ;;  %v3715_v31 = vadd.f32 %v7000_v29, %v3695_v53 }
0x1365   :  { %v3696_v13 = vmul.f32 %v6993_v18, %v3676_v10 }
0x1366   :  { %v5277_v45 = vpop.eup %5276  ;;  %v3725_v23 = vpack.c.bf16 %v3715_v31, %v3714_v37 }
0x1367   :  { %v5279_v27 = vpop.eup %5278  ;;  %v3677_v32 = vmul.f32 %v5277_v45, %v6973_v61  ;;  %v3716_v58 = vadd.f32 %v7000_v29, %v3696_v13 }
0x1368   :  { %4860 = vmatmul.mubr.msk.bf16.gmra.mxu0 %vm47_vm0, %v3725_v23  ;;  %v3678_v39 = vmul.f32 %v5279_v27, %v6976_v40 }
0x1369   :  { %v3697_v21 = vmul.f32 %v6993_v18, %v3677_v32 }
0x136a   :  { %v5281_v47 = vpop.eup %5280  ;;  %v3698_v19 = vmul.f32 %v6993_v18, %v3678_v39 }
0x136b   :  { %v3717_v42 = vadd.f32 %v7000_v29, %v3697_v21  ;;  %v3679_v24 = vmul.f32 %v5281_v47, %v6984_v59 }
0x136c   :  { %v3718_v49 = vadd.f32 %v7000_v29, %v3698_v19 }
0x136d   :  { %v3726_v33 = vpack.c.bf16 %v3717_v42, %v3716_v58  ;;  %v3699_v61 = vmul.f32 %v6993_v18, %v3679_v24 }
0x136f   :  { %4863 = vmatprep.mubr.msk.bf16.mxu0 %vm47_vm0, %v3726_v33  ;;  %v3719_v40 = vadd.f32 %v7000_v29, %v3699_v61 }
0x1371   :  { %v3727_v15 = vpack.c.bf16 %v3719_v40, %v3718_v49 }
0x1373   :  { %4864 = vmatmul.mubr.msk.bf16.gmra.mxu0 %vm47_vm0, %v3727_v15 }
0x13aa   :  { %v4853_v59 = vpop.f32.mrf.mxu0 }
0x13ab   :  { %v3818_v35 = vadd.f32 %v4853_v59, %v7082_v6 }
0x13ac   :  { %v3809_v25 = vpop.f32.mrf.mxu0 }
0x13ad   :  { %v3810_v18 = vadd.f32 %v7082_v6, %v3809_v25  ;;  %v3890_v41 = vmul.f32 0.70710677, %v3818_v35  ;;  %v3874_v21 = vmul.f32 0.5, %v3818_v35 }
0x13ae   :  { %v4854_v55 = vpop.f32.mrf.mxu0 }
0x13af   :  { %v3888_v17 = vmul.f32 0.70710677, %v3810_v18  ;;  %v3821_v2 = vadd.f32 %v4854_v55, %v7082_v6  ;;  %v3872_v32 = vmul.f32 0.5, %v3810_v18 }
0x13b0   :  { %v3812_v29 = vpop.f32.mrf.mxu0 }
0x13b1   :  { %5282 = verf.f32 %v3888_v17  ;;  %v3891_v46 = vmul.f32 0.70710677, %v3821_v2  ;;  %v3813_v54 = vadd.f32 %v7082_v6, %v3812_v29  ;;  %v3875_v27 = vmul.f32 0.5, %v3821_v2 }
0x13b2   :  { %5284 = verf.f32 %v3890_v41  ;;  %v4857_v22 = vpop.f32.mrf.mxu0 }
0x13b3   :  { %5286 = verf.f32 %v3891_v46  ;;  %v3889_v50 = vmul.f32 0.70710677, %v3813_v54  ;;  %v3834_v3 = vadd.f32 %v4857_v22, %v7082_v6  ;;  %v3873_v13 = vmul.f32 0.5, %v3813_v54 }
0x13b4   :  { %v3825_v5 = vpop.f32.mrf.mxu0 }
0x13b5   :  { %5288 = verf.f32 %v3889_v50  ;;  %v3826_v56 = vadd.f32 %v7082_v6, %v3825_v5  ;;  %v3894_v60 = vmul.f32 0.70710677, %v3834_v3  ;;  %v3878_v35 = vmul.f32 0.5, %v3834_v3 }
0x13b6   :  { %v4858_v11 = vpop.f32.mrf.mxu0 }
0x13b7   :  { %v3892_v63 = vmul.f32 0.70710677, %v3826_v56  ;;  %v3837_v8 = vadd.f32 %v4858_v11, %v7082_v6  ;;  %v3876_v18 = vmul.f32 0.5, %v3826_v56 }
0x13b8   :  { %v3828_v44 = vpop.f32.mrf.mxu0 }
0x13b9   :  { %5290 = verf.f32 %v3892_v63  ;;  %v3895_v62 = vmul.f32 0.70710677, %v3837_v8  ;;  %v3829_v4 = vadd.f32 %v7082_v6, %v3828_v44  ;;  %v3879_v55 = vmul.f32 0.5, %v3837_v8 }
0x13ba   :  { %5292 = verf.f32 %v3894_v60 }
0x13bb   :  { %5294 = verf.f32 %v3895_v62  ;;  %v3893_v20 = vmul.f32 0.70710677, %v3829_v4  ;;  %v3877_v17 = vmul.f32 0.5, %v3829_v4 }
0x13bd   :  { %5296 = verf.f32 %v3893_v20 }
0x13be   :  { %v5283_v12 = vpop.eup %5282 }
0x13bf   :  { %v5285_v53 = vpop.eup %5284  ;;  %v3920_v37 = vadd.f32 1.0, %v5283_v12 }
0x13c0   :  { %v5287_v10 = vpop.eup %5286  ;;  %v3922_v23 = vadd.f32 1.0, %v5285_v53 }
0x13c1   :  { %v3923_v31 = vadd.f32 1.0, %v5287_v10  ;;  %v3936_v58 = vmul.f32 %v3920_v37, %v3872_v32 }
0x13c2   :  { %v5289_v45 = vpop.eup %5288  ;;  %v3938_v19 = vmul.f32 %v3922_v23, %v3874_v21 }
0x13c3   :  { %v3921_v39 = vadd.f32 1.0, %v5289_v45  ;;  %v3939_v47 = vmul.f32 %v3923_v31, %v3875_v27 }
0x13c5   :  { %v3937_v42 = vmul.f32 %v3921_v39, %v3873_v13  ;;  %v3953_v40 = vpack.c.bf16 %v3939_v47, %v3938_v19 }
0x13c6   :  { %v5291_v24 = vpop.eup %5290 }
0x13c7   :  { %v5293_v33 = vpop.eup %5292  ;;  %v3952_v61 = vpack.c.bf16 %v3937_v42, %v3936_v58  ;;  %v3924_v15 = vadd.f32 1.0, %v5291_v24 }
0x13c8   :  { %v5295_v49 = vpop.eup %5294  ;;  %v3926_v41 = vadd.f32 1.0, %v5293_v33 }
0x13c9   :  { %v3927_v59 = vadd.f32 1.0, %v5295_v49  ;;  %4883 = vmatprep.mubr.bf16.mxu1 %v3952_v61  ;;  %v3940_v46 = vmul.f32 %v3924_v15, %v3876_v18 }
0x13ca   :  { %v5297_v25 = vpop.eup %5296  ;;  %4884 = vmatmul.mubr.bf16.vlgmr.msra.gmra.mxu1 %v3953_v40  ;;  %v3942_v22 = vmul.f32 %v3926_v41, %v3878_v35 }
0x13cb   :  { %v3925_v2 = vadd.f32 1.0, %v5297_v25  ;;  %v3943_v29 = vmul.f32 %v3927_v59, %v3879_v55 }
0x13cd   :  { %v3941_v54 = vmul.f32 %v3925_v2, %v3877_v17  ;;  %v3955_v5 = vpack.c.bf16 %v3943_v29, %v3942_v22 }
0x13cf   :  { %v3954_v50 = vpack.c.bf16 %v3941_v54, %v3940_v46 }
0x13d1   :  { %4887 = vmatprep.mubr.bf16.mxu1 %v3954_v50 }
0x13d2   :  { %4888 = vmatmul.mubr.bf16.gmra.mxu1 %v3955_v5 }
0x1428   :  { %v4861_v60 = vpop.f32.mrf.mxu0 }
0x1429   :  { %v3850_v11 = vadd.f32 %v4861_v60, %v7082_v6 }
0x142a   :  { %v3841_v63 = vpop.f32.mrf.mxu0 }
0x142b   :  { %v3842_v44 = vadd.f32 %v7082_v6, %v3841_v63  ;;  %v3898_v8 = vmul.f32 0.70710677, %v3850_v11  ;;  %v3882_v55 = vmul.f32 0.5, %v3850_v11 }
0x142c   :  { %v4862_v62 = vpop.f32.mrf.mxu0 }
0x142d   :  { %v3896_v56 = vmul.f32 0.70710677, %v3842_v44  ;;  %v3853_v4 = vadd.f32 %v4862_v62, %v7082_v6  ;;  %v3880_v59 = vmul.f32 0.5, %v3842_v44 }
0x142e   :  { %v3844_v3 = vpop.f32.mrf.mxu0 }
0x142f   :  { %5298 = verf.f32 %v3896_v56  ;;  %v3899_v20 = vmul.f32 0.70710677, %v3853_v4  ;;  %v3845_v12 = vadd.f32 %v7082_v6, %v3844_v3  ;;  %v3883_v15 = vmul.f32 0.5, %v3853_v4 }
0x1430   :  { %5300 = verf.f32 %v3898_v8 }
0x1431   :  { %5302 = verf.f32 %v3899_v20  ;;  %v3897_v53 = vmul.f32 0.70710677, %v3845_v12  ;;  %v3881_v25 = vmul.f32 0.5, %v3845_v12 }
0x1433   :  { %5304 = verf.f32 %v3897_v53  ;;  %v4865_v10 = vpop.f32.mrf.mxu0 }
0x1434   :  { %v3866_v37 = vadd.f32 %v4865_v10, %v7082_v6 }
0x1435   :  { %v3857_v31 = vpop.f32.mrf.mxu0 }
0x1436   :  { %v3858_v45 = vadd.f32 %v7082_v6, %v3857_v31  ;;  %v3902_v23 = vmul.f32 0.70710677, %v3866_v37  ;;  %v3886_v11 = vmul.f32 0.5, %v3866_v37  ;;  %v3978_v31 = vsub.s32 5, %v5511_v26 }
0x1437   :  { %v4866_v27 = vpop.f32.mrf.mxu0 }
0x1438   :  { %v3900_v32 = vmul.f32 0.70710677, %v3858_v45  ;;  %v3869_v13 = vadd.f32 %v4866_v27, %v7082_v6  ;;  %v3884_v44 = vmul.f32 0.5, %v3858_v45 }
0x1439   :  { %v3860_v39 = vpop.f32.mrf.mxu0 }
0x143a   :  { %5306 = verf.f32 %v3900_v32  ;;  %v3903_v21 = vmul.f32 0.70710677, %v3869_v13  ;;  %v3861_v47 = vadd.f32 %v7082_v6, %v3860_v39  ;;  %v3887_v8 = vmul.f32 0.5, %v3869_v13 }
0x143b   :  { %5308 = verf.f32 %v3902_v23  ;;  %v5320_v23 = vld [vmem:[%s7186_s1] sm:$0x3f] }
0x143c   :  { %v5299_v58 = vpop.eup %5298  ;;  %5310 = verf.f32 %v3903_v21  ;;  %v3901_v42 = vmul.f32 0.70710677, %v3861_v47  ;;  %v3885_v62 = vmul.f32 0.5, %v3861_v47  ;;  %v3979_v27 = vrot.slane %v5320_v23, %v3978_v31 }
0x143d   :  { %v5301_v24 = vpop.eup %5300  ;;  %v3928_v33 = vadd.f32 1.0, %v5299_v58 }
0x143e   :  { %v5303_v19 = vpop.eup %5302  ;;  %5312 = verf.f32 %v3901_v42  ;;  %v3930_v40 = vadd.f32 1.0, %v5301_v24 }
0x143f   :  { %v3931_v61 = vadd.f32 1.0, %v5303_v19  ;;  %v3944_v17 = vmul.f32 %v3928_v33, %v3880_v59 }
0x1440   :  { %v5305_v49 = vpop.eup %5304  ;;  %v3946_v6 = vmul.f32 %v3930_v40, %v3882_v55 }
0x1441   :  { %v3929_v41 = vadd.f32 1.0, %v5305_v49  ;;  %v3947_v18 = vmul.f32 %v3931_v61, %v3883_v15 }
0x1443   :  { %v3945_v2 = vmul.f32 %v3929_v41, %v3881_v25  ;;  %v3957_v29 = vpack.c.bf16 %v3947_v18, %v3946_v6 }
0x1445   :  { %v3956_v35 = vpack.c.bf16 %v3945_v2, %v3944_v17 }
0x1447   :  { %v5307_v46 = vpop.eup %5306  ;;  %4891 = vmatprep.mubr.bf16.mxu1 %v3956_v35 }
0x1448   :  { %v5309_v54 = vpop.eup %5308  ;;  %4892 = vmatmul.mubr.bf16.gmra.mxu1 %v3957_v29  ;;  %v3932_v50 = vadd.f32 1.0, %v5307_v46 }
0x1449   :  { %v5311_v22 = vpop.eup %5310  ;;  %v3934_v63 = vadd.f32 1.0, %v5309_v54 }
0x144a   :  { %v3935_v5 = vadd.f32 1.0, %v5311_v22  ;;  %v3948_v3 = vmul.f32 %v3932_v50, %v3884_v44 }
0x144b   :  { %v5313_v60 = vpop.eup %5312  ;;  %v3950_v12 = vmul.f32 %v3934_v63, %v3886_v11 }
0x144c   :  { %v3933_v56 = vadd.f32 1.0, %v5313_v60  ;;  %v3951_v4 = vmul.f32 %v3935_v5, %v3887_v8 }
0x144e   :  { %v3949_v20 = vmul.f32 %v3933_v56, %v3885_v62  ;;  %v3959_v10 = vpack.c.bf16 %v3951_v4, %v3950_v12 }
0x1450   :  { %v3958_v53 = vpack.c.bf16 %v3949_v20, %v3948_v3 }
0x1452   :  { %4895 = vmatprep.mubr.bf16.mxu1 %v3958_v53 }
0x1453   :  { %4896 = vmatmul.mubr.bf16.gmra.mxu1 %v3959_v10 }
0x148a   :  { %v4885_v32 = vpop.f32.mrf.mxu1 }
0x148b   :  { %v4071_v45 = vadd.f32 %v4885_v32, %v3979_v27 }
0x148c   :  { %v4062_v13 = vpop.f32.mrf.mxu1 }
0x148d   :  { %v4127_v37 = vadd.f32 %v4071_v45, %v6722_v43  ;;  %v4063_v39 = vadd.f32 %v4062_v13, %v3979_v27 }
0x148e   :  { %v4886_v21 = vpop.f32.mrf.mxu1 }
0x148f   :  { %4143 = vst.msk [vmem:[%s7192_s8 + $0x10] sm:$0xff] %vm47_vm0, %v4127_v37  ;;  %v4125_v47 = vadd.f32 %v4063_v39, %v6717_v52  ;;  %v4074_v26 = vadd.f32 %v4886_v21, %v3979_v27 }
0x1490   :  { %v4065_v58 = vpop.f32.mrf.mxu1 }
0x1491   :  { %4141 = vst.msk [vmem:[%s7192_s8] sm:$0xff] %vm47_vm0, %v4125_v47  ;;  %v4128_v42 = vadd.f32 %v4074_v26, %v6731_v28  ;;  %v4066_v24 = vadd.f32 %v4065_v58, %v3979_v27 }
0x1492   :  { %v4889_v43 = vpop.f32.mrf.mxu1 }
0x1493   :  { %4144 = vst.msk [vmem:[%s7192_s8 + $0x18] sm:$0xff] %vm47_vm0, %v4128_v42  ;;  %v4126_v19 = vadd.f32 %v4066_v24, %v6772_v14  ;;  %v4087_v33 = vadd.f32 %v4889_v43, %v3979_v27 }
0x1494   :  { %v4078_v52 = vpop.f32.mrf.mxu1 }
0x1495   :  { %4142 = vst.msk [vmem:[%s7192_s8 + $0x8] sm:$0xff] %vm47_vm0, %v4126_v19  ;;  %v4131_v61 = vadd.f32 %v4087_v33, %v6745_v36  ;;  %v4079_v49 = vadd.f32 %v4078_v52, %v3979_v27 }
0x1496   :  { %v4890_v28 = vpop.f32.mrf.mxu1 }
0x1497   :  { %4147 = vst.msk [vmem:[%s7192_s8 + $0x30] sm:$0xff] %vm47_vm0, %v4131_v61  ;;  %v4129_v40 = vadd.f32 %v4079_v49, %v6740_v7  ;;  %v4090_v15 = vadd.f32 %v4890_v28, %v3979_v27 }
0x1498   :  { %v4081_v14 = vpop.f32.mrf.mxu1 }
0x1499   :  { %4145 = vst.msk [vmem:[%s7192_s8 + $0x20] sm:$0xff] %vm47_vm0, %v4129_v40  ;;  %v4132_v59 = vadd.f32 %v4090_v15, %v6788_v16  ;;  %v4082_v25 = vadd.f32 %v4081_v14, %v3979_v27 }
0x149b   :  { %4148 = vst.msk [vmem:[%s7192_s8 + $0x38] sm:$0xff] %vm47_vm0, %v4132_v59  ;;  %v4130_v36 = vadd.f32 %v4082_v25, %v6781_v30 }
0x149d   :  { %4146 = vst.msk [vmem:[%s7192_s8 + $0x28] sm:$0xff] %vm47_vm0, %v4130_v36 }
0x1508   :  { %v4893_v7 = vpop.f32.mrf.mxu1 }
0x1509   :  { %v4103_v41 = vadd.f32 %v4893_v7, %v3979_v27 }
0x150a   :  { %v4094_v55 = vpop.f32.mrf.mxu1 }
0x150b   :  { %v4135_v18 = vadd.f32 %v4103_v41, %v6847_v48  ;;  %v4095_v17 = vadd.f32 %v4094_v55, %v3979_v27 }
0x150c   :  { %v4894_v16 = vpop.f32.mrf.mxu1 }
0x150d   :  { %4151 = vst.msk [vmem:[%s7192_s8 + $0x50] sm:$0xff] %vm47_vm0, %v4135_v18  ;;  %v4133_v2 = vadd.f32 %v4095_v17, %v6844_v9  ;;  %v4106_v30 = vadd.f32 %v4894_v16, %v3979_v27 }
0x150e   :  { %v4097_v6 = vpop.f32.mrf.mxu1 }
0x150f   :  { %4149 = vst.msk [vmem:[%s7192_s8 + $0x40] sm:$0xff] %vm47_vm0, %v4133_v2  ;;  %v4136_v35 = vadd.f32 %v4106_v30, %v6857_v38  ;;  %v4098_v29 = vadd.f32 %v4097_v6, %v3979_v27 }
0x1511   :  { %4152 = vst.msk [vmem:[%s7192_s8 + $0x58] sm:$0xff] %vm47_vm0, %v4136_v35  ;;  %v4134_v48 = vadd.f32 %v4098_v29, %v6854_v57 }
0x1513   :  { %4150 = vst.msk [vmem:[%s7192_s8 + $0x48] sm:$0xff] %vm47_vm0, %v4134_v48  ;;  %v4897_v9 = vpop.f32.mrf.mxu1 }
0x1514   :  { %v4119_v46 = vadd.f32 %v4897_v9, %v3979_v27 }
0x1515   :  { %v4110_v54 = vpop.f32.mrf.mxu1 }
0x1516   :  { %v4139_v22 = vadd.f32 %v4119_v46, %v6874_v0  ;;  %v4111_v50 = vadd.f32 %v4110_v54, %v3979_v27 }
0x1517   :  { %v4898_v38 = vpop.f32.mrf.mxu1 }
0x1518   :  { %4155 = vst.msk [vmem:[%s7192_s8 + $0x70] sm:$0xff] %vm47_vm0, %v4139_v22  ;;  %v4137_v5 = vadd.f32 %v4111_v50, %v6868_v1  ;;  %v4122_v57 = vadd.f32 %v4898_v38, %v3979_v27 }
0x1519   :  { %v4113_v60 = vpop.f32.mrf.mxu1 }
0x151a   :  { %4153 = vst.msk [vmem:[%s7192_s8 + $0x60] sm:$0xff] %vm47_vm0, %v4137_v5  ;;  %v4140_v63 = vadd.f32 %v4122_v57, %v6892_v51  ;;  %v4114_v8 = vadd.f32 %v4113_v60, %v3979_v27 }
0x151c   :  { %4156 = vst.msk [vmem:[%s7192_s8 + $0x78] sm:$0xff] %vm47_vm0, %v4140_v63  ;;  %v4138_v0 = vadd.f32 %v4114_v8, %v6881_v34 }
0x151e   :  { %4154 = vst.msk [vmem:[%s7192_s8 + $0x68] sm:$0xff] %vm47_vm0, %v4138_v0 }

</bundles_post_ra>
